<compile_context>
chip_gen: v7x
topology: tpu7x:2x2x1
jax: 0.10.0
libtpu: 0.0.40
codegen_flags: <defaults>
</compile_context>

<pallas_src>
import jax
import jax.numpy as jnp
from jax.experimental import pallas as pl
from jax.experimental.pallas import tpu as pltpu

LANE = 128  # TPU lane width


def _round_up(x, m):
    return (x + m - 1) // m * m


def _pick_batch_tile(B, T, HP):
    """Large batch tiles amortize the serial recurrence; keep >=2 grid tiles
    when the batch allows (dual-TC chips) and bound per-tile VMEM scratch."""
    bp8 = _round_up(max(B, 1), 8)
    if bp8 <= 8:
        bt = 8
    else:
        bt = min(128, _round_up((bp8 + 1) // 2, 8))
    # per batch-row scratch bytes: bf16 x (2 dirs x 4HP) + f32 h (2 dirs x HP)
    per_row_bytes = T * (2 * (4 * HP) * 2 + 2 * HP * 4)
    bt_cap = max(8, ((24 << 20) // max(per_row_bytes, 1)) // 8 * 8)
    return int(max(8, min(bt, bt_cap)))


# ----------------------------------------------------------------------------
# Pallas kernel
# ----------------------------------------------------------------------------
def _rnn_attn_kernel(
    emb_ref,     # (1, T*BT, EP)  bf16  per-tile, time-major embeddings
    len_ref,     # (BT, 1)        i32   per-row sequence lengths
    wih_ref,     # (EP, 8*HP)     bf16  [fwd | bwd] input->gate weights
    whh_f_ref,   # (HP, 4*HP)     bf16  fwd hidden->gate weights
    whh_b_ref,   # (HP, 4*HP)     bf16  bwd hidden->gate weights
    bias_ref,    # (1, 8*HP)      f32   [fwd | bwd] gate biases (b_ih + b_hh)
    watt_ref,    # (2*HP, AP)     bf16  word_attention weight
    batt_ref,    # (1, AP)        f32   word_attention bias
    wctx_ref,    # (1, AP)        f32   word_context_vector weight
    wcls_ref,    # (2*HP, LP)     bf16  classifier weight
    bcls_ref,    # (1, LP)        f32   classifier bias
    logits_ref,  # (BT, LP)       f32   output
    sent_ref,    # (BT, 2*HP)     f32   output ("sentences")
    xf_ref,      # (T, BT, 4*HP)  bf16  scratch: fwd input projections
    xb_ref,      # (T, BT, 4*HP)  bf16  scratch: bwd input projections
    hf_ref,      # (T, BT, HP)    f32   scratch: fwd LSTM outputs
    hb_ref,      # (T, BT, HP)    f32   scratch: bwd LSTM outputs
):
    BT = len_ref.shape[0]
    TB = emb_ref.shape[1]
    T = TB // BT
    HP = whh_f_ref.shape[0]
    AP = watt_ref.shape[1]
    G4 = 4 * HP

    # ---- bulk input projection: ONE MXU matmul covers both directions ------
    e2 = emb_ref[0]                                            # (TB, EP) bf16
    x_all = jnp.dot(e2, wih_ref[...], preferred_element_type=jnp.float32)
    xf_ref[...] = x_all[:, :G4].reshape(T, BT, G4).astype(jnp.bfloat16)
    xb_ref[...] = x_all[:, G4:].reshape(T, BT, G4).astype(jnp.bfloat16)

    len_col = len_ref[...]                                     # (BT, 1) i32
    b_f = bias_ref[:, :G4]                                     # f32 bias, added per step
    b_b = bias_ref[:, G4:]
    zeros_h = jnp.zeros((BT, HP), jnp.float32)

    def half_step(x_row, valid, h, c, whh_ref):
        # Only the recurrent matmul + gate math sit on the serialized path.
        gates = x_row + jnp.dot(h.astype(jnp.bfloat16), whh_ref[...],
                                preferred_element_type=jnp.float32)
        i_g = jax.nn.sigmoid(gates[:, 0 * HP:1 * HP])          # 128-lane aligned
        f_g = jax.nn.sigmoid(gates[:, 1 * HP:2 * HP])
        g_g = jnp.tanh(gates[:, 2 * HP:3 * HP])
        o_g = jax.nn.sigmoid(gates[:, 3 * HP:4 * HP])
        c_new = f_g * c + i_g * g_g
        h_new = o_g * jnp.tanh(c_new)
        h_out = jnp.where(valid, h_new, 0.0)      # pad_packed -> zeros on padding
        return jnp.where(valid, h_new, h), jnp.where(valid, c_new, c), h_out

    # ---- fused fwd/bwd recurrence (independent chains interleaved) ---------
    def body(t, carry):
        hf, cf, hb, cb = carry
        tb = T - 1 - t

        xf_row = xf_ref[t].astype(jnp.float32) + b_f
        hf, cf, hf_out = half_step(xf_row, t < len_col, hf, cf, whh_f_ref)
        hf_ref[t] = hf_out

        xb_row = xb_ref[tb].astype(jnp.float32) + b_b
        hb, cb, hb_out = half_step(xb_row, tb < len_col, hb, cb, whh_b_ref)
        hb_ref[tb] = hb_out
        return hf, cf, hb, cb

    unroll = True if T <= 32 else 8
    jax.lax.fori_loop(0, T, body, (zeros_h, zeros_h, zeros_h, zeros_h),
                      unroll=unroll)

    # ---- word attention: single bulk matmul over both directions -----------
    hf2 = hf_ref[...].reshape(TB, HP)
    hb2 = hb_ref[...].reshape(TB, HP)
    h2 = jnp.concatenate([hf2, hb2], axis=-1).astype(jnp.bfloat16)   # (TB, 2HP)
    u = jnp.tanh(jnp.dot(h2, watt_ref[...], preferred_element_type=jnp.float32)
                 + batt_ref[...])                                    # (TB, AP)
    w = (u * wctx_ref[...]).reshape(T, BT, AP)
    score = jnp.sum(w, axis=-1, keepdims=True)                       # (T, BT, 1)

    # ---- masked softmax over time (validity derived from lengths) ----------
    t_iota = jax.lax.broadcasted_iota(jnp.int32, (T, BT, 1), 0)
    valid = t_iota < len_col[None, :, :]
    smax = jnp.max(jnp.where(valid, score, jnp.float32(-1e30)),
                   axis=0, keepdims=True)
    e = jnp.where(valid, jnp.exp(score - smax), 0.0)
    denom = jnp.maximum(jnp.sum(e, axis=0, keepdims=True), jnp.float32(1e-30))
    alpha = e * pl.reciprocal(denom, approx=True)                    # (T, BT, 1)

    # ---- attention-weighted sentence vectors + classifier (one matmul) -----
    sent_f = jnp.sum(hf_ref[...] * alpha, axis=0)                    # (BT, HP)
    sent_b = jnp.sum(hb_ref[...] * alpha, axis=0)
    sent = jnp.concatenate([sent_f, sent_b], axis=-1)                # (BT, 2HP)
    logits = (jnp.dot(sent.astype(jnp.bfloat16), wcls_ref[...],
                      preferred_element_type=jnp.float32) + bcls_ref[...])

    logits_ref[...] = logits
    sent_ref[...] = sent


# ----------------------------------------------------------------------------
# Weight repacking helpers (gate-block aligned, zero-padded)
# ----------------------------------------------------------------------------
def _pack_gates_ih(w, e_pad, h, h_pad):
    # w: (4H, E) torch layout (gates i,f,g,o) -> (Ep, 4Hp), gate k at lanes [k*Hp, k*Hp+H)
    E = w.shape[1]
    out = jnp.zeros((e_pad, 4 * h_pad), jnp.float32)
    for k in range(4):
        out = out.at[:E, k * h_pad:k * h_pad + h].set(w[k * h:(k + 1) * h, :].T)
    return out


def _pack_gates_hh(w, h, h_pad):
    out = jnp.zeros((h_pad, 4 * h_pad), jnp.float32)
    for k in range(4):
        out = out.at[:h, k * h_pad:k * h_pad + h].set(w[k * h:(k + 1) * h, :].T)
    return out


def _pack_gates_bias(b, h, h_pad):
    out = jnp.zeros((1, 4 * h_pad), jnp.float32)
    for k in range(4):
        out = out.at[0, k * h_pad:k * h_pad + h].set(b[k * h:(k + 1) * h])
    return out


# ----------------------------------------------------------------------------
# Wrapper (plain-JAX glue: embedding gather, padding, repacking)
# ----------------------------------------------------------------------------
@jax.jit
def rnn_multilabel_forward(input_ids, attention_mask, params):
    B, T = input_ids.shape
    E = params["emb_table"].shape[1]
    H = params["W_hh_f"].shape[1]
    A = params["W_att"].shape[0]
    L = params["W_cls"].shape[0]

    EP = _round_up(E, LANE)
    HP = _round_up(H, LANE)
    AP = _round_up(A, LANE)
    LP = _round_up(L, LANE)
    G4 = 4 * HP

    BT = _pick_batch_tile(B, T, HP)
    BP = _round_up(max(B, BT), BT)
    NT = BP // BT

    bf16 = jnp.bfloat16

    # Embedding lookup (nn.Embedding), pad, and lay out per batch-tile as
    # (NT, T*BT, EP) so the kernel needs no packed-dtype reshapes.
    emb = jnp.take(params["emb_table"], input_ids, axis=0)            # (B, T, E)
    emb_p = jnp.zeros((BP, T, EP), jnp.float32).at[:B, :, :E].set(emb)
    emb_p = (emb_p.reshape(NT, BT, T, EP)
                  .transpose(0, 2, 1, 3)
                  .reshape(NT, T * BT, EP)
                  .astype(bf16))

    lengths = attention_mask.astype(jnp.int32).sum(axis=1)            # (B,)
    len_p = jnp.zeros((BP, 1), jnp.int32).at[:B, 0].set(lengths)

    # LSTM weights: both directions fused for the bulk input projection.
    wih = jnp.concatenate(
        [_pack_gates_ih(params["W_ih_f"], EP, H, HP),
         _pack_gates_ih(params["W_ih_b"], EP, H, HP)], axis=1).astype(bf16)
    whh_f = _pack_gates_hh(params["W_hh_f"], H, HP).astype(bf16)
    whh_b = _pack_gates_hh(params["W_hh_b"], H, HP).astype(bf16)
    bias = jnp.concatenate(
        [_pack_gates_bias(params["b_ih_f"] + params["b_hh_f"], H, HP),
         _pack_gates_bias(params["b_ih_b"] + params["b_hh_b"], H, HP)], axis=1)

    watt_t = params["W_att"].T                                        # (2H, A)
    watt = jnp.zeros((2 * HP, AP), jnp.float32)
    watt = watt.at[:H, :A].set(watt_t[:H]).at[HP:HP + H, :A].set(watt_t[H:])
    watt = watt.astype(bf16)
    batt = jnp.zeros((1, AP), jnp.float32).at[0, :A].set(params["b_att"])
    wctx = jnp.zeros((1, AP), jnp.float32).at[0, :A].set(params["W_ctx"][0])

    wcls_t = params["W_cls"].T                                        # (2H, L)
    wcls = jnp.zeros((2 * HP, LP), jnp.float32)
    wcls = wcls.at[:H, :L].set(wcls_t[:H]).at[HP:HP + H, :L].set(wcls_t[H:])
    wcls = wcls.astype(bf16)
    bcls = jnp.zeros((1, LP), jnp.float32).at[0, :L].set(params["b_cls"])

    inputs = (emb_p, len_p, wih, whh_f, whh_b, bias, watt, batt, wctx,
              wcls, bcls)

    # NOTE: weight blocks have constant index maps; single-buffering them via
    # pipeline_mode=pl.Buffered(1) would save a little VMEM at large H.
    def _rep_spec(shape):
        n = len(shape)
        return pl.BlockSpec(shape, lambda i, _n=n: (0,) * _n)

    in_specs = [
        pl.BlockSpec((1, T * BT, EP), lambda i: (i, 0, 0)),
        pl.BlockSpec((BT, 1), lambda i: (i, 0)),
    ] + [_rep_spec(x.shape) for x in inputs[2:]]

    out_specs = (pl.BlockSpec((BT, LP), lambda i: (i, 0)),
                 pl.BlockSpec((BT, 2 * HP), lambda i: (i, 0)))
    out_shape = (jax.ShapeDtypeStruct((BP, LP), jnp.float32),
                 jax.ShapeDtypeStruct((BP, 2 * HP), jnp.float32))

    scratch_shapes = [
        pltpu.VMEM((T, BT, G4), bf16),          # fwd input projections (bf16)
        pltpu.VMEM((T, BT, G4), bf16),          # bwd input projections (bf16)
        pltpu.VMEM((T, BT, HP), jnp.float32),   # fwd LSTM outputs
        pltpu.VMEM((T, BT, HP), jnp.float32),   # bwd LSTM outputs
    ]
    # NOTE: for very long T this scratch should be time-chunked (emit_pipeline)
    # to fit v7x's 64 MiB VMEM; not needed at these sizes.

    weight_bytes = sum(int(a.size) * a.dtype.itemsize for a in inputs[2:])
    scratch_bytes = T * BT * (2 * G4 * 2 + 2 * HP * 4)
    io_bytes = 2 * (T * BT * EP * 2 + BT * 4) + BT * (LP + 2 * HP) * 4
    vmem_limit = int(min(100 * 2 ** 20,
                         max(32 * 2 ** 20,
                             2 * (weight_bytes + scratch_bytes + io_bytes))))

    logits_p, sent_p = pl.pallas_call(
        _rnn_attn_kernel,
        out_shape=out_shape,
        grid=(NT,),
        in_specs=in_specs,
        out_specs=out_specs,
        scratch_shapes=scratch_shapes,
        compiler_params=pltpu.CompilerParams(
            dimension_semantics=("parallel",),       # batch tiles across cores
            vmem_limit_bytes=vmem_limit),
    )(*inputs)

    logits = logits_p[:B, :L]
    sentences = jnp.concatenate([sent_p[:B, :H], sent_p[:B, HP:HP + H]], axis=1)
    # TODO(synk): BCEWithLogitsLoss branch (labels is not None) left out of the kernel.
    return logits, sentences


# ----------------------------------------------------------------------------
# Deterministic parameter init (shapes follow the PyTorch module __init__)
# ----------------------------------------------------------------------------
def init_params(key, vocab, E, H, A, L):
    ks = jax.random.split(key, 14)

    def unif(k, shape, bound):
        return jax.random.uniform(k, shape, jnp.float32, -bound, bound)

    kH = 1.0 / float(H) ** 0.5
    k2H = 1.0 / float(2 * H) ** 0.5
    kA = 1.0 / float(A) ** 0.5

    return {
        "emb_table": jax.random.normal(ks[0], (vocab, E), jnp.float32),
        # bidirectional LSTM (1 layer): forward + reverse direction
        "W_ih_f": unif(ks[1], (4 * H, E), kH),
        "W_hh_f": unif(ks[2], (4 * H, H), kH),
        "b_ih_f": unif(ks[3], (4 * H,), kH),
        "b_hh_f": unif(ks[4], (4 * H,), kH),
        "W_ih_b": unif(ks[5], (4 * H, E), kH),
        "W_hh_b": unif(ks[6], (4 * H, H), kH),
        "b_ih_b": unif(ks[7], (4 * H,), kH),
        "b_hh_b": unif(ks[8], (4 * H,), kH),
        # word_attention: Linear(2H, 50); word_context_vector: Linear(50, 1, bias=False)
        "W_att": unif(ks[9], (A, 2 * H), k2H),
        "b_att": unif(ks[10], (A,), k2H),
        "W_ctx": unif(ks[11], (1, A), kA),
        # classifier: Linear(2H, num_labels)
        "W_cls": unif(ks[12], (L, 2 * H), k2H),
        "b_cls": unif(ks[13], (L,), k2H),
    }


if __name__ == "__main__":
    B, T = 2, 8            # batch, sequence length
    V, E = 100, 32         # vocab size, embedding dim (word_vectors.shape)
    H = 32                 # hidden_size
    A = 50                 # word_attention output dim (hardcoded 50 in module)
    L = 2                  # num_labels

    key = jax.random.PRNGKey(0)
    k_ids, k_par = jax.random.split(key)

    input_ids = jax.random.randint(k_ids, (B, T), 0, V, dtype=jnp.int32)
    lengths = jnp.array([T, 5], dtype=jnp.int32)
    attention_mask = (jnp.arange(T)[None, :] < lengths[:, None]).astype(jnp.int32)

    params = init_params(k_par, V, E, H, A, L)

    logits, sentences = rnn_multilabel_forward(input_ids, attention_mask, params)
    jax.block_until_ready((logits, sentences))

    assert logits.shape == (B, L) and sentences.shape == (B, 2 * H)
    assert bool(jnp.all(jnp.isfinite(logits))) and bool(jnp.all(jnp.isfinite(sentences)))
    print("KERNEL_OK")
</pallas_src>

<mosaic_0001>
module attributes {stable_mosaic.version = 11 : i64} {
  func.func @_rnn_attn_kernel(%arg0: i32, %arg1: memref<1x64x128xbf16, #tpu.memory_space<vmem>>, %arg2: memref<8x1xi32, #tpu.memory_space<vmem>>, %arg3: memref<128x1024xbf16, #tpu.memory_space<vmem>>, %arg4: memref<128x512xbf16, #tpu.memory_space<vmem>>, %arg5: memref<128x512xbf16, #tpu.memory_space<vmem>>, %arg6: memref<1x1024xf32, #tpu.memory_space<vmem>>, %arg7: memref<256x128xbf16, #tpu.memory_space<vmem>>, %arg8: memref<1x128xf32, #tpu.memory_space<vmem>>, %arg9: memref<1x128xf32, #tpu.memory_space<vmem>>, %arg10: memref<256x128xbf16, #tpu.memory_space<vmem>>, %arg11: memref<1x128xf32, #tpu.memory_space<vmem>>, %arg12: memref<8x128xf32, #tpu.memory_space<vmem>>, %arg13: memref<8x256xf32, #tpu.memory_space<vmem>>, %arg14: memref<8x8x512xbf16, #tpu.memory_space<vmem>>, %arg15: memref<8x8x512xbf16, #tpu.memory_space<vmem>>, %arg16: memref<8x8x128xf32, #tpu.memory_space<vmem>>, %arg17: memref<8x8x128xf32, #tpu.memory_space<vmem>>) attributes {dimension_semantics = [#tpu.dimension_semantics<parallel>], iteration_bounds = array<i64: 1>, scalar_prefetch = 0 : i64, scratch_operands = 4 : i64, tpu.core_type = #tpu.core_type<tc>, window_params = [{transform_indices = @transform_0, window_bounds = array<i64: 1, 64, 128>}, {transform_indices = @transform_1, window_bounds = array<i64: 8, 1>}, {pipeline_mode = #tpu.pipeline_mode<synchronous>, transform_indices = @transform_2, window_bounds = array<i64: 128, 1024>}, {pipeline_mode = #tpu.pipeline_mode<synchronous>, transform_indices = @transform_3, window_bounds = array<i64: 128, 512>}, {pipeline_mode = #tpu.pipeline_mode<synchronous>, transform_indices = @transform_4, window_bounds = array<i64: 128, 512>}, {pipeline_mode = #tpu.pipeline_mode<synchronous>, transform_indices = @transform_5, window_bounds = array<i64: 1, 1024>}, {pipeline_mode = #tpu.pipeline_mode<synchronous>, transform_indices = @transform_6, window_bounds = array<i64: 256, 128>}, {pipeline_mode = #tpu.pipeline_mode<synchronous>, transform_indices = @transform_7, window_bounds = array<i64: 1, 128>}, {pipeline_mode = #tpu.pipeline_mode<synchronous>, transform_indices = @transform_8, window_bounds = array<i64: 1, 128>}, {pipeline_mode = #tpu.pipeline_mode<synchronous>, transform_indices = @transform_9, window_bounds = array<i64: 256, 128>}, {pipeline_mode = #tpu.pipeline_mode<synchronous>, transform_indices = @transform_10, window_bounds = array<i64: 1, 128>}, {transform_indices = @transform_11, window_bounds = array<i64: 8, 128>}, {transform_indices = @transform_12, window_bounds = array<i64: 8, 256>}]} {
    %c0 = arith.constant 0 : index
    %c0_0 = arith.constant 0 : index
    %c0_1 = arith.constant 0 : index
    %0 = vector.load %arg1[%c0, %c0_0, %c0_1] : memref<1x64x128xbf16, #tpu.memory_space<vmem>>, vector<1x64x128xbf16>
    %1 = vector.shape_cast %0 : vector<1x64x128xbf16> to vector<64x128xbf16>
    %c0_2 = arith.constant 0 : index
    %c0_3 = arith.constant 0 : index
    %2 = vector.load %arg3[%c0_2, %c0_3] : memref<128x1024xbf16, #tpu.memory_space<vmem>>, vector<128x1024xbf16>
    %cst = arith.constant dense<0.000000e+00> : vector<64x1024xf32>
    %3 = tpu.matmul %1, %2, %cst {dimension_numbers = #tpu.dot_dimension_numbers<[1], [0], [0], [1], [0, 0, 1, 1], [], []>} : vector<64x128xbf16>, vector<128x1024xbf16>, vector<64x1024xf32> -> vector<64x1024xf32>
    %4 = vector.extract_strided_slice %3 {offsets = [0, 0], sizes = [64, 512], strides = [1, 1]} : vector<64x1024xf32> to vector<64x512xf32>
    %5 = vector.shape_cast %4 : vector<64x512xf32> to vector<8x8x512xf32>
    %6 = arith.truncf %5 : vector<8x8x512xf32> to vector<8x8x512xbf16>
    %c0_4 = arith.constant 0 : index
    %c0_5 = arith.constant 0 : index
    %c0_6 = arith.constant 0 : index
    %7 = vector.load %arg14[%c0_4, %c0_5, %c0_6] : memref<8x8x512xbf16, #tpu.memory_space<vmem>>, vector<8x8x512xbf16>
    tpu.vector_store %arg14[%c0_4, %c0_5, %c0_6], %6 {strides = array<i32>} : memref<8x8x512xbf16, #tpu.memory_space<vmem>>, vector<8x8x512xbf16>,
    %8 = vector.extract_strided_slice %3 {offsets = [0, 512], sizes = [64, 512], strides = [1, 1]} : vector<64x1024xf32> to vector<64x512xf32>
    %9 = vector.shape_cast %8 : vector<64x512xf32> to vector<8x8x512xf32>
    %10 = arith.truncf %9 : vector<8x8x512xf32> to vector<8x8x512xbf16>
    %c0_7 = arith.constant 0 : index
    %c0_8 = arith.constant 0 : index
    %c0_9 = arith.constant 0 : index
    %11 = vector.load %arg15[%c0_7, %c0_8, %c0_9] : memref<8x8x512xbf16, #tpu.memory_space<vmem>>, vector<8x8x512xbf16>
    tpu.vector_store %arg15[%c0_7, %c0_8, %c0_9], %10 {strides = array<i32>} : memref<8x8x512xbf16, #tpu.memory_space<vmem>>, vector<8x8x512xbf16>,
    %c0_10 = arith.constant 0 : index
    %c0_11 = arith.constant 0 : index
    %12 = vector.load %arg2[%c0_10, %c0_11] : memref<8x1xi32, #tpu.memory_space<vmem>>, vector<8x1xi32>
    %c0_12 = arith.constant 0 : index
    %c0_13 = arith.constant 0 : index
    %13 = vector.load %arg6[%c0_12, %c0_13] : memref<1x1024xf32, #tpu.memory_space<vmem>>, vector<1x512xf32>
    %c0_14 = arith.constant 0 : index
    %c512 = arith.constant 512 : index
    %14 = vector.load %arg6[%c0_14, %c512] : memref<1x1024xf32, #tpu.memory_space<vmem>>, vector<1x512xf32>
    %cst_15 = arith.constant 0.000000e+00 : f32
    %15 = vector.broadcast %cst_15 : f32 to vector<8x128xf32>
    %c0_i32 = arith.constant 0 : i32
    %c7_i32 = arith.constant 7 : i32
    %16 = arith.subi %c7_i32, %c0_i32 : i32
    %17 = arith.index_cast %c0_i32 : i32 to index
    %c0_16 = arith.constant 0 : index
    %c0_17 = arith.constant 0 : index
    %18 = vector.load %arg14[%17, %c0_16, %c0_17] : memref<8x8x512xbf16, #tpu.memory_space<vmem>>, vector<1x8x512xbf16>
    %19 = vector.shape_cast %18 : vector<1x8x512xbf16> to vector<8x512xbf16>
    %20 = arith.extf %19 : vector<8x512xbf16> to vector<8x512xf32>
    %21 = vector.broadcast %13 : vector<1x512xf32> to vector<8x512xf32>
    %22 = arith.addf %20, %21 : vector<8x512xf32>
    %23 = vector.broadcast %c0_i32 : i32 to vector<8x1xi32>
    %24 = arith.cmpi slt, %23, %12 : vector<8x1xi32>
    %25 = arith.truncf %15 : vector<8x128xf32> to vector<8x128xbf16>
    %c0_18 = arith.constant 0 : index
    %c0_19 = arith.constant 0 : index
    %26 = vector.load %arg4[%c0_18, %c0_19] : memref<128x512xbf16, #tpu.memory_space<vmem>>, vector<128x512xbf16>
    %cst_20 = arith.constant dense<0.000000e+00> : vector<8x512xf32>
    %27 = tpu.matmul %25, %26, %cst_20 {dimension_numbers = #tpu.dot_dimension_numbers<[1], [0], [0], [1], [0, 0, 1, 1], [], []>} : vector<8x128xbf16>, vector<128x512xbf16>, vector<8x512xf32> -> vector<8x512xf32>
    %28 = arith.addf %22, %27 : vector<8x512xf32>
    %29 = vector.extract_strided_slice %28 {offsets = [0, 0], sizes = [8, 128], strides = [1, 1]} : vector<8x512xf32> to vector<8x128xf32>
    %30 = arith.negf %29 : vector<8x128xf32>
    %31 = math.exp %30 : vector<8x128xf32>
    %cst_21 = arith.constant 1.000000e+00 : f32
    %32 = vector.broadcast %cst_21 : f32 to vector<8x128xf32>
    %33 = arith.addf %32, %31 : vector<8x128xf32>
    %34 = arith.divf %32, %33 : vector<8x128xf32>
    %35 = vector.extract_strided_slice %28 {offsets = [0, 128], sizes = [8, 128], strides = [1, 1]} : vector<8x512xf32> to vector<8x128xf32>
    %36 = arith.negf %35 : vector<8x128xf32>
    %37 = math.exp %36 : vector<8x128xf32>
    %cst_22 = arith.constant 1.000000e+00 : f32
    %38 = vector.broadcast %cst_22 : f32 to vector<8x128xf32>
    %39 = arith.addf %38, %37 : vector<8x128xf32>
    %40 = arith.divf %38, %39 : vector<8x128xf32>
    %41 = vector.extract_strided_slice %28 {offsets = [0, 256], sizes = [8, 128], strides = [1, 1]} : vector<8x512xf32> to vector<8x128xf32>
    %42 = math.tanh %41 : vector<8x128xf32>
    %43 = vector.extract_strided_slice %28 {offsets = [0, 384], sizes = [8, 128], strides = [1, 1]} : vector<8x512xf32> to vector<8x128xf32>
    %44 = arith.negf %43 : vector<8x128xf32>
    %45 = math.exp %44 : vector<8x128xf32>
    %cst_23 = arith.constant 1.000000e+00 : f32
    %46 = vector.broadcast %cst_23 : f32 to vector<8x128xf32>
    %47 = arith.addf %46, %45 : vector<8x128xf32>
    %48 = arith.divf %46, %47 : vector<8x128xf32>
    %49 = arith.mulf %40, %15 : vector<8x128xf32>
    %50 = arith.mulf %34, %42 : vector<8x128xf32>
    %51 = arith.addf %49, %50 : vector<8x128xf32>
    %52 = math.tanh %51 : vector<8x128xf32>
    %53 = arith.mulf %48, %52 : vector<8x128xf32>
    %cst_24 = arith.constant 0.000000e+00 : f32
    %54 = vector.shape_cast %24 : vector<8x1xi1> to vector<8x1xi1>
    %55 = vector.broadcast %54 : vector<8x1xi1> to vector<8x128xi1>
    %56 = vector.broadcast %cst_24 : f32 to vector<8x128xf32>
    %57 = arith.select %55, %53, %56 : vector<8x128xi1>, vector<8x128xf32>
    %58 = vector.shape_cast %24 : vector<8x1xi1> to vector<8x1xi1>
    %59 = vector.broadcast %58 : vector<8x1xi1> to vector<8x128xi1>
    %60 = arith.select %59, %53, %15 : vector<8x128xi1>, vector<8x128xf32>
    %61 = vector.shape_cast %24 : vector<8x1xi1> to vector<8x1xi1>
    %62 = vector.broadcast %61 : vector<8x1xi1> to vector<8x128xi1>
    %63 = arith.select %62, %51, %15 : vector<8x128xi1>, vector<8x128xf32>
    %64 = arith.index_cast %c0_i32 : i32 to index
    %c0_25 = arith.constant 0 : index
    %c0_26 = arith.constant 0 : index
    %65 = vector.load %arg16[%64, %c0_25, %c0_26] : memref<8x8x128xf32, #tpu.memory_space<vmem>>, vector<1x8x128xf32>
    %66 = vector.shape_cast %65 : vector<1x8x128xf32> to vector<8x128xf32>
    %67 = vector.shape_cast %57 : vector<8x128xf32> to vector<1x8x128xf32>
    tpu.vector_store %arg16[%64, %c0_25, %c0_26], %67 {strides = array<i32>} : memref<8x8x128xf32, #tpu.memory_space<vmem>>, vector<1x8x128xf32>,
    %68 = arith.index_cast %16 : i32 to index
    %c0_27 = arith.constant 0 : index
    %c0_28 = arith.constant 0 : index
    %69 = vector.load %arg15[%68, %c0_27, %c0_28] : memref<8x8x512xbf16, #tpu.memory_space<vmem>>, vector<1x8x512xbf16>
    %70 = vector.shape_cast %69 : vector<1x8x512xbf16> to vector<8x512xbf16>
    %71 = arith.extf %70 : vector<8x512xbf16> to vector<8x512xf32>
    %72 = vector.broadcast %14 : vector<1x512xf32> to vector<8x512xf32>
    %73 = arith.addf %71, %72 : vector<8x512xf32>
    %74 = vector.broadcast %16 : i32 to vector<8x1xi32>
    %75 = arith.cmpi slt, %74, %12 : vector<8x1xi32>
    %76 = arith.truncf %15 : vector<8x128xf32> to vector<8x128xbf16>
    %c0_29 = arith.constant 0 : index
    %c0_30 = arith.constant 0 : index
    %77 = vector.load %arg5[%c0_29, %c0_30] : memref<128x512xbf16, #tpu.memory_space<vmem>>, vector<128x512xbf16>
    %cst_31 = arith.constant dense<0.000000e+00> : vector<8x512xf32>
    %78 = tpu.matmul %76, %77, %cst_31 {dimension_numbers = #tpu.dot_dimension_numbers<[1], [0], [0], [1], [0, 0, 1, 1], [], []>} : vector<8x128xbf16>, vector<128x512xbf16>, vector<8x512xf32> -> vector<8x512xf32>
    %79 = arith.addf %73, %78 : vector<8x512xf32>
    %80 = vector.extract_strided_slice %79 {offsets = [0, 0], sizes = [8, 128], strides = [1, 1]} : vector<8x512xf32> to vector<8x128xf32>
    %81 = arith.negf %80 : vector<8x128xf32>
    %82 = math.exp %81 : vector<8x128xf32>
    %cst_32 = arith.constant 1.000000e+00 : f32
    %83 = vector.broadcast %cst_32 : f32 to vector<8x128xf32>
    %84 = arith.addf %83, %82 : vector<8x128xf32>
    %85 = arith.divf %83, %84 : vector<8x128xf32>
    %86 = vector.extract_strided_slice %79 {offsets = [0, 128], sizes = [8, 128], strides = [1, 1]} : vector<8x512xf32> to vector<8x128xf32>
    %87 = arith.negf %86 : vector<8x128xf32>
    %88 = math.exp %87 : vector<8x128xf32>
    %cst_33 = arith.constant 1.000000e+00 : f32
    %89 = vector.broadcast %cst_33 : f32 to vector<8x128xf32>
    %90 = arith.addf %89, %88 : vector<8x128xf32>
    %91 = arith.divf %89, %90 : vector<8x128xf32>
    %92 = vector.extract_strided_slice %79 {offsets = [0, 256], sizes = [8, 128], strides = [1, 1]} : vector<8x512xf32> to vector<8x128xf32>
    %93 = math.tanh %92 : vector<8x128xf32>
    %94 = vector.extract_strided_slice %79 {offsets = [0, 384], sizes = [8, 128], strides = [1, 1]} : vector<8x512xf32> to vector<8x128xf32>
    %95 = arith.negf %94 : vector<8x128xf32>
    %96 = math.exp %95 : vector<8x128xf32>
    %cst_34 = arith.constant 1.000000e+00 : f32
    %97 = vector.broadcast %cst_34 : f32 to vector<8x128xf32>
    %98 = arith.addf %97, %96 : vector<8x128xf32>
    %99 = arith.divf %97, %98 : vector<8x128xf32>
    %100 = arith.mulf %91, %15 : vector<8x128xf32>
    %101 = arith.mulf %85, %93 : vector<8x128xf32>
    %102 = arith.addf %100, %101 : vector<8x128xf32>
    %103 = math.tanh %102 : vector<8x128xf32>
    %104 = arith.mulf %99, %103 : vector<8x128xf32>
    %cst_35 = arith.constant 0.000000e+00 : f32
    %105 = vector.shape_cast %75 : vector<8x1xi1> to vector<8x1xi1>
    %106 = vector.broadcast %105 : vector<8x1xi1> to vector<8x128xi1>
    %107 = vector.broadcast %cst_35 : f32 to vector<8x128xf32>
    %108 = arith.select %106, %104, %107 : vector<8x128xi1>, vector<8x128xf32>
    %109 = vector.shape_cast %75 : vector<8x1xi1> to vector<8x1xi1>
    %110 = vector.broadcast %109 : vector<8x1xi1> to vector<8x128xi1>
    %111 = arith.select %110, %104, %15 : vector<8x128xi1>, vector<8x128xf32>
    %112 = vector.shape_cast %75 : vector<8x1xi1> to vector<8x1xi1>
    %113 = vector.broadcast %112 : vector<8x1xi1> to vector<8x128xi1>
    %114 = arith.select %113, %102, %15 : vector<8x128xi1>, vector<8x128xf32>
    %115 = arith.index_cast %16 : i32 to index
    %c0_36 = arith.constant 0 : index
    %c0_37 = arith.constant 0 : index
    %116 = vector.load %arg17[%115, %c0_36, %c0_37] : memref<8x8x128xf32, #tpu.memory_space<vmem>>, vector<1x8x128xf32>
    %117 = vector.shape_cast %116 : vector<1x8x128xf32> to vector<8x128xf32>
    %118 = vector.shape_cast %108 : vector<8x128xf32> to vector<1x8x128xf32>
    tpu.vector_store %arg17[%115, %c0_36, %c0_37], %118 {strides = array<i32>} : memref<8x8x128xf32, #tpu.memory_space<vmem>>, vector<1x8x128xf32>,
    %c1_i32 = arith.constant 1 : i32
    %c7_i32_38 = arith.constant 7 : i32
    %119 = arith.subi %c7_i32_38, %c1_i32 : i32
    %120 = arith.index_cast %c1_i32 : i32 to index
    %c0_39 = arith.constant 0 : index
    %c0_40 = arith.constant 0 : index
    %121 = vector.load %arg14[%120, %c0_39, %c0_40] : memref<8x8x512xbf16, #tpu.memory_space<vmem>>, vector<1x8x512xbf16>
    %122 = vector.shape_cast %121 : vector<1x8x512xbf16> to vector<8x512xbf16>
    %123 = arith.extf %122 : vector<8x512xbf16> to vector<8x512xf32>
    %124 = vector.broadcast %13 : vector<1x512xf32> to vector<8x512xf32>
    %125 = arith.addf %123, %124 : vector<8x512xf32>
    %126 = vector.broadcast %c1_i32 : i32 to vector<8x1xi32>
    %127 = arith.cmpi slt, %126, %12 : vector<8x1xi32>
    %128 = arith.truncf %60 : vector<8x128xf32> to vector<8x128xbf16>
    %c0_41 = arith.constant 0 : index
    %c0_42 = arith.constant 0 : index
    %129 = vector.load %arg4[%c0_41, %c0_42] : memref<128x512xbf16, #tpu.memory_space<vmem>>, vector<128x512xbf16>
    %cst_43 = arith.constant dense<0.000000e+00> : vector<8x512xf32>
    %130 = tpu.matmul %128, %129, %cst_43 {dimension_numbers = #tpu.dot_dimension_numbers<[1], [0], [0], [1], [0, 0, 1, 1], [], []>} : vector<8x128xbf16>, vector<128x512xbf16>, vector<8x512xf32> -> vector<8x512xf32>
    %131 = arith.addf %125, %130 : vector<8x512xf32>
    %132 = vector.extract_strided_slice %131 {offsets = [0, 0], sizes = [8, 128], strides = [1, 1]} : vector<8x512xf32> to vector<8x128xf32>
    %133 = arith.negf %132 : vector<8x128xf32>
    %134 = math.exp %133 : vector<8x128xf32>
    %cst_44 = arith.constant 1.000000e+00 : f32
    %135 = vector.broadcast %cst_44 : f32 to vector<8x128xf32>
    %136 = arith.addf %135, %134 : vector<8x128xf32>
    %137 = arith.divf %135, %136 : vector<8x128xf32>
    %138 = vector.extract_strided_slice %131 {offsets = [0, 128], sizes = [8, 128], strides = [1, 1]} : vector<8x512xf32> to vector<8x128xf32>
    %139 = arith.negf %138 : vector<8x128xf32>
    %140 = math.exp %139 : vector<8x128xf32>
    %cst_45 = arith.constant 1.000000e+00 : f32
    %141 = vector.broadcast %cst_45 : f32 to vector<8x128xf32>
    %142 = arith.addf %141, %140 : vector<8x128xf32>
    %143 = arith.divf %141, %142 : vector<8x128xf32>
    %144 = vector.extract_strided_slice %131 {offsets = [0, 256], sizes = [8, 128], strides = [1, 1]} : vector<8x512xf32> to vector<8x128xf32>
    %145 = math.tanh %144 : vector<8x128xf32>
    %146 = vector.extract_strided_slice %131 {offsets = [0, 384], sizes = [8, 128], strides = [1, 1]} : vector<8x512xf32> to vector<8x128xf32>
    %147 = arith.negf %146 : vector<8x128xf32>
    %148 = math.exp %147 : vector<8x128xf32>
    %cst_46 = arith.constant 1.000000e+00 : f32
    %149 = vector.broadcast %cst_46 : f32 to vector<8x128xf32>
    %150 = arith.addf %149, %148 : vector<8x128xf32>
    %151 = arith.divf %149, %150 : vector<8x128xf32>
    %152 = arith.mulf %143, %63 : vector<8x128xf32>
    %153 = arith.mulf %137, %145 : vector<8x128xf32>
    %154 = arith.addf %152, %153 : vector<8x128xf32>
    %155 = math.tanh %154 : vector<8x128xf32>
    %156 = arith.mulf %151, %155 : vector<8x128xf32>
    %cst_47 = arith.constant 0.000000e+00 : f32
    %157 = vector.shape_cast %127 : vector<8x1xi1> to vector<8x1xi1>
    %158 = vector.broadcast %157 : vector<8x1xi1> to vector<8x128xi1>
    %159 = vector.broadcast %cst_47 : f32 to vector<8x128xf32>
    %160 = arith.select %158, %156, %159 : vector<8x128xi1>, vector<8x128xf32>
    %161 = vector.shape_cast %127 : vector<8x1xi1> to vector<8x1xi1>
    %162 = vector.broadcast %161 : vector<8x1xi1> to vector<8x128xi1>
    %163 = arith.select %162, %156, %60 : vector<8x128xi1>, vector<8x128xf32>
    %164 = vector.shape_cast %127 : vector<8x1xi1> to vector<8x1xi1>
    %165 = vector.broadcast %164 : vector<8x1xi1> to vector<8x128xi1>
    %166 = arith.select %165, %154, %63 : vector<8x128xi1>, vector<8x128xf32>
    %167 = arith.index_cast %c1_i32 : i32 to index
    %c0_48 = arith.constant 0 : index
    %c0_49 = arith.constant 0 : index
    %168 = vector.load %arg16[%167, %c0_48, %c0_49] : memref<8x8x128xf32, #tpu.memory_space<vmem>>, vector<1x8x128xf32>
    %169 = vector.shape_cast %168 : vector<1x8x128xf32> to vector<8x128xf32>
    %170 = vector.shape_cast %160 : vector<8x128xf32> to vector<1x8x128xf32>
    tpu.vector_store %arg16[%167, %c0_48, %c0_49], %170 {strides = array<i32>} : memref<8x8x128xf32, #tpu.memory_space<vmem>>, vector<1x8x128xf32>,
    %171 = arith.index_cast %119 : i32 to index
    %c0_50 = arith.constant 0 : index
    %c0_51 = arith.constant 0 : index
    %172 = vector.load %arg15[%171, %c0_50, %c0_51] : memref<8x8x512xbf16, #tpu.memory_space<vmem>>, vector<1x8x512xbf16>
    %173 = vector.shape_cast %172 : vector<1x8x512xbf16> to vector<8x512xbf16>
    %174 = arith.extf %173 : vector<8x512xbf16> to vector<8x512xf32>
    %175 = vector.broadcast %14 : vector<1x512xf32> to vector<8x512xf32>
    %176 = arith.addf %174, %175 : vector<8x512xf32>
    %177 = vector.broadcast %119 : i32 to vector<8x1xi32>
    %178 = arith.cmpi slt, %177, %12 : vector<8x1xi32>
    %179 = arith.truncf %111 : vector<8x128xf32> to vector<8x128xbf16>
    %c0_52 = arith.constant 0 : index
    %c0_53 = arith.constant 0 : index
    %180 = vector.load %arg5[%c0_52, %c0_53] : memref<128x512xbf16, #tpu.memory_space<vmem>>, vector<128x512xbf16>
    %cst_54 = arith.constant dense<0.000000e+00> : vector<8x512xf32>
    %181 = tpu.matmul %179, %180, %cst_54 {dimension_numbers = #tpu.dot_dimension_numbers<[1], [0], [0], [1], [0, 0, 1, 1], [], []>} : vector<8x128xbf16>, vector<128x512xbf16>, vector<8x512xf32> -> vector<8x512xf32>
    %182 = arith.addf %176, %181 : vector<8x512xf32>
    %183 = vector.extract_strided_slice %182 {offsets = [0, 0], sizes = [8, 128], strides = [1, 1]} : vector<8x512xf32> to vector<8x128xf32>
    %184 = arith.negf %183 : vector<8x128xf32>
    %185 = math.exp %184 : vector<8x128xf32>
    %cst_55 = arith.constant 1.000000e+00 : f32
    %186 = vector.broadcast %cst_55 : f32 to vector<8x128xf32>
    %187 = arith.addf %186, %185 : vector<8x128xf32>
    %188 = arith.divf %186, %187 : vector<8x128xf32>
    %189 = vector.extract_strided_slice %182 {offsets = [0, 128], sizes = [8, 128], strides = [1, 1]} : vector<8x512xf32> to vector<8x128xf32>
    %190 = arith.negf %189 : vector<8x128xf32>
    %191 = math.exp %190 : vector<8x128xf32>
    %cst_56 = arith.constant 1.000000e+00 : f32
    %192 = vector.broadcast %cst_56 : f32 to vector<8x128xf32>
    %193 = arith.addf %192, %191 : vector<8x128xf32>
    %194 = arith.divf %192, %193 : vector<8x128xf32>
    %195 = vector.extract_strided_slice %182 {offsets = [0, 256], sizes = [8, 128], strides = [1, 1]} : vector<8x512xf32> to vector<8x128xf32>
    %196 = math.tanh %195 : vector<8x128xf32>
    %197 = vector.extract_strided_slice %182 {offsets = [0, 384], sizes = [8, 128], strides = [1, 1]} : vector<8x512xf32> to vector<8x128xf32>
    %198 = arith.negf %197 : vector<8x128xf32>
    %199 = math.exp %198 : vector<8x128xf32>
    %cst_57 = arith.constant 1.000000e+00 : f32
    %200 = vector.broadcast %cst_57 : f32 to vector<8x128xf32>
    %201 = arith.addf %200, %199 : vector<8x128xf32>
    %202 = arith.divf %200, %201 : vector<8x128xf32>
    %203 = arith.mulf %194, %114 : vector<8x128xf32>
    %204 = arith.mulf %188, %196 : vector<8x128xf32>
    %205 = arith.addf %203, %204 : vector<8x128xf32>
    %206 = math.tanh %205 : vector<8x128xf32>
    %207 = arith.mulf %202, %206 : vector<8x128xf32>
    %cst_58 = arith.constant 0.000000e+00 : f32
    %208 = vector.shape_cast %178 : vector<8x1xi1> to vector<8x1xi1>
    %209 = vector.broadcast %208 : vector<8x1xi1> to vector<8x128xi1>
    %210 = vector.broadcast %cst_58 : f32 to vector<8x128xf32>
    %211 = arith.select %209, %207, %210 : vector<8x128xi1>, vector<8x128xf32>
    %212 = vector.shape_cast %178 : vector<8x1xi1> to vector<8x1xi1>
    %213 = vector.broadcast %212 : vector<8x1xi1> to vector<8x128xi1>
    %214 = arith.select %213, %207, %111 : vector<8x128xi1>, vector<8x128xf32>
    %215 = vector.shape_cast %178 : vector<8x1xi1> to vector<8x1xi1>
    %216 = vector.broadcast %215 : vector<8x1xi1> to vector<8x128xi1>
    %217 = arith.select %216, %205, %114 : vector<8x128xi1>, vector<8x128xf32>
    %218 = arith.index_cast %119 : i32 to index
    %c0_59 = arith.constant 0 : index
    %c0_60 = arith.constant 0 : index
    %219 = vector.load %arg17[%218, %c0_59, %c0_60] : memref<8x8x128xf32, #tpu.memory_space<vmem>>, vector<1x8x128xf32>
    %220 = vector.shape_cast %219 : vector<1x8x128xf32> to vector<8x128xf32>
    %221 = vector.shape_cast %211 : vector<8x128xf32> to vector<1x8x128xf32>
    tpu.vector_store %arg17[%218, %c0_59, %c0_60], %221 {strides = array<i32>} : memref<8x8x128xf32, #tpu.memory_space<vmem>>, vector<1x8x128xf32>,
    %c2_i32 = arith.constant 2 : i32
    %c7_i32_61 = arith.constant 7 : i32
    %222 = arith.subi %c7_i32_61, %c2_i32 : i32
    %223 = arith.index_cast %c2_i32 : i32 to index
    %c0_62 = arith.constant 0 : index
    %c0_63 = arith.constant 0 : index
    %224 = vector.load %arg14[%223, %c0_62, %c0_63] : memref<8x8x512xbf16, #tpu.memory_space<vmem>>, vector<1x8x512xbf16>
    %225 = vector.shape_cast %224 : vector<1x8x512xbf16> to vector<8x512xbf16>
    %226 = arith.extf %225 : vector<8x512xbf16> to vector<8x512xf32>
    %227 = vector.broadcast %13 : vector<1x512xf32> to vector<8x512xf32>
    %228 = arith.addf %226, %227 : vector<8x512xf32>
    %229 = vector.broadcast %c2_i32 : i32 to vector<8x1xi32>
    %230 = arith.cmpi slt, %229, %12 : vector<8x1xi32>
    %231 = arith.truncf %163 : vector<8x128xf32> to vector<8x128xbf16>
    %c0_64 = arith.constant 0 : index
    %c0_65 = arith.constant 0 : index
    %232 = vector.load %arg4[%c0_64, %c0_65] : memref<128x512xbf16, #tpu.memory_space<vmem>>, vector<128x512xbf16>
    %cst_66 = arith.constant dense<0.000000e+00> : vector<8x512xf32>
    %233 = tpu.matmul %231, %232, %cst_66 {dimension_numbers = #tpu.dot_dimension_numbers<[1], [0], [0], [1], [0, 0, 1, 1], [], []>} : vector<8x128xbf16>, vector<128x512xbf16>, vector<8x512xf32> -> vector<8x512xf32>
    %234 = arith.addf %228, %233 : vector<8x512xf32>
    %235 = vector.extract_strided_slice %234 {offsets = [0, 0], sizes = [8, 128], strides = [1, 1]} : vector<8x512xf32> to vector<8x128xf32>
    %236 = arith.negf %235 : vector<8x128xf32>
    %237 = math.exp %236 : vector<8x128xf32>
    %cst_67 = arith.constant 1.000000e+00 : f32
    %238 = vector.broadcast %cst_67 : f32 to vector<8x128xf32>
    %239 = arith.addf %238, %237 : vector<8x128xf32>
    %240 = arith.divf %238, %239 : vector<8x128xf32>
    %241 = vector.extract_strided_slice %234 {offsets = [0, 128], sizes = [8, 128], strides = [1, 1]} : vector<8x512xf32> to vector<8x128xf32>
    %242 = arith.negf %241 : vector<8x128xf32>
    %243 = math.exp %242 : vector<8x128xf32>
    %cst_68 = arith.constant 1.000000e+00 : f32
    %244 = vector.broadcast %cst_68 : f32 to vector<8x128xf32>
    %245 = arith.addf %244, %243 : vector<8x128xf32>
    %246 = arith.divf %244, %245 : vector<8x128xf32>
    %247 = vector.extract_strided_slice %234 {offsets = [0, 256], sizes = [8, 128], strides = [1, 1]} : vector<8x512xf32> to vector<8x128xf32>
    %248 = math.tanh %247 : vector<8x128xf32>
    %249 = vector.extract_strided_slice %234 {offsets = [0, 384], sizes = [8, 128], strides = [1, 1]} : vector<8x512xf32> to vector<8x128xf32>
    %250 = arith.negf %249 : vector<8x128xf32>
    %251 = math.exp %250 : vector<8x128xf32>
    %cst_69 = arith.constant 1.000000e+00 : f32
    %252 = vector.broadcast %cst_69 : f32 to vector<8x128xf32>
    %253 = arith.addf %252, %251 : vector<8x128xf32>
    %254 = arith.divf %252, %253 : vector<8x128xf32>
    %255 = arith.mulf %246, %166 : vector<8x128xf32>
    %256 = arith.mulf %240, %248 : vector<8x128xf32>
    %257 = arith.addf %255, %256 : vector<8x128xf32>
    %258 = math.tanh %257 : vector<8x128xf32>
    %259 = arith.mulf %254, %258 : vector<8x128xf32>
    %cst_70 = arith.constant 0.000000e+00 : f32
    %260 = vector.shape_cast %230 : vector<8x1xi1> to vector<8x1xi1>
    %261 = vector.broadcast %260 : vector<8x1xi1> to vector<8x128xi1>
    %262 = vector.broadcast %cst_70 : f32 to vector<8x128xf32>
    %263 = arith.select %261, %259, %262 : vector<8x128xi1>, vector<8x128xf32>
    %264 = vector.shape_cast %230 : vector<8x1xi1> to vector<8x1xi1>
    %265 = vector.broadcast %264 : vector<8x1xi1> to vector<8x128xi1>
    %266 = arith.select %265, %259, %163 : vector<8x128xi1>, vector<8x128xf32>
    %267 = vector.shape_cast %230 : vector<8x1xi1> to vector<8x1xi1>
    %268 = vector.broadcast %267 : vector<8x1xi1> to vector<8x128xi1>
    %269 = arith.select %268, %257, %166 : vector<8x128xi1>, vector<8x128xf32>
    %270 = arith.index_cast %c2_i32 : i32 to index
    %c0_71 = arith.constant 0 : index
    %c0_72 = arith.constant 0 : index
    %271 = vector.load %arg16[%270, %c0_71, %c0_72] : memref<8x8x128xf32, #tpu.memory_space<vmem>>, vector<1x8x128xf32>
    %272 = vector.shape_cast %271 : vector<1x8x128xf32> to vector<8x128xf32>
    %273 = vector.shape_cast %263 : vector<8x128xf32> to vector<1x8x128xf32>
    tpu.vector_store %arg16[%270, %c0_71, %c0_72], %273 {strides = array<i32>} : memref<8x8x128xf32, #tpu.memory_space<vmem>>, vector<1x8x128xf32>,
    %274 = arith.index_cast %222 : i32 to index
    %c0_73 = arith.constant 0 : index
    %c0_74 = arith.constant 0 : index
    %275 = vector.load %arg15[%274, %c0_73, %c0_74] : memref<8x8x512xbf16, #tpu.memory_space<vmem>>, vector<1x8x512xbf16>
    %276 = vector.shape_cast %275 : vector<1x8x512xbf16> to vector<8x512xbf16>
    %277 = arith.extf %276 : vector<8x512xbf16> to vector<8x512xf32>
    %278 = vector.broadcast %14 : vector<1x512xf32> to vector<8x512xf32>
    %279 = arith.addf %277, %278 : vector<8x512xf32>
    %280 = vector.broadcast %222 : i32 to vector<8x1xi32>
    %281 = arith.cmpi slt, %280, %12 : vector<8x1xi32>
    %282 = arith.truncf %214 : vector<8x128xf32> to vector<8x128xbf16>
    %c0_75 = arith.constant 0 : index
    %c0_76 = arith.constant 0 : index
    %283 = vector.load %arg5[%c0_75, %c0_76] : memref<128x512xbf16, #tpu.memory_space<vmem>>, vector<128x512xbf16>
    %cst_77 = arith.constant dense<0.000000e+00> : vector<8x512xf32>
    %284 = tpu.matmul %282, %283, %cst_77 {dimension_numbers = #tpu.dot_dimension_numbers<[1], [0], [0], [1], [0, 0, 1, 1], [], []>} : vector<8x128xbf16>, vector<128x512xbf16>, vector<8x512xf32> -> vector<8x512xf32>
    %285 = arith.addf %279, %284 : vector<8x512xf32>
    %286 = vector.extract_strided_slice %285 {offsets = [0, 0], sizes = [8, 128], strides = [1, 1]} : vector<8x512xf32> to vector<8x128xf32>
    %287 = arith.negf %286 : vector<8x128xf32>
    %288 = math.exp %287 : vector<8x128xf32>
    %cst_78 = arith.constant 1.000000e+00 : f32
    %289 = vector.broadcast %cst_78 : f32 to vector<8x128xf32>
    %290 = arith.addf %289, %288 : vector<8x128xf32>
    %291 = arith.divf %289, %290 : vector<8x128xf32>
    %292 = vector.extract_strided_slice %285 {offsets = [0, 128], sizes = [8, 128], strides = [1, 1]} : vector<8x512xf32> to vector<8x128xf32>
    %293 = arith.negf %292 : vector<8x128xf32>
    %294 = math.exp %293 : vector<8x128xf32>
    %cst_79 = arith.constant 1.000000e+00 : f32
    %295 = vector.broadcast %cst_79 : f32 to vector<8x128xf32>
    %296 = arith.addf %295, %294 : vector<8x128xf32>
    %297 = arith.divf %295, %296 : vector<8x128xf32>
    %298 = vector.extract_strided_slice %285 {offsets = [0, 256], sizes = [8, 128], strides = [1, 1]} : vector<8x512xf32> to vector<8x128xf32>
    %299 = math.tanh %298 : vector<8x128xf32>
    %300 = vector.extract_strided_slice %285 {offsets = [0, 384], sizes = [8, 128], strides = [1, 1]} : vector<8x512xf32> to vector<8x128xf32>
    %301 = arith.negf %300 : vector<8x128xf32>
    %302 = math.exp %301 : vector<8x128xf32>
    %cst_80 = arith.constant 1.000000e+00 : f32
    %303 = vector.broadcast %cst_80 : f32 to vector<8x128xf32>
    %304 = arith.addf %303, %302 : vector<8x128xf32>
    %305 = arith.divf %303, %304 : vector<8x128xf32>
    %306 = arith.mulf %297, %217 : vector<8x128xf32>
    %307 = arith.mulf %291, %299 : vector<8x128xf32>
    %308 = arith.addf %306, %307 : vector<8x128xf32>
    %309 = math.tanh %308 : vector<8x128xf32>
    %310 = arith.mulf %305, %309 : vector<8x128xf32>
    %cst_81 = arith.constant 0.000000e+00 : f32
    %311 = vector.shape_cast %281 : vector<8x1xi1> to vector<8x1xi1>
    %312 = vector.broadcast %311 : vector<8x1xi1> to vector<8x128xi1>
    %313 = vector.broadcast %cst_81 : f32 to vector<8x128xf32>
    %314 = arith.select %312, %310, %313 : vector<8x128xi1>, vector<8x128xf32>
    %315 = vector.shape_cast %281 : vector<8x1xi1> to vector<8x1xi1>
    %316 = vector.broadcast %315 : vector<8x1xi1> to vector<8x128xi1>
    %317 = arith.select %316, %310, %214 : vector<8x128xi1>, vector<8x128xf32>
    %318 = vector.shape_cast %281 : vector<8x1xi1> to vector<8x1xi1>
    %319 = vector.broadcast %318 : vector<8x1xi1> to vector<8x128xi1>
    %320 = arith.select %319, %308, %217 : vector<8x128xi1>, vector<8x128xf32>
    %321 = arith.index_cast %222 : i32 to index
    %c0_82 = arith.constant 0 : index
    %c0_83 = arith.constant 0 : index
    %322 = vector.load %arg17[%321, %c0_82, %c0_83] : memref<8x8x128xf32, #tpu.memory_space<vmem>>, vector<1x8x128xf32>
    %323 = vector.shape_cast %322 : vector<1x8x128xf32> to vector<8x128xf32>
    %324 = vector.shape_cast %314 : vector<8x128xf32> to vector<1x8x128xf32>
    tpu.vector_store %arg17[%321, %c0_82, %c0_83], %324 {strides = array<i32>} : memref<8x8x128xf32, #tpu.memory_space<vmem>>, vector<1x8x128xf32>,
    %c3_i32 = arith.constant 3 : i32
    %c7_i32_84 = arith.constant 7 : i32
    %325 = arith.subi %c7_i32_84, %c3_i32 : i32
    %326 = arith.index_cast %c3_i32 : i32 to index
    %c0_85 = arith.constant 0 : index
    %c0_86 = arith.constant 0 : index
    %327 = vector.load %arg14[%326, %c0_85, %c0_86] : memref<8x8x512xbf16, #tpu.memory_space<vmem>>, vector<1x8x512xbf16>
    %328 = vector.shape_cast %327 : vector<1x8x512xbf16> to vector<8x512xbf16>
    %329 = arith.extf %328 : vector<8x512xbf16> to vector<8x512xf32>
    %330 = vector.broadcast %13 : vector<1x512xf32> to vector<8x512xf32>
    %331 = arith.addf %329, %330 : vector<8x512xf32>
    %332 = vector.broadcast %c3_i32 : i32 to vector<8x1xi32>
    %333 = arith.cmpi slt, %332, %12 : vector<8x1xi32>
    %334 = arith.truncf %266 : vector<8x128xf32> to vector<8x128xbf16>
    %c0_87 = arith.constant 0 : index
    %c0_88 = arith.constant 0 : index
    %335 = vector.load %arg4[%c0_87, %c0_88] : memref<128x512xbf16, #tpu.memory_space<vmem>>, vector<128x512xbf16>
    %cst_89 = arith.constant dense<0.000000e+00> : vector<8x512xf32>
    %336 = tpu.matmul %334, %335, %cst_89 {dimension_numbers = #tpu.dot_dimension_numbers<[1], [0], [0], [1], [0, 0, 1, 1], [], []>} : vector<8x128xbf16>, vector<128x512xbf16>, vector<8x512xf32> -> vector<8x512xf32>
    %337 = arith.addf %331, %336 : vector<8x512xf32>
    %338 = vector.extract_strided_slice %337 {offsets = [0, 0], sizes = [8, 128], strides = [1, 1]} : vector<8x512xf32> to vector<8x128xf32>
    %339 = arith.negf %338 : vector<8x128xf32>
    %340 = math.exp %339 : vector<8x128xf32>
    %cst_90 = arith.constant 1.000000e+00 : f32
    %341 = vector.broadcast %cst_90 : f32 to vector<8x128xf32>
    %342 = arith.addf %341, %340 : vector<8x128xf32>
    %343 = arith.divf %341, %342 : vector<8x128xf32>
    %344 = vector.extract_strided_slice %337 {offsets = [0, 128], sizes = [8, 128], strides = [1, 1]} : vector<8x512xf32> to vector<8x128xf32>
    %345 = arith.negf %344 : vector<8x128xf32>
    %346 = math.exp %345 : vector<8x128xf32>
    %cst_91 = arith.constant 1.000000e+00 : f32
    %347 = vector.broadcast %cst_91 : f32 to vector<8x128xf32>
    %348 = arith.addf %347, %346 : vector<8x128xf32>
    %349 = arith.divf %347, %348 : vector<8x128xf32>
    %350 = vector.extract_strided_slice %337 {offsets = [0, 256], sizes = [8, 128], strides = [1, 1]} : vector<8x512xf32> to vector<8x128xf32>
    %351 = math.tanh %350 : vector<8x128xf32>
    %352 = vector.extract_strided_slice %337 {offsets = [0, 384], sizes = [8, 128], strides = [1, 1]} : vector<8x512xf32> to vector<8x128xf32>
    %353 = arith.negf %352 : vector<8x128xf32>
    %354 = math.exp %353 : vector<8x128xf32>
    %cst_92 = arith.constant 1.000000e+00 : f32
    %355 = vector.broadcast %cst_92 : f32 to vector<8x128xf32>
    %356 = arith.addf %355, %354 : vector<8x128xf32>
    %357 = arith.divf %355, %356 : vector<8x128xf32>
    %358 = arith.mulf %349, %269 : vector<8x128xf32>
    %359 = arith.mulf %343, %351 : vector<8x128xf32>
    %360 = arith.addf %358, %359 : vector<8x128xf32>
    %361 = math.tanh %360 : vector<8x128xf32>
    %362 = arith.mulf %357, %361 : vector<8x128xf32>
    %cst_93 = arith.constant 0.000000e+00 : f32
    %363 = vector.shape_cast %333 : vector<8x1xi1> to vector<8x1xi1>
    %364 = vector.broadcast %363 : vector<8x1xi1> to vector<8x128xi1>
    %365 = vector.broadcast %cst_93 : f32 to vector<8x128xf32>
    %366 = arith.select %364, %362, %365 : vector<8x128xi1>, vector<8x128xf32>
    %367 = vector.shape_cast %333 : vector<8x1xi1> to vector<8x1xi1>
    %368 = vector.broadcast %367 : vector<8x1xi1> to vector<8x128xi1>
    %369 = arith.select %368, %362, %266 : vector<8x128xi1>, vector<8x128xf32>
    %370 = vector.shape_cast %333 : vector<8x1xi1> to vector<8x1xi1>
    %371 = vector.broadcast %370 : vector<8x1xi1> to vector<8x128xi1>
    %372 = arith.select %371, %360, %269 : vector<8x128xi1>, vector<8x128xf32>
    %373 = arith.index_cast %c3_i32 : i32 to index
    %c0_94 = arith.constant 0 : index
    %c0_95 = arith.constant 0 : index
    %374 = vector.load %arg16[%373, %c0_94, %c0_95] : memref<8x8x128xf32, #tpu.memory_space<vmem>>, vector<1x8x128xf32>
    %375 = vector.shape_cast %374 : vector<1x8x128xf32> to vector<8x128xf32>
    %376 = vector.shape_cast %366 : vector<8x128xf32> to vector<1x8x128xf32>
    tpu.vector_store %arg16[%373, %c0_94, %c0_95], %376 {strides = array<i32>} : memref<8x8x128xf32, #tpu.memory_space<vmem>>, vector<1x8x128xf32>,
    %377 = arith.index_cast %325 : i32 to index
    %c0_96 = arith.constant 0 : index
    %c0_97 = arith.constant 0 : index
    %378 = vector.load %arg15[%377, %c0_96, %c0_97] : memref<8x8x512xbf16, #tpu.memory_space<vmem>>, vector<1x8x512xbf16>
    %379 = vector.shape_cast %378 : vector<1x8x512xbf16> to vector<8x512xbf16>
    %380 = arith.extf %379 : vector<8x512xbf16> to vector<8x512xf32>
    %381 = vector.broadcast %14 : vector<1x512xf32> to vector<8x512xf32>
    %382 = arith.addf %380, %381 : vector<8x512xf32>
    %383 = vector.broadcast %325 : i32 to vector<8x1xi32>
    %384 = arith.cmpi slt, %383, %12 : vector<8x1xi32>
    %385 = arith.truncf %317 : vector<8x128xf32> to vector<8x128xbf16>
    %c0_98 = arith.constant 0 : index
    %c0_99 = arith.constant 0 : index
    %386 = vector.load %arg5[%c0_98, %c0_99] : memref<128x512xbf16, #tpu.memory_space<vmem>>, vector<128x512xbf16>
    %cst_100 = arith.constant dense<0.000000e+00> : vector<8x512xf32>
    %387 = tpu.matmul %385, %386, %cst_100 {dimension_numbers = #tpu.dot_dimension_numbers<[1], [0], [0], [1], [0, 0, 1, 1], [], []>} : vector<8x128xbf16>, vector<128x512xbf16>, vector<8x512xf32> -> vector<8x512xf32>
    %388 = arith.addf %382, %387 : vector<8x512xf32>
    %389 = vector.extract_strided_slice %388 {offsets = [0, 0], sizes = [8, 128], strides = [1, 1]} : vector<8x512xf32> to vector<8x128xf32>
    %390 = arith.negf %389 : vector<8x128xf32>
    %391 = math.exp %390 : vector<8x128xf32>
    %cst_101 = arith.constant 1.000000e+00 : f32
    %392 = vector.broadcast %cst_101 : f32 to vector<8x128xf32>
    %393 = arith.addf %392, %391 : vector<8x128xf32>
    %394 = arith.divf %392, %393 : vector<8x128xf32>
    %395 = vector.extract_strided_slice %388 {offsets = [0, 128], sizes = [8, 128], strides = [1, 1]} : vector<8x512xf32> to vector<8x128xf32>
    %396 = arith.negf %395 : vector<8x128xf32>
    %397 = math.exp %396 : vector<8x128xf32>
    %cst_102 = arith.constant 1.000000e+00 : f32
    %398 = vector.broadcast %cst_102 : f32 to vector<8x128xf32>
    %399 = arith.addf %398, %397 : vector<8x128xf32>
    %400 = arith.divf %398, %399 : vector<8x128xf32>
    %401 = vector.extract_strided_slice %388 {offsets = [0, 256], sizes = [8, 128], strides = [1, 1]} : vector<8x512xf32> to vector<8x128xf32>
    %402 = math.tanh %401 : vector<8x128xf32>
    %403 = vector.extract_strided_slice %388 {offsets = [0, 384], sizes = [8, 128], strides = [1, 1]} : vector<8x512xf32> to vector<8x128xf32>
    %404 = arith.negf %403 : vector<8x128xf32>
    %405 = math.exp %404 : vector<8x128xf32>
    %cst_103 = arith.constant 1.000000e+00 : f32
    %406 = vector.broadcast %cst_103 : f32 to vector<8x128xf32>
    %407 = arith.addf %406, %405 : vector<8x128xf32>
    %408 = arith.divf %406, %407 : vector<8x128xf32>
    %409 = arith.mulf %400, %320 : vector<8x128xf32>
    %410 = arith.mulf %394, %402 : vector<8x128xf32>
    %411 = arith.addf %409, %410 : vector<8x128xf32>
    %412 = math.tanh %411 : vector<8x128xf32>
    %413 = arith.mulf %408, %412 : vector<8x128xf32>
    %cst_104 = arith.constant 0.000000e+00 : f32
    %414 = vector.shape_cast %384 : vector<8x1xi1> to vector<8x1xi1>
    %415 = vector.broadcast %414 : vector<8x1xi1> to vector<8x128xi1>
    %416 = vector.broadcast %cst_104 : f32 to vector<8x128xf32>
    %417 = arith.select %415, %413, %416 : vector<8x128xi1>, vector<8x128xf32>
    %418 = vector.shape_cast %384 : vector<8x1xi1> to vector<8x1xi1>
    %419 = vector.broadcast %418 : vector<8x1xi1> to vector<8x128xi1>
    %420 = arith.select %419, %413, %317 : vector<8x128xi1>, vector<8x128xf32>
    %421 = vector.shape_cast %384 : vector<8x1xi1> to vector<8x1xi1>
    %422 = vector.broadcast %421 : vector<8x1xi1> to vector<8x128xi1>
    %423 = arith.select %422, %411, %320 : vector<8x128xi1>, vector<8x128xf32>
    %424 = arith.index_cast %325 : i32 to index
    %c0_105 = arith.constant 0 : index
    %c0_106 = arith.constant 0 : index
    %425 = vector.load %arg17[%424, %c0_105, %c0_106] : memref<8x8x128xf32, #tpu.memory_space<vmem>>, vector<1x8x128xf32>
    %426 = vector.shape_cast %425 : vector<1x8x128xf32> to vector<8x128xf32>
    %427 = vector.shape_cast %417 : vector<8x128xf32> to vector<1x8x128xf32>
    tpu.vector_store %arg17[%424, %c0_105, %c0_106], %427 {strides = array<i32>} : memref<8x8x128xf32, #tpu.memory_space<vmem>>, vector<1x8x128xf32>,
    %c4_i32 = arith.constant 4 : i32
    %c7_i32_107 = arith.constant 7 : i32
    %428 = arith.subi %c7_i32_107, %c4_i32 : i32
    %429 = arith.index_cast %c4_i32 : i32 to index
    %c0_108 = arith.constant 0 : index
    %c0_109 = arith.constant 0 : index
    %430 = vector.load %arg14[%429, %c0_108, %c0_109] : memref<8x8x512xbf16, #tpu.memory_space<vmem>>, vector<1x8x512xbf16>
    %431 = vector.shape_cast %430 : vector<1x8x512xbf16> to vector<8x512xbf16>
    %432 = arith.extf %431 : vector<8x512xbf16> to vector<8x512xf32>
    %433 = vector.broadcast %13 : vector<1x512xf32> to vector<8x512xf32>
    %434 = arith.addf %432, %433 : vector<8x512xf32>
    %435 = vector.broadcast %c4_i32 : i32 to vector<8x1xi32>
    %436 = arith.cmpi slt, %435, %12 : vector<8x1xi32>
    %437 = arith.truncf %369 : vector<8x128xf32> to vector<8x128xbf16>
    %c0_110 = arith.constant 0 : index
    %c0_111 = arith.constant 0 : index
    %438 = vector.load %arg4[%c0_110, %c0_111] : memref<128x512xbf16, #tpu.memory_space<vmem>>, vector<128x512xbf16>
    %cst_112 = arith.constant dense<0.000000e+00> : vector<8x512xf32>
    %439 = tpu.matmul %437, %438, %cst_112 {dimension_numbers = #tpu.dot_dimension_numbers<[1], [0], [0], [1], [0, 0, 1, 1], [], []>} : vector<8x128xbf16>, vector<128x512xbf16>, vector<8x512xf32> -> vector<8x512xf32>
    %440 = arith.addf %434, %439 : vector<8x512xf32>
    %441 = vector.extract_strided_slice %440 {offsets = [0, 0], sizes = [8, 128], strides = [1, 1]} : vector<8x512xf32> to vector<8x128xf32>
    %442 = arith.negf %441 : vector<8x128xf32>
    %443 = math.exp %442 : vector<8x128xf32>
    %cst_113 = arith.constant 1.000000e+00 : f32
    %444 = vector.broadcast %cst_113 : f32 to vector<8x128xf32>
    %445 = arith.addf %444, %443 : vector<8x128xf32>
    %446 = arith.divf %444, %445 : vector<8x128xf32>
    %447 = vector.extract_strided_slice %440 {offsets = [0, 128], sizes = [8, 128], strides = [1, 1]} : vector<8x512xf32> to vector<8x128xf32>
    %448 = arith.negf %447 : vector<8x128xf32>
    %449 = math.exp %448 : vector<8x128xf32>
    %cst_114 = arith.constant 1.000000e+00 : f32
    %450 = vector.broadcast %cst_114 : f32 to vector<8x128xf32>
    %451 = arith.addf %450, %449 : vector<8x128xf32>
    %452 = arith.divf %450, %451 : vector<8x128xf32>
    %453 = vector.extract_strided_slice %440 {offsets = [0, 256], sizes = [8, 128], strides = [1, 1]} : vector<8x512xf32> to vector<8x128xf32>
    %454 = math.tanh %453 : vector<8x128xf32>
    %455 = vector.extract_strided_slice %440 {offsets = [0, 384], sizes = [8, 128], strides = [1, 1]} : vector<8x512xf32> to vector<8x128xf32>
    %456 = arith.negf %455 : vector<8x128xf32>
    %457 = math.exp %456 : vector<8x128xf32>
    %cst_115 = arith.constant 1.000000e+00 : f32
    %458 = vector.broadcast %cst_115 : f32 to vector<8x128xf32>
    %459 = arith.addf %458, %457 : vector<8x128xf32>
    %460 = arith.divf %458, %459 : vector<8x128xf32>
    %461 = arith.mulf %452, %372 : vector<8x128xf32>
    %462 = arith.mulf %446, %454 : vector<8x128xf32>
    %463 = arith.addf %461, %462 : vector<8x128xf32>
    %464 = math.tanh %463 : vector<8x128xf32>
    %465 = arith.mulf %460, %464 : vector<8x128xf32>
    %cst_116 = arith.constant 0.000000e+00 : f32
    %466 = vector.shape_cast %436 : vector<8x1xi1> to vector<8x1xi1>
    %467 = vector.broadcast %466 : vector<8x1xi1> to vector<8x128xi1>
    %468 = vector.broadcast %cst_116 : f32 to vector<8x128xf32>
    %469 = arith.select %467, %465, %468 : vector<8x128xi1>, vector<8x128xf32>
    %470 = vector.shape_cast %436 : vector<8x1xi1> to vector<8x1xi1>
    %471 = vector.broadcast %470 : vector<8x1xi1> to vector<8x128xi1>
    %472 = arith.select %471, %465, %369 : vector<8x128xi1>, vector<8x128xf32>
    %473 = vector.shape_cast %436 : vector<8x1xi1> to vector<8x1xi1>
    %474 = vector.broadcast %473 : vector<8x1xi1> to vector<8x128xi1>
    %475 = arith.select %474, %463, %372 : vector<8x128xi1>, vector<8x128xf32>
    %476 = arith.index_cast %c4_i32 : i32 to index
    %c0_117 = arith.constant 0 : index
    %c0_118 = arith.constant 0 : index
    %477 = vector.load %arg16[%476, %c0_117, %c0_118] : memref<8x8x128xf32, #tpu.memory_space<vmem>>, vector<1x8x128xf32>
    %478 = vector.shape_cast %477 : vector<1x8x128xf32> to vector<8x128xf32>
    %479 = vector.shape_cast %469 : vector<8x128xf32> to vector<1x8x128xf32>
    tpu.vector_store %arg16[%476, %c0_117, %c0_118], %479 {strides = array<i32>} : memref<8x8x128xf32, #tpu.memory_space<vmem>>, vector<1x8x128xf32>,
    %480 = arith.index_cast %428 : i32 to index
    %c0_119 = arith.constant 0 : index
    %c0_120 = arith.constant 0 : index
    %481 = vector.load %arg15[%480, %c0_119, %c0_120] : memref<8x8x512xbf16, #tpu.memory_space<vmem>>, vector<1x8x512xbf16>
    %482 = vector.shape_cast %481 : vector<1x8x512xbf16> to vector<8x512xbf16>
    %483 = arith.extf %482 : vector<8x512xbf16> to vector<8x512xf32>
    %484 = vector.broadcast %14 : vector<1x512xf32> to vector<8x512xf32>
    %485 = arith.addf %483, %484 : vector<8x512xf32>
    %486 = vector.broadcast %428 : i32 to vector<8x1xi32>
    %487 = arith.cmpi slt, %486, %12 : vector<8x1xi32>
    %488 = arith.truncf %420 : vector<8x128xf32> to vector<8x128xbf16>
    %c0_121 = arith.constant 0 : index
    %c0_122 = arith.constant 0 : index
    %489 = vector.load %arg5[%c0_121, %c0_122] : memref<128x512xbf16, #tpu.memory_space<vmem>>, vector<128x512xbf16>
    %cst_123 = arith.constant dense<0.000000e+00> : vector<8x512xf32>
    %490 = tpu.matmul %488, %489, %cst_123 {dimension_numbers = #tpu.dot_dimension_numbers<[1], [0], [0], [1], [0, 0, 1, 1], [], []>} : vector<8x128xbf16>, vector<128x512xbf16>, vector<8x512xf32> -> vector<8x512xf32>
    %491 = arith.addf %485, %490 : vector<8x512xf32>
    %492 = vector.extract_strided_slice %491 {offsets = [0, 0], sizes = [8, 128], strides = [1, 1]} : vector<8x512xf32> to vector<8x128xf32>
    %493 = arith.negf %492 : vector<8x128xf32>
    %494 = math.exp %493 : vector<8x128xf32>
    %cst_124 = arith.constant 1.000000e+00 : f32
    %495 = vector.broadcast %cst_124 : f32 to vector<8x128xf32>
    %496 = arith.addf %495, %494 : vector<8x128xf32>
    %497 = arith.divf %495, %496 : vector<8x128xf32>
    %498 = vector.extract_strided_slice %491 {offsets = [0, 128], sizes = [8, 128], strides = [1, 1]} : vector<8x512xf32> to vector<8x128xf32>
    %499 = arith.negf %498 : vector<8x128xf32>
    %500 = math.exp %499 : vector<8x128xf32>
    %cst_125 = arith.constant 1.000000e+00 : f32
    %501 = vector.broadcast %cst_125 : f32 to vector<8x128xf32>
    %502 = arith.addf %501, %500 : vector<8x128xf32>
    %503 = arith.divf %501, %502 : vector<8x128xf32>
    %504 = vector.extract_strided_slice %491 {offsets = [0, 256], sizes = [8, 128], strides = [1, 1]} : vector<8x512xf32> to vector<8x128xf32>
    %505 = math.tanh %504 : vector<8x128xf32>
    %506 = vector.extract_strided_slice %491 {offsets = [0, 384], sizes = [8, 128], strides = [1, 1]} : vector<8x512xf32> to vector<8x128xf32>
    %507 = arith.negf %506 : vector<8x128xf32>
    %508 = math.exp %507 : vector<8x128xf32>
    %cst_126 = arith.constant 1.000000e+00 : f32
    %509 = vector.broadcast %cst_126 : f32 to vector<8x128xf32>
    %510 = arith.addf %509, %508 : vector<8x128xf32>
    %511 = arith.divf %509, %510 : vector<8x128xf32>
    %512 = arith.mulf %503, %423 : vector<8x128xf32>
    %513 = arith.mulf %497, %505 : vector<8x128xf32>
    %514 = arith.addf %512, %513 : vector<8x128xf32>
    %515 = math.tanh %514 : vector<8x128xf32>
    %516 = arith.mulf %511, %515 : vector<8x128xf32>
    %cst_127 = arith.constant 0.000000e+00 : f32
    %517 = vector.shape_cast %487 : vector<8x1xi1> to vector<8x1xi1>
    %518 = vector.broadcast %517 : vector<8x1xi1> to vector<8x128xi1>
    %519 = vector.broadcast %cst_127 : f32 to vector<8x128xf32>
    %520 = arith.select %518, %516, %519 : vector<8x128xi1>, vector<8x128xf32>
    %521 = vector.shape_cast %487 : vector<8x1xi1> to vector<8x1xi1>
    %522 = vector.broadcast %521 : vector<8x1xi1> to vector<8x128xi1>
    %523 = arith.select %522, %516, %420 : vector<8x128xi1>, vector<8x128xf32>
    %524 = vector.shape_cast %487 : vector<8x1xi1> to vector<8x1xi1>
    %525 = vector.broadcast %524 : vector<8x1xi1> to vector<8x128xi1>
    %526 = arith.select %525, %514, %423 : vector<8x128xi1>, vector<8x128xf32>
    %527 = arith.index_cast %428 : i32 to index
    %c0_128 = arith.constant 0 : index
    %c0_129 = arith.constant 0 : index
    %528 = vector.load %arg17[%527, %c0_128, %c0_129] : memref<8x8x128xf32, #tpu.memory_space<vmem>>, vector<1x8x128xf32>
    %529 = vector.shape_cast %528 : vector<1x8x128xf32> to vector<8x128xf32>
    %530 = vector.shape_cast %520 : vector<8x128xf32> to vector<1x8x128xf32>
    tpu.vector_store %arg17[%527, %c0_128, %c0_129], %530 {strides = array<i32>} : memref<8x8x128xf32, #tpu.memory_space<vmem>>, vector<1x8x128xf32>,
    %c5_i32 = arith.constant 5 : i32
    %c7_i32_130 = arith.constant 7 : i32
    %531 = arith.subi %c7_i32_130, %c5_i32 : i32
    %532 = arith.index_cast %c5_i32 : i32 to index
    %c0_131 = arith.constant 0 : index
    %c0_132 = arith.constant 0 : index
    %533 = vector.load %arg14[%532, %c0_131, %c0_132] : memref<8x8x512xbf16, #tpu.memory_space<vmem>>, vector<1x8x512xbf16>
    %534 = vector.shape_cast %533 : vector<1x8x512xbf16> to vector<8x512xbf16>
    %535 = arith.extf %534 : vector<8x512xbf16> to vector<8x512xf32>
    %536 = vector.broadcast %13 : vector<1x512xf32> to vector<8x512xf32>
    %537 = arith.addf %535, %536 : vector<8x512xf32>
    %538 = vector.broadcast %c5_i32 : i32 to vector<8x1xi32>
    %539 = arith.cmpi slt, %538, %12 : vector<8x1xi32>
    %540 = arith.truncf %472 : vector<8x128xf32> to vector<8x128xbf16>
    %c0_133 = arith.constant 0 : index
    %c0_134 = arith.constant 0 : index
    %541 = vector.load %arg4[%c0_133, %c0_134] : memref<128x512xbf16, #tpu.memory_space<vmem>>, vector<128x512xbf16>
    %cst_135 = arith.constant dense<0.000000e+00> : vector<8x512xf32>
    %542 = tpu.matmul %540, %541, %cst_135 {dimension_numbers = #tpu.dot_dimension_numbers<[1], [0], [0], [1], [0, 0, 1, 1], [], []>} : vector<8x128xbf16>, vector<128x512xbf16>, vector<8x512xf32> -> vector<8x512xf32>
    %543 = arith.addf %537, %542 : vector<8x512xf32>
    %544 = vector.extract_strided_slice %543 {offsets = [0, 0], sizes = [8, 128], strides = [1, 1]} : vector<8x512xf32> to vector<8x128xf32>
    %545 = arith.negf %544 : vector<8x128xf32>
    %546 = math.exp %545 : vector<8x128xf32>
    %cst_136 = arith.constant 1.000000e+00 : f32
    %547 = vector.broadcast %cst_136 : f32 to vector<8x128xf32>
    %548 = arith.addf %547, %546 : vector<8x128xf32>
    %549 = arith.divf %547, %548 : vector<8x128xf32>
    %550 = vector.extract_strided_slice %543 {offsets = [0, 128], sizes = [8, 128], strides = [1, 1]} : vector<8x512xf32> to vector<8x128xf32>
    %551 = arith.negf %550 : vector<8x128xf32>
    %552 = math.exp %551 : vector<8x128xf32>
    %cst_137 = arith.constant 1.000000e+00 : f32
    %553 = vector.broadcast %cst_137 : f32 to vector<8x128xf32>
    %554 = arith.addf %553, %552 : vector<8x128xf32>
    %555 = arith.divf %553, %554 : vector<8x128xf32>
    %556 = vector.extract_strided_slice %543 {offsets = [0, 256], sizes = [8, 128], strides = [1, 1]} : vector<8x512xf32> to vector<8x128xf32>
    %557 = math.tanh %556 : vector<8x128xf32>
    %558 = vector.extract_strided_slice %543 {offsets = [0, 384], sizes = [8, 128], strides = [1, 1]} : vector<8x512xf32> to vector<8x128xf32>
    %559 = arith.negf %558 : vector<8x128xf32>
    %560 = math.exp %559 : vector<8x128xf32>
    %cst_138 = arith.constant 1.000000e+00 : f32
    %561 = vector.broadcast %cst_138 : f32 to vector<8x128xf32>
    %562 = arith.addf %561, %560 : vector<8x128xf32>
    %563 = arith.divf %561, %562 : vector<8x128xf32>
    %564 = arith.mulf %555, %475 : vector<8x128xf32>
    %565 = arith.mulf %549, %557 : vector<8x128xf32>
    %566 = arith.addf %564, %565 : vector<8x128xf32>
    %567 = math.tanh %566 : vector<8x128xf32>
    %568 = arith.mulf %563, %567 : vector<8x128xf32>
    %cst_139 = arith.constant 0.000000e+00 : f32
    %569 = vector.shape_cast %539 : vector<8x1xi1> to vector<8x1xi1>
    %570 = vector.broadcast %569 : vector<8x1xi1> to vector<8x128xi1>
    %571 = vector.broadcast %cst_139 : f32 to vector<8x128xf32>
    %572 = arith.select %570, %568, %571 : vector<8x128xi1>, vector<8x128xf32>
    %573 = vector.shape_cast %539 : vector<8x1xi1> to vector<8x1xi1>
    %574 = vector.broadcast %573 : vector<8x1xi1> to vector<8x128xi1>
    %575 = arith.select %574, %568, %472 : vector<8x128xi1>, vector<8x128xf32>
    %576 = vector.shape_cast %539 : vector<8x1xi1> to vector<8x1xi1>
    %577 = vector.broadcast %576 : vector<8x1xi1> to vector<8x128xi1>
    %578 = arith.select %577, %566, %475 : vector<8x128xi1>, vector<8x128xf32>
    %579 = arith.index_cast %c5_i32 : i32 to index
    %c0_140 = arith.constant 0 : index
    %c0_141 = arith.constant 0 : index
    %580 = vector.load %arg16[%579, %c0_140, %c0_141] : memref<8x8x128xf32, #tpu.memory_space<vmem>>, vector<1x8x128xf32>
    %581 = vector.shape_cast %580 : vector<1x8x128xf32> to vector<8x128xf32>
    %582 = vector.shape_cast %572 : vector<8x128xf32> to vector<1x8x128xf32>
    tpu.vector_store %arg16[%579, %c0_140, %c0_141], %582 {strides = array<i32>} : memref<8x8x128xf32, #tpu.memory_space<vmem>>, vector<1x8x128xf32>,
    %583 = arith.index_cast %531 : i32 to index
    %c0_142 = arith.constant 0 : index
    %c0_143 = arith.constant 0 : index
    %584 = vector.load %arg15[%583, %c0_142, %c0_143] : memref<8x8x512xbf16, #tpu.memory_space<vmem>>, vector<1x8x512xbf16>
    %585 = vector.shape_cast %584 : vector<1x8x512xbf16> to vector<8x512xbf16>
    %586 = arith.extf %585 : vector<8x512xbf16> to vector<8x512xf32>
    %587 = vector.broadcast %14 : vector<1x512xf32> to vector<8x512xf32>
    %588 = arith.addf %586, %587 : vector<8x512xf32>
    %589 = vector.broadcast %531 : i32 to vector<8x1xi32>
    %590 = arith.cmpi slt, %589, %12 : vector<8x1xi32>
    %591 = arith.truncf %523 : vector<8x128xf32> to vector<8x128xbf16>
    %c0_144 = arith.constant 0 : index
    %c0_145 = arith.constant 0 : index
    %592 = vector.load %arg5[%c0_144, %c0_145] : memref<128x512xbf16, #tpu.memory_space<vmem>>, vector<128x512xbf16>
    %cst_146 = arith.constant dense<0.000000e+00> : vector<8x512xf32>
    %593 = tpu.matmul %591, %592, %cst_146 {dimension_numbers = #tpu.dot_dimension_numbers<[1], [0], [0], [1], [0, 0, 1, 1], [], []>} : vector<8x128xbf16>, vector<128x512xbf16>, vector<8x512xf32> -> vector<8x512xf32>
    %594 = arith.addf %588, %593 : vector<8x512xf32>
    %595 = vector.extract_strided_slice %594 {offsets = [0, 0], sizes = [8, 128], strides = [1, 1]} : vector<8x512xf32> to vector<8x128xf32>
    %596 = arith.negf %595 : vector<8x128xf32>
    %597 = math.exp %596 : vector<8x128xf32>
    %cst_147 = arith.constant 1.000000e+00 : f32
    %598 = vector.broadcast %cst_147 : f32 to vector<8x128xf32>
    %599 = arith.addf %598, %597 : vector<8x128xf32>
    %600 = arith.divf %598, %599 : vector<8x128xf32>
    %601 = vector.extract_strided_slice %594 {offsets = [0, 128], sizes = [8, 128], strides = [1, 1]} : vector<8x512xf32> to vector<8x128xf32>
    %602 = arith.negf %601 : vector<8x128xf32>
    %603 = math.exp %602 : vector<8x128xf32>
    %cst_148 = arith.constant 1.000000e+00 : f32
    %604 = vector.broadcast %cst_148 : f32 to vector<8x128xf32>
    %605 = arith.addf %604, %603 : vector<8x128xf32>
    %606 = arith.divf %604, %605 : vector<8x128xf32>
    %607 = vector.extract_strided_slice %594 {offsets = [0, 256], sizes = [8, 128], strides = [1, 1]} : vector<8x512xf32> to vector<8x128xf32>
    %608 = math.tanh %607 : vector<8x128xf32>
    %609 = vector.extract_strided_slice %594 {offsets = [0, 384], sizes = [8, 128], strides = [1, 1]} : vector<8x512xf32> to vector<8x128xf32>
    %610 = arith.negf %609 : vector<8x128xf32>
    %611 = math.exp %610 : vector<8x128xf32>
    %cst_149 = arith.constant 1.000000e+00 : f32
    %612 = vector.broadcast %cst_149 : f32 to vector<8x128xf32>
    %613 = arith.addf %612, %611 : vector<8x128xf32>
    %614 = arith.divf %612, %613 : vector<8x128xf32>
    %615 = arith.mulf %606, %526 : vector<8x128xf32>
    %616 = arith.mulf %600, %608 : vector<8x128xf32>
    %617 = arith.addf %615, %616 : vector<8x128xf32>
    %618 = math.tanh %617 : vector<8x128xf32>
    %619 = arith.mulf %614, %618 : vector<8x128xf32>
    %cst_150 = arith.constant 0.000000e+00 : f32
    %620 = vector.shape_cast %590 : vector<8x1xi1> to vector<8x1xi1>
    %621 = vector.broadcast %620 : vector<8x1xi1> to vector<8x128xi1>
    %622 = vector.broadcast %cst_150 : f32 to vector<8x128xf32>
    %623 = arith.select %621, %619, %622 : vector<8x128xi1>, vector<8x128xf32>
    %624 = vector.shape_cast %590 : vector<8x1xi1> to vector<8x1xi1>
    %625 = vector.broadcast %624 : vector<8x1xi1> to vector<8x128xi1>
    %626 = arith.select %625, %619, %523 : vector<8x128xi1>, vector<8x128xf32>
    %627 = vector.shape_cast %590 : vector<8x1xi1> to vector<8x1xi1>
    %628 = vector.broadcast %627 : vector<8x1xi1> to vector<8x128xi1>
    %629 = arith.select %628, %617, %526 : vector<8x128xi1>, vector<8x128xf32>
    %630 = arith.index_cast %531 : i32 to index
    %c0_151 = arith.constant 0 : index
    %c0_152 = arith.constant 0 : index
    %631 = vector.load %arg17[%630, %c0_151, %c0_152] : memref<8x8x128xf32, #tpu.memory_space<vmem>>, vector<1x8x128xf32>
    %632 = vector.shape_cast %631 : vector<1x8x128xf32> to vector<8x128xf32>
    %633 = vector.shape_cast %623 : vector<8x128xf32> to vector<1x8x128xf32>
    tpu.vector_store %arg17[%630, %c0_151, %c0_152], %633 {strides = array<i32>} : memref<8x8x128xf32, #tpu.memory_space<vmem>>, vector<1x8x128xf32>,
    %c6_i32 = arith.constant 6 : i32
    %c7_i32_153 = arith.constant 7 : i32
    %634 = arith.subi %c7_i32_153, %c6_i32 : i32
    %635 = arith.index_cast %c6_i32 : i32 to index
    %c0_154 = arith.constant 0 : index
    %c0_155 = arith.constant 0 : index
    %636 = vector.load %arg14[%635, %c0_154, %c0_155] : memref<8x8x512xbf16, #tpu.memory_space<vmem>>, vector<1x8x512xbf16>
    %637 = vector.shape_cast %636 : vector<1x8x512xbf16> to vector<8x512xbf16>
    %638 = arith.extf %637 : vector<8x512xbf16> to vector<8x512xf32>
    %639 = vector.broadcast %13 : vector<1x512xf32> to vector<8x512xf32>
    %640 = arith.addf %638, %639 : vector<8x512xf32>
    %641 = vector.broadcast %c6_i32 : i32 to vector<8x1xi32>
    %642 = arith.cmpi slt, %641, %12 : vector<8x1xi32>
    %643 = arith.truncf %575 : vector<8x128xf32> to vector<8x128xbf16>
    %c0_156 = arith.constant 0 : index
    %c0_157 = arith.constant 0 : index
    %644 = vector.load %arg4[%c0_156, %c0_157] : memref<128x512xbf16, #tpu.memory_space<vmem>>, vector<128x512xbf16>
    %cst_158 = arith.constant dense<0.000000e+00> : vector<8x512xf32>
    %645 = tpu.matmul %643, %644, %cst_158 {dimension_numbers = #tpu.dot_dimension_numbers<[1], [0], [0], [1], [0, 0, 1, 1], [], []>} : vector<8x128xbf16>, vector<128x512xbf16>, vector<8x512xf32> -> vector<8x512xf32>
    %646 = arith.addf %640, %645 : vector<8x512xf32>
    %647 = vector.extract_strided_slice %646 {offsets = [0, 0], sizes = [8, 128], strides = [1, 1]} : vector<8x512xf32> to vector<8x128xf32>
    %648 = arith.negf %647 : vector<8x128xf32>
    %649 = math.exp %648 : vector<8x128xf32>
    %cst_159 = arith.constant 1.000000e+00 : f32
    %650 = vector.broadcast %cst_159 : f32 to vector<8x128xf32>
    %651 = arith.addf %650, %649 : vector<8x128xf32>
    %652 = arith.divf %650, %651 : vector<8x128xf32>
    %653 = vector.extract_strided_slice %646 {offsets = [0, 128], sizes = [8, 128], strides = [1, 1]} : vector<8x512xf32> to vector<8x128xf32>
    %654 = arith.negf %653 : vector<8x128xf32>
    %655 = math.exp %654 : vector<8x128xf32>
    %cst_160 = arith.constant 1.000000e+00 : f32
    %656 = vector.broadcast %cst_160 : f32 to vector<8x128xf32>
    %657 = arith.addf %656, %655 : vector<8x128xf32>
    %658 = arith.divf %656, %657 : vector<8x128xf32>
    %659 = vector.extract_strided_slice %646 {offsets = [0, 256], sizes = [8, 128], strides = [1, 1]} : vector<8x512xf32> to vector<8x128xf32>
    %660 = math.tanh %659 : vector<8x128xf32>
    %661 = vector.extract_strided_slice %646 {offsets = [0, 384], sizes = [8, 128], strides = [1, 1]} : vector<8x512xf32> to vector<8x128xf32>
    %662 = arith.negf %661 : vector<8x128xf32>
    %663 = math.exp %662 : vector<8x128xf32>
    %cst_161 = arith.constant 1.000000e+00 : f32
    %664 = vector.broadcast %cst_161 : f32 to vector<8x128xf32>
    %665 = arith.addf %664, %663 : vector<8x128xf32>
    %666 = arith.divf %664, %665 : vector<8x128xf32>
    %667 = arith.mulf %658, %578 : vector<8x128xf32>
    %668 = arith.mulf %652, %660 : vector<8x128xf32>
    %669 = arith.addf %667, %668 : vector<8x128xf32>
    %670 = math.tanh %669 : vector<8x128xf32>
    %671 = arith.mulf %666, %670 : vector<8x128xf32>
    %cst_162 = arith.constant 0.000000e+00 : f32
    %672 = vector.shape_cast %642 : vector<8x1xi1> to vector<8x1xi1>
    %673 = vector.broadcast %672 : vector<8x1xi1> to vector<8x128xi1>
    %674 = vector.broadcast %cst_162 : f32 to vector<8x128xf32>
    %675 = arith.select %673, %671, %674 : vector<8x128xi1>, vector<8x128xf32>
    %676 = vector.shape_cast %642 : vector<8x1xi1> to vector<8x1xi1>
    %677 = vector.broadcast %676 : vector<8x1xi1> to vector<8x128xi1>
    %678 = arith.select %677, %671, %575 : vector<8x128xi1>, vector<8x128xf32>
    %679 = vector.shape_cast %642 : vector<8x1xi1> to vector<8x1xi1>
    %680 = vector.broadcast %679 : vector<8x1xi1> to vector<8x128xi1>
    %681 = arith.select %680, %669, %578 : vector<8x128xi1>, vector<8x128xf32>
    %682 = arith.index_cast %c6_i32 : i32 to index
    %c0_163 = arith.constant 0 : index
    %c0_164 = arith.constant 0 : index
    %683 = vector.load %arg16[%682, %c0_163, %c0_164] : memref<8x8x128xf32, #tpu.memory_space<vmem>>, vector<1x8x128xf32>
    %684 = vector.shape_cast %683 : vector<1x8x128xf32> to vector<8x128xf32>
    %685 = vector.shape_cast %675 : vector<8x128xf32> to vector<1x8x128xf32>
    tpu.vector_store %arg16[%682, %c0_163, %c0_164], %685 {strides = array<i32>} : memref<8x8x128xf32, #tpu.memory_space<vmem>>, vector<1x8x128xf32>,
    %686 = arith.index_cast %634 : i32 to index
    %c0_165 = arith.constant 0 : index
    %c0_166 = arith.constant 0 : index
    %687 = vector.load %arg15[%686, %c0_165, %c0_166] : memref<8x8x512xbf16, #tpu.memory_space<vmem>>, vector<1x8x512xbf16>
    %688 = vector.shape_cast %687 : vector<1x8x512xbf16> to vector<8x512xbf16>
    %689 = arith.extf %688 : vector<8x512xbf16> to vector<8x512xf32>
    %690 = vector.broadcast %14 : vector<1x512xf32> to vector<8x512xf32>
    %691 = arith.addf %689, %690 : vector<8x512xf32>
    %692 = vector.broadcast %634 : i32 to vector<8x1xi32>
    %693 = arith.cmpi slt, %692, %12 : vector<8x1xi32>
    %694 = arith.truncf %626 : vector<8x128xf32> to vector<8x128xbf16>
    %c0_167 = arith.constant 0 : index
    %c0_168 = arith.constant 0 : index
    %695 = vector.load %arg5[%c0_167, %c0_168] : memref<128x512xbf16, #tpu.memory_space<vmem>>, vector<128x512xbf16>
    %cst_169 = arith.constant dense<0.000000e+00> : vector<8x512xf32>
    %696 = tpu.matmul %694, %695, %cst_169 {dimension_numbers = #tpu.dot_dimension_numbers<[1], [0], [0], [1], [0, 0, 1, 1], [], []>} : vector<8x128xbf16>, vector<128x512xbf16>, vector<8x512xf32> -> vector<8x512xf32>
    %697 = arith.addf %691, %696 : vector<8x512xf32>
    %698 = vector.extract_strided_slice %697 {offsets = [0, 0], sizes = [8, 128], strides = [1, 1]} : vector<8x512xf32> to vector<8x128xf32>
    %699 = arith.negf %698 : vector<8x128xf32>
    %700 = math.exp %699 : vector<8x128xf32>
    %cst_170 = arith.constant 1.000000e+00 : f32
    %701 = vector.broadcast %cst_170 : f32 to vector<8x128xf32>
    %702 = arith.addf %701, %700 : vector<8x128xf32>
    %703 = arith.divf %701, %702 : vector<8x128xf32>
    %704 = vector.extract_strided_slice %697 {offsets = [0, 128], sizes = [8, 128], strides = [1, 1]} : vector<8x512xf32> to vector<8x128xf32>
    %705 = arith.negf %704 : vector<8x128xf32>
    %706 = math.exp %705 : vector<8x128xf32>
    %cst_171 = arith.constant 1.000000e+00 : f32
    %707 = vector.broadcast %cst_171 : f32 to vector<8x128xf32>
    %708 = arith.addf %707, %706 : vector<8x128xf32>
    %709 = arith.divf %707, %708 : vector<8x128xf32>
    %710 = vector.extract_strided_slice %697 {offsets = [0, 256], sizes = [8, 128], strides = [1, 1]} : vector<8x512xf32> to vector<8x128xf32>
    %711 = math.tanh %710 : vector<8x128xf32>
    %712 = vector.extract_strided_slice %697 {offsets = [0, 384], sizes = [8, 128], strides = [1, 1]} : vector<8x512xf32> to vector<8x128xf32>
    %713 = arith.negf %712 : vector<8x128xf32>
    %714 = math.exp %713 : vector<8x128xf32>
    %cst_172 = arith.constant 1.000000e+00 : f32
    %715 = vector.broadcast %cst_172 : f32 to vector<8x128xf32>
    %716 = arith.addf %715, %714 : vector<8x128xf32>
    %717 = arith.divf %715, %716 : vector<8x128xf32>
    %718 = arith.mulf %709, %629 : vector<8x128xf32>
    %719 = arith.mulf %703, %711 : vector<8x128xf32>
    %720 = arith.addf %718, %719 : vector<8x128xf32>
    %721 = math.tanh %720 : vector<8x128xf32>
    %722 = arith.mulf %717, %721 : vector<8x128xf32>
    %cst_173 = arith.constant 0.000000e+00 : f32
    %723 = vector.shape_cast %693 : vector<8x1xi1> to vector<8x1xi1>
    %724 = vector.broadcast %723 : vector<8x1xi1> to vector<8x128xi1>
    %725 = vector.broadcast %cst_173 : f32 to vector<8x128xf32>
    %726 = arith.select %724, %722, %725 : vector<8x128xi1>, vector<8x128xf32>
    %727 = vector.shape_cast %693 : vector<8x1xi1> to vector<8x1xi1>
    %728 = vector.broadcast %727 : vector<8x1xi1> to vector<8x128xi1>
    %729 = arith.select %728, %722, %626 : vector<8x128xi1>, vector<8x128xf32>
    %730 = vector.shape_cast %693 : vector<8x1xi1> to vector<8x1xi1>
    %731 = vector.broadcast %730 : vector<8x1xi1> to vector<8x128xi1>
    %732 = arith.select %731, %720, %629 : vector<8x128xi1>, vector<8x128xf32>
    %733 = arith.index_cast %634 : i32 to index
    %c0_174 = arith.constant 0 : index
    %c0_175 = arith.constant 0 : index
    %734 = vector.load %arg17[%733, %c0_174, %c0_175] : memref<8x8x128xf32, #tpu.memory_space<vmem>>, vector<1x8x128xf32>
    %735 = vector.shape_cast %734 : vector<1x8x128xf32> to vector<8x128xf32>
    %736 = vector.shape_cast %726 : vector<8x128xf32> to vector<1x8x128xf32>
    tpu.vector_store %arg17[%733, %c0_174, %c0_175], %736 {strides = array<i32>} : memref<8x8x128xf32, #tpu.memory_space<vmem>>, vector<1x8x128xf32>,
    %c7_i32_176 = arith.constant 7 : i32
    %c7_i32_177 = arith.constant 7 : i32
    %737 = arith.subi %c7_i32_177, %c7_i32_176 : i32
    %738 = arith.index_cast %c7_i32_176 : i32 to index
    %c0_178 = arith.constant 0 : index
    %c0_179 = arith.constant 0 : index
    %739 = vector.load %arg14[%738, %c0_178, %c0_179] : memref<8x8x512xbf16, #tpu.memory_space<vmem>>, vector<1x8x512xbf16>
    %740 = vector.shape_cast %739 : vector<1x8x512xbf16> to vector<8x512xbf16>
    %741 = arith.extf %740 : vector<8x512xbf16> to vector<8x512xf32>
    %742 = vector.broadcast %13 : vector<1x512xf32> to vector<8x512xf32>
    %743 = arith.addf %741, %742 : vector<8x512xf32>
    %744 = vector.broadcast %c7_i32_176 : i32 to vector<8x1xi32>
    %745 = arith.cmpi slt, %744, %12 : vector<8x1xi32>
    %746 = arith.truncf %678 : vector<8x128xf32> to vector<8x128xbf16>
    %c0_180 = arith.constant 0 : index
    %c0_181 = arith.constant 0 : index
    %747 = vector.load %arg4[%c0_180, %c0_181] : memref<128x512xbf16, #tpu.memory_space<vmem>>, vector<128x512xbf16>
    %cst_182 = arith.constant dense<0.000000e+00> : vector<8x512xf32>
    %748 = tpu.matmul %746, %747, %cst_182 {dimension_numbers = #tpu.dot_dimension_numbers<[1], [0], [0], [1], [0, 0, 1, 1], [], []>} : vector<8x128xbf16>, vector<128x512xbf16>, vector<8x512xf32> -> vector<8x512xf32>
    %749 = arith.addf %743, %748 : vector<8x512xf32>
    %750 = vector.extract_strided_slice %749 {offsets = [0, 0], sizes = [8, 128], strides = [1, 1]} : vector<8x512xf32> to vector<8x128xf32>
    %751 = arith.negf %750 : vector<8x128xf32>
    %752 = math.exp %751 : vector<8x128xf32>
    %cst_183 = arith.constant 1.000000e+00 : f32
    %753 = vector.broadcast %cst_183 : f32 to vector<8x128xf32>
    %754 = arith.addf %753, %752 : vector<8x128xf32>
    %755 = arith.divf %753, %754 : vector<8x128xf32>
    %756 = vector.extract_strided_slice %749 {offsets = [0, 128], sizes = [8, 128], strides = [1, 1]} : vector<8x512xf32> to vector<8x128xf32>
    %757 = arith.negf %756 : vector<8x128xf32>
    %758 = math.exp %757 : vector<8x128xf32>
    %cst_184 = arith.constant 1.000000e+00 : f32
    %759 = vector.broadcast %cst_184 : f32 to vector<8x128xf32>
    %760 = arith.addf %759, %758 : vector<8x128xf32>
    %761 = arith.divf %759, %760 : vector<8x128xf32>
    %762 = vector.extract_strided_slice %749 {offsets = [0, 256], sizes = [8, 128], strides = [1, 1]} : vector<8x512xf32> to vector<8x128xf32>
    %763 = math.tanh %762 : vector<8x128xf32>
    %764 = vector.extract_strided_slice %749 {offsets = [0, 384], sizes = [8, 128], strides = [1, 1]} : vector<8x512xf32> to vector<8x128xf32>
    %765 = arith.negf %764 : vector<8x128xf32>
    %766 = math.exp %765 : vector<8x128xf32>
    %cst_185 = arith.constant 1.000000e+00 : f32
    %767 = vector.broadcast %cst_185 : f32 to vector<8x128xf32>
    %768 = arith.addf %767, %766 : vector<8x128xf32>
    %769 = arith.divf %767, %768 : vector<8x128xf32>
    %770 = arith.mulf %761, %681 : vector<8x128xf32>
    %771 = arith.mulf %755, %763 : vector<8x128xf32>
    %772 = arith.addf %770, %771 : vector<8x128xf32>
    %773 = math.tanh %772 : vector<8x128xf32>
    %774 = arith.mulf %769, %773 : vector<8x128xf32>
    %cst_186 = arith.constant 0.000000e+00 : f32
    %775 = vector.shape_cast %745 : vector<8x1xi1> to vector<8x1xi1>
    %776 = vector.broadcast %775 : vector<8x1xi1> to vector<8x128xi1>
    %777 = vector.broadcast %cst_186 : f32 to vector<8x128xf32>
    %778 = arith.select %776, %774, %777 : vector<8x128xi1>, vector<8x128xf32>
    %779 = vector.shape_cast %745 : vector<8x1xi1> to vector<8x1xi1>
    %780 = vector.broadcast %779 : vector<8x1xi1> to vector<8x128xi1>
    %781 = arith.select %780, %774, %678 : vector<8x128xi1>, vector<8x128xf32>
    %782 = vector.shape_cast %745 : vector<8x1xi1> to vector<8x1xi1>
    %783 = vector.broadcast %782 : vector<8x1xi1> to vector<8x128xi1>
    %784 = arith.select %783, %772, %681 : vector<8x128xi1>, vector<8x128xf32>
    %785 = arith.index_cast %c7_i32_176 : i32 to index
    %c0_187 = arith.constant 0 : index
    %c0_188 = arith.constant 0 : index
    %786 = vector.load %arg16[%785, %c0_187, %c0_188] : memref<8x8x128xf32, #tpu.memory_space<vmem>>, vector<1x8x128xf32>
    %787 = vector.shape_cast %786 : vector<1x8x128xf32> to vector<8x128xf32>
    %788 = vector.shape_cast %778 : vector<8x128xf32> to vector<1x8x128xf32>
    tpu.vector_store %arg16[%785, %c0_187, %c0_188], %788 {strides = array<i32>} : memref<8x8x128xf32, #tpu.memory_space<vmem>>, vector<1x8x128xf32>,
    %789 = arith.index_cast %737 : i32 to index
    %c0_189 = arith.constant 0 : index
    %c0_190 = arith.constant 0 : index
    %790 = vector.load %arg15[%789, %c0_189, %c0_190] : memref<8x8x512xbf16, #tpu.memory_space<vmem>>, vector<1x8x512xbf16>
    %791 = vector.shape_cast %790 : vector<1x8x512xbf16> to vector<8x512xbf16>
    %792 = arith.extf %791 : vector<8x512xbf16> to vector<8x512xf32>
    %793 = vector.broadcast %14 : vector<1x512xf32> to vector<8x512xf32>
    %794 = arith.addf %792, %793 : vector<8x512xf32>
    %795 = vector.broadcast %737 : i32 to vector<8x1xi32>
    %796 = arith.cmpi slt, %795, %12 : vector<8x1xi32>
    %797 = arith.truncf %729 : vector<8x128xf32> to vector<8x128xbf16>
    %c0_191 = arith.constant 0 : index
    %c0_192 = arith.constant 0 : index
    %798 = vector.load %arg5[%c0_191, %c0_192] : memref<128x512xbf16, #tpu.memory_space<vmem>>, vector<128x512xbf16>
    %cst_193 = arith.constant dense<0.000000e+00> : vector<8x512xf32>
    %799 = tpu.matmul %797, %798, %cst_193 {dimension_numbers = #tpu.dot_dimension_numbers<[1], [0], [0], [1], [0, 0, 1, 1], [], []>} : vector<8x128xbf16>, vector<128x512xbf16>, vector<8x512xf32> -> vector<8x512xf32>
    %800 = arith.addf %794, %799 : vector<8x512xf32>
    %801 = vector.extract_strided_slice %800 {offsets = [0, 0], sizes = [8, 128], strides = [1, 1]} : vector<8x512xf32> to vector<8x128xf32>
    %802 = arith.negf %801 : vector<8x128xf32>
    %803 = math.exp %802 : vector<8x128xf32>
    %cst_194 = arith.constant 1.000000e+00 : f32
    %804 = vector.broadcast %cst_194 : f32 to vector<8x128xf32>
    %805 = arith.addf %804, %803 : vector<8x128xf32>
    %806 = arith.divf %804, %805 : vector<8x128xf32>
    %807 = vector.extract_strided_slice %800 {offsets = [0, 128], sizes = [8, 128], strides = [1, 1]} : vector<8x512xf32> to vector<8x128xf32>
    %808 = arith.negf %807 : vector<8x128xf32>
    %809 = math.exp %808 : vector<8x128xf32>
    %cst_195 = arith.constant 1.000000e+00 : f32
    %810 = vector.broadcast %cst_195 : f32 to vector<8x128xf32>
    %811 = arith.addf %810, %809 : vector<8x128xf32>
    %812 = arith.divf %810, %811 : vector<8x128xf32>
    %813 = vector.extract_strided_slice %800 {offsets = [0, 256], sizes = [8, 128], strides = [1, 1]} : vector<8x512xf32> to vector<8x128xf32>
    %814 = math.tanh %813 : vector<8x128xf32>
    %815 = vector.extract_strided_slice %800 {offsets = [0, 384], sizes = [8, 128], strides = [1, 1]} : vector<8x512xf32> to vector<8x128xf32>
    %816 = arith.negf %815 : vector<8x128xf32>
    %817 = math.exp %816 : vector<8x128xf32>
    %cst_196 = arith.constant 1.000000e+00 : f32
    %818 = vector.broadcast %cst_196 : f32 to vector<8x128xf32>
    %819 = arith.addf %818, %817 : vector<8x128xf32>
    %820 = arith.divf %818, %819 : vector<8x128xf32>
    %821 = arith.mulf %812, %732 : vector<8x128xf32>
    %822 = arith.mulf %806, %814 : vector<8x128xf32>
    %823 = arith.addf %821, %822 : vector<8x128xf32>
    %824 = math.tanh %823 : vector<8x128xf32>
    %825 = arith.mulf %820, %824 : vector<8x128xf32>
    %cst_197 = arith.constant 0.000000e+00 : f32
    %826 = vector.shape_cast %796 : vector<8x1xi1> to vector<8x1xi1>
    %827 = vector.broadcast %826 : vector<8x1xi1> to vector<8x128xi1>
    %828 = vector.broadcast %cst_197 : f32 to vector<8x128xf32>
    %829 = arith.select %827, %825, %828 : vector<8x128xi1>, vector<8x128xf32>
    %830 = vector.shape_cast %796 : vector<8x1xi1> to vector<8x1xi1>
    %831 = vector.broadcast %830 : vector<8x1xi1> to vector<8x128xi1>
    %832 = arith.select %831, %825, %729 : vector<8x128xi1>, vector<8x128xf32>
    %833 = vector.shape_cast %796 : vector<8x1xi1> to vector<8x1xi1>
    %834 = vector.broadcast %833 : vector<8x1xi1> to vector<8x128xi1>
    %835 = arith.select %834, %823, %732 : vector<8x128xi1>, vector<8x128xf32>
    %836 = arith.index_cast %737 : i32 to index
    %c0_198 = arith.constant 0 : index
    %c0_199 = arith.constant 0 : index
    %837 = vector.load %arg17[%836, %c0_198, %c0_199] : memref<8x8x128xf32, #tpu.memory_space<vmem>>, vector<1x8x128xf32>
    %838 = vector.shape_cast %837 : vector<1x8x128xf32> to vector<8x128xf32>
    %839 = vector.shape_cast %829 : vector<8x128xf32> to vector<1x8x128xf32>
    tpu.vector_store %arg17[%836, %c0_198, %c0_199], %839 {strides = array<i32>} : memref<8x8x128xf32, #tpu.memory_space<vmem>>, vector<1x8x128xf32>,
    %c8_i32 = arith.constant 8 : i32
    %c0_200 = arith.constant 0 : index
    %c0_201 = arith.constant 0 : index
    %c0_202 = arith.constant 0 : index
    %840 = vector.load %arg16[%c0_200, %c0_201, %c0_202] : memref<8x8x128xf32, #tpu.memory_space<vmem>>, vector<8x8x128xf32>
    %841 = vector.shape_cast %840 : vector<8x8x128xf32> to vector<64x128xf32>
    %c0_203 = arith.constant 0 : index
    %c0_204 = arith.constant 0 : index
    %c0_205 = arith.constant 0 : index
    %842 = vector.load %arg17[%c0_203, %c0_204, %c0_205] : memref<8x8x128xf32, #tpu.memory_space<vmem>>, vector<8x8x128xf32>
    %843 = vector.shape_cast %842 : vector<8x8x128xf32> to vector<64x128xf32>
    %844 = tpu.concatenate %841, %843 in 1 : vector<64x128xf32>, vector<64x128xf32> -> vector<64x256xf32>
    %845 = arith.truncf %844 : vector<64x256xf32> to vector<64x256xbf16>
    %c0_206 = arith.constant 0 : index
    %c0_207 = arith.constant 0 : index
    %846 = vector.load %arg7[%c0_206, %c0_207] : memref<256x128xbf16, #tpu.memory_space<vmem>>, vector<256x128xbf16>
    %cst_208 = arith.constant dense<0.000000e+00> : vector<64x128xf32>
    %847 = tpu.matmul %845, %846, %cst_208 {dimension_numbers = #tpu.dot_dimension_numbers<[1], [0], [0], [1], [0, 0, 1, 1], [], []>} : vector<64x256xbf16>, vector<256x128xbf16>, vector<64x128xf32> -> vector<64x128xf32>
    %c0_209 = arith.constant 0 : index
    %c0_210 = arith.constant 0 : index
    %848 = vector.load %arg8[%c0_209, %c0_210] : memref<1x128xf32, #tpu.memory_space<vmem>>, vector<1x128xf32>
    %849 = vector.broadcast %848 : vector<1x128xf32> to vector<64x128xf32>
    %850 = arith.addf %847, %849 : vector<64x128xf32>
    %851 = math.tanh %850 : vector<64x128xf32>
    %c0_211 = arith.constant 0 : index
    %c0_212 = arith.constant 0 : index
    %852 = vector.load %arg9[%c0_211, %c0_212] : memref<1x128xf32, #tpu.memory_space<vmem>>, vector<1x128xf32>
    %853 = vector.broadcast %852 : vector<1x128xf32> to vector<64x128xf32>
    %854 = arith.mulf %851, %853 : vector<64x128xf32>
    %855 = vector.shape_cast %854 : vector<64x128xf32> to vector<8x8x128xf32>
    %cst_213 = arith.constant dense<0.000000e+00> : vector<8x8xf32>
    %856 = vector.multi_reduction <add>, %855, %cst_213 [2] : vector<8x8x128xf32> to vector<8x8xf32>
    %857 = vector.shape_cast %856 : vector<8x8xf32> to vector<8x8x1xf32>
    %858 = tpu.iota {dimensions = array<i32: 0>} : vector<8x8x1xi32>
    %859 = vector.shape_cast %12 : vector<8x1xi32> to vector<1x8x1xi32>
    %860 = vector.broadcast %859 : vector<1x8x1xi32> to vector<8x8x1xi32>
    %861 = arith.cmpi slt, %858, %860 : vector<8x8x1xi32>
    %cst_214 = arith.constant -1.000000e+30 : f32
    %862 = vector.broadcast %cst_214 : f32 to vector<8x8x1xf32>
    %863 = arith.select %861, %857, %862 : vector<8x8x1xi1>, vector<8x8x1xf32>
    %cst_215 = arith.constant dense<0xFF800000> : vector<8x1xf32>
    %864 = vector.multi_reduction <maximumf>, %863, %cst_215 [0] : vector<8x8x1xf32> to vector<8x1xf32>
    %865 = vector.shape_cast %864 : vector<8x1xf32> to vector<1x8x1xf32>
    %866 = vector.broadcast %865 : vector<1x8x1xf32> to vector<8x8x1xf32>
    %867 = arith.subf %857, %866 : vector<8x8x1xf32>
    %868 = math.exp %867 : vector<8x8x1xf32>
    %cst_216 = arith.constant 0.000000e+00 : f32
    %869 = vector.broadcast %cst_216 : f32 to vector<8x8x1xf32>
    %870 = arith.select %861, %868, %869 : vector<8x8x1xi1>, vector<8x8x1xf32>
    %cst_217 = arith.constant dense<0.000000e+00> : vector<8x1xf32>
    %871 = vector.multi_reduction <add>, %870, %cst_217 [0] : vector<8x8x1xf32> to vector<8x1xf32>
    %872 = vector.shape_cast %871 : vector<8x1xf32> to vector<1x8x1xf32>
    %cst_218 = arith.constant 1.000000e-30 : f32
    %873 = vector.broadcast %cst_218 : f32 to vector<1x8x1xf32>
    %874 = arith.maximumf %872, %873 : vector<1x8x1xf32>
    %875 = tpu.reciprocal %874 {approx = true} : vector<1x8x1xf32> -> vector<1x8x1xf32>
    %876 = vector.broadcast %875 : vector<1x8x1xf32> to vector<8x8x1xf32>
    %877 = arith.mulf %870, %876 : vector<8x8x1xf32>
    %c0_219 = arith.constant 0 : index
    %c0_220 = arith.constant 0 : index
    %c0_221 = arith.constant 0 : index
    %878 = vector.load %arg16[%c0_219, %c0_220, %c0_221] : memref<8x8x128xf32, #tpu.memory_space<vmem>>, vector<8x8x128xf32>
    %879 = vector.broadcast %877 : vector<8x8x1xf32> to vector<8x8x128xf32>
    %880 = arith.mulf %878, %879 : vector<8x8x128xf32>
    %cst_222 = arith.constant dense<0.000000e+00> : vector<8x128xf32>
    %881 = vector.multi_reduction <add>, %880, %cst_222 [0] : vector<8x8x128xf32> to vector<8x128xf32>
    %c0_223 = arith.constant 0 : index
    %c0_224 = arith.constant 0 : index
    %c0_225 = arith.constant 0 : index
    %882 = vector.load %arg17[%c0_223, %c0_224, %c0_225] : memref<8x8x128xf32, #tpu.memory_space<vmem>>, vector<8x8x128xf32>
    %883 = vector.broadcast %877 : vector<8x8x1xf32> to vector<8x8x128xf32>
    %884 = arith.mulf %882, %883 : vector<8x8x128xf32>
    %cst_226 = arith.constant dense<0.000000e+00> : vector<8x128xf32>
    %885 = vector.multi_reduction <add>, %884, %cst_226 [0] : vector<8x8x128xf32> to vector<8x128xf32>
    %886 = tpu.concatenate %881, %885 in 1 : vector<8x128xf32>, vector<8x128xf32> -> vector<8x256xf32>
    %887 = arith.truncf %886 : vector<8x256xf32> to vector<8x256xbf16>
    %c0_227 = arith.constant 0 : index
    %c0_228 = arith.constant 0 : index
    %888 = vector.load %arg10[%c0_227, %c0_228] : memref<256x128xbf16, #tpu.memory_space<vmem>>, vector<256x128xbf16>
    %cst_229 = arith.constant dense<0.000000e+00> : vector<8x128xf32>
    %889 = tpu.matmul %887, %888, %cst_229 {dimension_numbers = #tpu.dot_dimension_numbers<[1], [0], [0], [1], [0, 0, 1, 1], [], []>} : vector<8x256xbf16>, vector<256x128xbf16>, vector<8x128xf32> -> vector<8x128xf32>
    %c0_230 = arith.constant 0 : index
    %c0_231 = arith.constant 0 : index
    %890 = vector.load %arg11[%c0_230, %c0_231] : memref<1x128xf32, #tpu.memory_space<vmem>>, vector<1x128xf32>
    %891 = vector.broadcast %890 : vector<1x128xf32> to vector<8x128xf32>
    %892 = arith.addf %889, %891 : vector<8x128xf32>
    %c0_232 = arith.constant 0 : index
    %c0_233 = arith.constant 0 : index
    %893 = vector.load %arg12[%c0_232, %c0_233] : memref<8x128xf32, #tpu.memory_space<vmem>>, vector<8x128xf32>
    tpu.vector_store %arg12[%c0_232, %c0_233], %892 {strides = array<i32>} : memref<8x128xf32, #tpu.memory_space<vmem>>, vector<8x128xf32>,
    %c0_234 = arith.constant 0 : index
    %c0_235 = arith.constant 0 : index
    %894 = vector.load %arg13[%c0_234, %c0_235] : memref<8x256xf32, #tpu.memory_space<vmem>>, vector<8x256xf32>
    tpu.vector_store %arg13[%c0_234, %c0_235], %886 {strides = array<i32>} : memref<8x256xf32, #tpu.memory_space<vmem>>, vector<8x256xf32>,
    return
  }
  func.func @transform_0(%arg0: i32) -> (i32, i32, i32) {
    %c0_i32 = arith.constant 0 : i32
    %c0_i32_0 = arith.constant 0 : i32
    %c0_i32_1 = arith.constant 0 : i32
    return %arg0, %c0_i32, %c0_i32_0 : i32, i32, i32
  }
  func.func @transform_1(%arg0: i32) -> (i32, i32) {
    %c0_i32 = arith.constant 0 : i32
    %c0_i32_0 = arith.constant 0 : i32
    return %arg0, %c0_i32 : i32, i32
  }
  func.func @transform_2(%arg0: i32) -> (i32, i32) {
    %c0_i32 = arith.constant 0 : i32
    %c0_i32_0 = arith.constant 0 : i32
    %c0_i32_1 = arith.constant 0 : i32
    return %c0_i32, %c0_i32_0 : i32, i32
  }
  func.func @transform_3(%arg0: i32) -> (i32, i32) {
    %c0_i32 = arith.constant 0 : i32
    %c0_i32_0 = arith.constant 0 : i32
    %c0_i32_1 = arith.constant 0 : i32
    return %c0_i32, %c0_i32_0 : i32, i32
  }
  func.func @transform_4(%arg0: i32) -> (i32, i32) {
    %c0_i32 = arith.constant 0 : i32
    %c0_i32_0 = arith.constant 0 : i32
    %c0_i32_1 = arith.constant 0 : i32
    return %c0_i32, %c0_i32_0 : i32, i32
  }
  func.func @transform_5(%arg0: i32) -> (i32, i32) {
    %c0_i32 = arith.constant 0 : i32
    %c0_i32_0 = arith.constant 0 : i32
    %c0_i32_1 = arith.constant 0 : i32
    return %c0_i32, %c0_i32_0 : i32, i32
  }
  func.func @transform_6(%arg0: i32) -> (i32, i32) {
    %c0_i32 = arith.constant 0 : i32
    %c0_i32_0 = arith.constant 0 : i32
    %c0_i32_1 = arith.constant 0 : i32
    return %c0_i32, %c0_i32_0 : i32, i32
  }
  func.func @transform_7(%arg0: i32) -> (i32, i32) {
    %c0_i32 = arith.constant 0 : i32
    %c0_i32_0 = arith.constant 0 : i32
    %c0_i32_1 = arith.constant 0 : i32
    return %c0_i32, %c0_i32_0 : i32, i32
  }
  func.func @transform_8(%arg0: i32) -> (i32, i32) {
    %c0_i32 = arith.constant 0 : i32
    %c0_i32_0 = arith.constant 0 : i32
    %c0_i32_1 = arith.constant 0 : i32
    return %c0_i32, %c0_i32_0 : i32, i32
  }
  func.func @transform_9(%arg0: i32) -> (i32, i32) {
    %c0_i32 = arith.constant 0 : i32
    %c0_i32_0 = arith.constant 0 : i32
    %c0_i32_1 = arith.constant 0 : i32
    return %c0_i32, %c0_i32_0 : i32, i32
  }
  func.func @transform_10(%arg0: i32) -> (i32, i32) {
    %c0_i32 = arith.constant 0 : i32
    %c0_i32_0 = arith.constant 0 : i32
    %c0_i32_1 = arith.constant 0 : i32
    return %c0_i32, %c0_i32_0 : i32, i32
  }
  func.func @transform_11(%arg0: i32) -> (i32, i32) {
    %c0_i32 = arith.constant 0 : i32
    %c0_i32_0 = arith.constant 0 : i32
    return %arg0, %c0_i32 : i32, i32
  }
  func.func @transform_12(%arg0: i32) -> (i32, i32) {
    %c0_i32 = arith.constant 0 : i32
    %c0_i32_0 = arith.constant 0 : i32
    return %arg0, %c0_i32 : i32, i32
  }
}

</mosaic_0001>

<bundles_post_ra>
// kernel: rnn_multilabel_forward.1
= control target key start
LH: loop header
LB: loop body
LE: loop exit
PB: predicated region body
PF: predicated region fallthrough
CT: control target
= control target key end

     0   :  { %v11322_v3 = vmov 0   ;;  %s11307_s2 = inlined_call_operand.vmem [shape: bf16[128,1024], index: 2, kind: input, shape index: {}]   ;;  %s11308_s0 = inlined_call_operand.vmem [shape: bf16[1,64,128], index: 0, kind: input, shape index: {}]   ;;  %s11309_s3 = inlined_call_operand.vmem [shape: bf16[128,512], index: 3, kind: input, shape index: {}]   ;;  %s11310_s4 = inlined_call_operand.vmem [shape: bf16[128,512], index: 4, kind: input, shape index: {}]   ;;  %s11311_s1 = inlined_call_operand.vmem [shape: s32[8,1], index: 1, kind: input, shape index: {}]   ;;  %s11312_s5 = inlined_call_operand.vmem [shape: f32[1,1024], index: 5, kind: input, shape index: {}]   ;;  %s11313_s6 = inlined_call_operand.vmem [shape: bf16[256,128], index: 6, kind: input, shape index: {}]   ;;  %s11314_s7 = inlined_call_operand.vmem [shape: f32[1,128], index: 7, kind: input, shape index: {}]   ;;  %s11315_s8 = inlined_call_operand.vmem [shape: f32[1,128], index: 8, kind: input, shape index: {}]   ;;  %s11316_s9 = inlined_call_operand.vmem [shape: bf16[256,128], index: 9, kind: input, shape index: {}]   ;;  %s11317_s12 = inlined_call_operand.vmem [shape: f32[8,256], index: 12, kind: output, shape index: {1}]   ;;  %s11318_s10 = inlined_call_operand.vmem [shape: f32[1,128], index: 10, kind: input, shape index: {}]   ;;  %s11319_s11 = inlined_call_operand.vmem [shape: f32[8,128], index: 11, kind: output, shape index: {0}]  }
   0x1   :  { %v49_v0 = vld [vmem:[%s11307_s2] sm:$0xff]  ;;  %v50_v2 = vld [vmem:[%s11307_s2 + $0x8] sm:$0xff]  ;;  %489 = vmatprep.mubr.bf16.mxu0 %v11322_v3  ;;  %562 = vmatprep.mubr.bf16.mxu1 %v11322_v3  ;;  %v51_v63 = vld [vmem:[%s11307_s2 + $0x10] sm:$0xff] }
   0x2   :  { %v53_v1 = vld [vmem:[%s11307_s2 + $0x20] sm:$0xff]  ;;  %v54_v5 = vld [vmem:[%s11307_s2 + $0x28] sm:$0xff]  ;;  %7650 = vset.pattern.permute.xlu0 %v11322_v3  ;;  %7651 = vset.pattern.permute.xlu1 %v11322_v3 }
   0x3   :  { %v6829_v4 = vcombine.high %v49_v0, %v53_v1  ;;  %v6828_v6 = vcombine.low %v49_v0, %v53_v1  ;;  %v57_v7 = vld [vmem:[%s11307_s2 + $0x40] sm:$0xff]  ;;  %v6831_v9 = vcombine.high %v50_v2, %v54_v5  ;;  %v6830_v10 = vcombine.low %v50_v2, %v54_v5  ;;  %v58_v12 = vld [vmem:[%s11307_s2 + $0x48] sm:$0xff]  ;;  %v55_v0 = vld [vmem:[%s11307_s2 + $0x30] sm:$0xff] }
   0x4   :  { %v61_v8 = vld [vmem:[%s11307_s2 + $0x60] sm:$0xff]  ;;  %v62_v13 = vld [vmem:[%s11307_s2 + $0x68] sm:$0xff]  ;;  %v52_v1 = vld [vmem:[%s11307_s2 + $0x18] sm:$0xff] }
   0x5   :  { %v6837_v11 = vcombine.high %v57_v7, %v61_v8  ;;  %v65_v14 = vld [vmem:[%s11307_s2 + $0x80] sm:$0xff]  ;;  %457 = vmatprep.subr.bf16.mxu0 %v6829_v4  ;;  %v6839_v15 = vcombine.high %v58_v12, %v62_v13  ;;  %v66_v17 = vld [vmem:[%s11307_s2 + $0x88] sm:$0xff]  ;;  %530 = vmatprep.subr.bf16.mxu1 %v6831_v9  ;;  %v6836_v19 = vcombine.low %v57_v7, %v61_v8  ;;  %v56_v2 = vld [vmem:[%s11307_s2 + $0x38] sm:$0xff] }
   0x6   :  { %v69_v16 = vld [vmem:[%s11307_s2 + $0xa0] sm:$0xff]  ;;  %v70_v18 = vld [vmem:[%s11307_s2 + $0xa8] sm:$0xff]  ;;  %458 = vmatpush1.bf16.msra.mxu0 %v6828_v6  ;;  %531 = vmatpush1.bf16.msra.mxu1 %v6830_v10  ;;  %v6838_v20 = vcombine.low %v58_v12, %v62_v13  ;;  %v6833_v7 = vcombine.high %v51_v63, %v55_v0  ;;  %v6835_v8 = vcombine.high %v52_v1, %v56_v2  ;;  %v59_v9 = vld [vmem:[%s11307_s2 + $0x50] sm:$0xff] }
   0x7   :  { %459 = vmatprep.subr.bf16.mxu0 %v6837_v11  ;;  %v6845_v21 = vcombine.high %v65_v14, %v69_v16  ;;  %532 = vmatprep.subr.bf16.mxu1 %v6839_v15  ;;  %v6847_v22 = vcombine.high %v66_v17, %v70_v18  ;;  %v73_v23 = vld [vmem:[%s11307_s2 + $0xc0] sm:$0xff]  ;;  %v74_v25 = vld [vmem:[%s11307_s2 + $0xc8] sm:$0xff]  ;;  %v6844_v27 = vcombine.low %v65_v14, %v69_v16  ;;  %v63_v10 = vld [vmem:[%s11307_s2 + $0x70] sm:$0xff] }
   0x8   :  { %v77_v24 = vld [vmem:[%s11307_s2 + $0xe0] sm:$0xff]  ;;  %v78_v26 = vld [vmem:[%s11307_s2 + $0xe8] sm:$0xff]  ;;  %v6846_v28 = vcombine.low %v66_v17, %v70_v18  ;;  %v60_v11 = vld [vmem:[%s11307_s2 + $0x58] sm:$0xff]  ;;  %v6832_v13 = vcombine.low %v51_v63, %v55_v0  ;;  %v6834_v14 = vcombine.low %v52_v1, %v56_v2  ;;  %v6841_v15 = vcombine.high %v59_v9, %v63_v10 }
   0x9   :  { %v6853_v29 = vcombine.high %v73_v23, %v77_v24  ;;  %v6855_v30 = vcombine.high %v74_v25, %v78_v26  ;;  %v81_v31 = vld [vmem:[%s11307_s2 + $0x100] sm:$0xff]  ;;  %v82_v33 = vld [vmem:[%s11307_s2 + $0x108] sm:$0xff]  ;;  %v6852_v35 = vcombine.low %v73_v23, %v77_v24  ;;  %v6854_v36 = vcombine.low %v74_v25, %v78_v26  ;;  %v64_v12 = vld [vmem:[%s11307_s2 + $0x78] sm:$0xff] }
   0xa   :  { %460 = vmatpush1.bf16.msra.mxu0 %v6836_v19  ;;  %533 = vmatpush1.bf16.msra.mxu1 %v6838_v20  ;;  %v85_v32 = vld [vmem:[%s11307_s2 + $0x120] sm:$0xff]  ;;  %v86_v34 = vld [vmem:[%s11307_s2 + $0x128] sm:$0xff]  ;;  %v6843_v16 = vcombine.high %v60_v11, %v64_v12  ;;  %v67_v17 = vld [vmem:[%s11307_s2 + $0x90] sm:$0xff] }
   0xb   :  { %461 = vmatprep.subr.bf16.mxu0 %v6845_v21  ;;  %534 = vmatprep.subr.bf16.mxu1 %v6847_v22  ;;  %v6861_v37 = vcombine.high %v81_v31, %v85_v32  ;;  %v89_v38 = vld [vmem:[%s11307_s2 + $0x140] sm:$0xff]  ;;  %v6863_v39 = vcombine.high %v82_v33, %v86_v34  ;;  %v90_v41 = vld [vmem:[%s11307_s2 + $0x148] sm:$0xff]  ;;  %v6860_v43 = vcombine.low %v81_v31, %v85_v32  ;;  %v71_v18 = vld [vmem:[%s11307_s2 + $0xb0] sm:$0xff] }
   0xc   :  { %v93_v40 = vld [vmem:[%s11307_s2 + $0x160] sm:$0xff]  ;;  %v94_v42 = vld [vmem:[%s11307_s2 + $0x168] sm:$0xff]  ;;  %v6862_v44 = vcombine.low %v82_v33, %v86_v34  ;;  %v68_v19 = vld [vmem:[%s11307_s2 + $0x98] sm:$0xff]  ;;  %v6840_v21 = vcombine.low %v59_v9, %v63_v10  ;;  %v6842_v22 = vcombine.low %v60_v11, %v64_v12  ;;  %v6849_v24 = vcombine.high %v67_v17, %v71_v18 }
   0xd   :  { %v6869_v45 = vcombine.high %v89_v38, %v93_v40  ;;  %v97_v46 = vld [vmem:[%s11307_s2 + $0x180] sm:$0xff]  ;;  %v6871_v47 = vcombine.high %v90_v41, %v94_v42  ;;  %v98_v49 = vld [vmem:[%s11307_s2 + $0x188] sm:$0xff]  ;;  %v6868_v51 = vcombine.low %v89_v38, %v93_v40  ;;  %v6870_v52 = vcombine.low %v90_v41, %v94_v42  ;;  %v72_v20 = vld [vmem:[%s11307_s2 + $0xb8] sm:$0xff] }
   0xe   :  { %462 = vmatpush1.bf16.msra.mxu0 %v6844_v27  ;;  %535 = vmatpush1.bf16.msra.mxu1 %v6846_v28  ;;  %v101_v48 = vld [vmem:[%s11307_s2 + $0x1a0] sm:$0xff]  ;;  %v102_v50 = vld [vmem:[%s11307_s2 + $0x1a8] sm:$0xff]  ;;  %v6851_v25 = vcombine.high %v68_v19, %v72_v20  ;;  %v75_v26 = vld [vmem:[%s11307_s2 + $0xd0] sm:$0xff]  ;;  %v6850_v31 = vcombine.low %v68_v19, %v72_v20 }
   0xf   :  { %463 = vmatprep.subr.bf16.mxu0 %v6853_v29  ;;  %536 = vmatprep.subr.bf16.mxu1 %v6855_v30  ;;  %v6877_v53 = vcombine.high %v97_v46, %v101_v48  ;;  %v6879_v54 = vcombine.high %v98_v49, %v102_v50  ;;  %v105_v55 = vld [vmem:[%s11307_s2 + $0x1c0] sm:$0xff]  ;;  %v106_v57 = vld [vmem:[%s11307_s2 + $0x1c8] sm:$0xff]  ;;  %v6876_v59 = vcombine.low %v97_v46, %v101_v48  ;;  %v79_v27 = vld [vmem:[%s11307_s2 + $0xf0] sm:$0xff] }
  0x10   :  { %v109_v56 = vld [vmem:[%s11307_s2 + $0x1e0] sm:$0xff]  ;;  %v110_v58 = vld [vmem:[%s11307_s2 + $0x1e8] sm:$0xff]  ;;  %v6878_v60 = vcombine.low %v98_v49, %v102_v50  ;;  %v76_v28 = vld [vmem:[%s11307_s2 + $0xd8] sm:$0xff]  ;;  %v6848_v30 = vcombine.low %v67_v17, %v71_v18  ;;  %v6857_v32 = vcombine.high %v75_v26, %v79_v27  ;;  %v6856_v38 = vcombine.low %v75_v26, %v79_v27 }
  0x11   :  { %v6885_v61 = vcombine.high %v105_v55, %v109_v56  ;;  %v6887_v62 = vcombine.high %v106_v57, %v110_v58  ;;  %v6884_v4 = vcombine.low %v105_v55, %v109_v56  ;;  %v6886_v5 = vcombine.low %v106_v57, %v110_v58  ;;  %v8551_v6 = vld [vmem:[%s11308_s0] sm:$0xff]   ;;  %v8582_v23 = vld [vmem:[%s11308_s0 + $0x8] sm:$0xff]   ;;  %v80_v29 = vld [vmem:[%s11307_s2 + $0xf8] sm:$0xff] }
  0x12   :  { %464 = vmatpush1.bf16.msra.mxu0 %v6852_v35  ;;  %537 = vmatpush1.bf16.msra.mxu1 %v6854_v36  ;;  %v6859_v33 = vcombine.high %v76_v28, %v80_v29  ;;  %v83_v34 = vld [vmem:[%s11307_s2 + $0x110] sm:$0xff]  ;;  %v84_v36 = vld [vmem:[%s11307_s2 + $0x118] sm:$0xff]  ;;  %v8721_v17 = vld [vmem:[%s11311_s1] sm:$0xff] }
  0x13   :  { %465 = vmatprep.subr.bf16.mxu0 %v6861_v37  ;;  %538 = vmatprep.subr.bf16.mxu1 %v6863_v39  ;;  %v87_v35 = vld [vmem:[%s11307_s2 + $0x130] sm:$0xff]  ;;  %v88_v37 = vld [vmem:[%s11307_s2 + $0x138] sm:$0xff]  ;;  %v6858_v39 = vcombine.low %v76_v28, %v80_v29  ;;  %11406 = vst [vmem:[#allocation6_spill] sm:$0xff] %v8721_v17  ;;  %vm1071_vm0 = vcmp.gt.s32.totalorder %v8721_v17, 0  ;;  %vm11403_vm1 = vcmp.gt.s32.totalorder %v8721_v17, 7  ;;  %vm1737_vm2 = vcmp.gt.s32.totalorder %v8721_v17, 1 }
  0x14   :  { %v8615_v40 = vld [vmem:[%s11308_s0 + $0x10] sm:$0xff]   ;;  %v6865_v41 = vcombine.high %v83_v34, %v87_v35  ;;  %v6867_v42 = vcombine.high %v84_v36, %v88_v37  ;;  %v96_v46 = vld [vmem:[%s11307_s2 + $0x178] sm:$0xff]  ;;  %v6866_v48 = vcombine.low %v84_v36, %v88_v37  ;;  %v1374_v19 = vsel %vm1071_vm0, 1, %v11322_v3 }
  0x15   :  { %v8648_v57 = vld [vmem:[%s11308_s0 + $0x18] sm:$0xff]   ;;  %v8681_v10 = vld [vmem:[%s11309_s3] ss:$16 sps:$4 sm:$0xff]   ;;  %v8692_v12 = vld [vmem:[%s11309_s3 + $0x24] ss:$16 sps:$4 sm:$0xff]   ;;  %v2041_v20 = vsel %vm1737_vm2, 1, %v11322_v3  ;;  %1376 = vperm.xlu0 %7650, %v1374_v19  }
  0x16   :  { %466 = vmatpush1.bf16.msra.mxu0 %v6860_v43  ;;  %539 = vmatpush1.bf16.msra.mxu1 %v6862_v44  ;;  %v91_v43 = vld [vmem:[%s11307_s2 + $0x150] sm:$0xff]  ;;  %v112_v63 = vld [vmem:[%s11307_s2 + $0x1f8] sm:$0xff]  ;;  %vm2387_vm3 = vcmp.gt.s32.totalorder %v8721_v17, 2  ;;  %vm11404_vm4 = vcmp.gt.s32.totalorder %v8721_v17, 6  ;;  %vm3037_vm5 = vcmp.gt.s32.totalorder %v8721_v17, 3  ;;  %vm2712_vm6 = vcmp.gt.s32.totalorder %v8721_v17, 5 }
  0x17   :  { %467 = vmatprep.subr.bf16.mxu0 %v6869_v45  ;;  %540 = vmatprep.subr.bf16.mxu1 %v6871_v47  ;;  %v95_v44 = vld [vmem:[%s11307_s2 + $0x170] sm:$0xff]  ;;  %v92_v45 = vld [vmem:[%s11307_s2 + $0x158] sm:$0xff]  ;;  %v6864_v47 = vcombine.low %v83_v34, %v87_v35  ;;  %v3341_v35 = vsel %vm3037_vm5, 1, %v11322_v3  ;;  %vm3362_vm7 = vcmp.gt.s32.totalorder %v8721_v17, 4 }
  0x18   :  { %v6873_v49 = vcombine.high %v91_v43, %v95_v44  ;;  %v6875_v50 = vcombine.high %v92_v45, %v96_v46  ;;  %v6872_v55 = vcombine.low %v91_v43, %v95_v44  ;;  %v6874_v56 = vcombine.low %v92_v45, %v96_v46  ;;  %v8675_v9 = vld [vmem:[%s11309_s3 + $0xc] ss:$16 sps:$4 sm:$0xff]   ;;  %v8686_v11 = vld [vmem:[%s11309_s3 + $0x8] ss:$16 sps:$4 sm:$0xff]   ;;  %2043 = vperm.xlu1 %7651, %v2041_v20   ;;  %v8773_v26 = vld [vmem:[%s11309_s3 + $0x60] ss:$16 sps:$4 sm:$0xff]  }
  0x19   :  { %v8738_v18 = vld [vmem:[%s11309_s3 + $0x4c] ss:$16 sps:$4 sm:$0xff]   ;;  %v8780_v27 = vld [vmem:[%s11309_s3 + $0x68] ss:$16 sps:$4 sm:$0xff]   ;;  %v8785_v28 = vld [vmem:[%s11309_s3 + $0x84] ss:$16 sps:$4 sm:$0xff]  }
  0x1a   :  { %468 = vmatpush1.bf16.msra.mxu0 %v6868_v51  ;;  %541 = vmatpush1.bf16.msra.mxu1 %v6870_v52  ;;  %v99_v51 = vld [vmem:[%s11307_s2 + $0x190] sm:$0xff]  ;;  %v8792_v29 = vld [vmem:[%s11309_s3 + $0x8c] ss:$16 sps:$4 sm:$0xff]   ;;  %v8842_v37 = vld [vmem:[%s11309_s3 + $0xa8] ss:$16 sps:$4 sm:$0xff]  }
  0x1b   :  { %469 = vmatprep.subr.bf16.mxu0 %v6877_v53  ;;  %542 = vmatprep.subr.bf16.mxu1 %v6879_v54  ;;  %v103_v52 = vld [vmem:[%s11307_s2 + $0x1b0] sm:$0xff]  ;;  %v100_v53 = vld [vmem:[%s11307_s2 + $0x198] sm:$0xff] }
  0x1c   :  { %v104_v54 = vld [vmem:[%s11307_s2 + $0x1b8] sm:$0xff]  ;;  %v6881_v58 = vcombine.high %v99_v51, %v103_v52  ;;  %v6880_v0 = vcombine.low %v99_v51, %v103_v52  ;;  %v8836_v36 = vld [vmem:[%s11309_s3 + $0xa0] ss:$16 sps:$4 sm:$0xff]   ;;  %v8899_v46 = vld [vmem:[%s11310_s4 + $0x4] ss:$16 sps:$4 sm:$0xff]  }
  0x1d   :  { %v6882_v1 = vcombine.low %v100_v53, %v104_v54  ;;  %v8825_v34 = vld [vmem:[%s11309_s3 + $0xac] ss:$16 sps:$4 sm:$0xff]   ;;  %v8888_v44 = vld [vmem:[%s11309_s3 + $0xe0] ss:$16 sps:$4 sm:$0xff]   ;;  %v8894_v45 = vld [vmem:[%s11309_s3 + $0xe8] ss:$16 sps:$4 sm:$0xff]  }
  0x1e   :  { %470 = vmatpush1.bf16.msra.mxu0 %v6876_v59  ;;  %543 = vmatpush1.bf16.msra.mxu1 %v6878_v60  ;;  %v6883_v59 = vcombine.high %v100_v53, %v104_v54  ;;  %v107_v60 = vld [vmem:[%s11307_s2 + $0x1d0] sm:$0xff]  ;;  %v8880_v43 = vld [vmem:[%s11309_s3 + $0xec] ss:$16 sps:$4 sm:$0xff]   ;;  %v7713_v53 = vld [vmem:[%s11310_s4 + $0x28] ss:$16 sps:$4 sm:$0xff]  }
  0x1f   :  { %471 = vmatprep.subr.bf16.mxu0 %v6885_v61  ;;  %544 = vmatprep.subr.bf16.mxu1 %v6887_v62  ;;  %v111_v61 = vld [vmem:[%s11307_s2 + $0x1f0] sm:$0xff]  ;;  %v108_v62 = vld [vmem:[%s11307_s2 + $0x1d8] sm:$0xff] }
  0x20   :  { %v6889_v2 = vcombine.high %v107_v60, %v111_v61  ;;  %v7715_v51 = vld [vmem:[%s11310_s4 + $0x2c] ss:$16 sps:$4 sm:$0xff]   ;;  %v7710_v52 = vld [vmem:[%s11310_s4 + $0x20] ss:$16 sps:$4 sm:$0xff]   ;;  %v7718_v54 = vld [vmem:[%s11310_s4 + $0x44] ss:$16 sps:$4 sm:$0xff]  }
  0x21   :  { %v9026_v19 = vld [vmem:[%s11310_s4 + $0xc4] ss:$16 sps:$4 sm:$0xff]   ;;  %v9032_v20 = vld [vmem:[%s11310_s4 + $0xcc] ss:$16 sps:$4 sm:$0xff]  }
  0x22   :  { %472 = vmatpush1.bf16.msra.mxu0 %v6884_v4  ;;  %545 = vmatpush1.bf16.msra.mxu1 %v6886_v5  ;;  %v6891_v4 = vcombine.high %v108_v62, %v112_v63  ;;  %v6888_v5 = vcombine.low %v107_v60, %v111_v61  ;;  %v8968_v60 = vld [vmem:[%s11310_s4 + $0x60] ss:$16 sps:$4 sm:$0xff]   ;;  %v8973_v61 = vld [vmem:[%s11310_s4 + $0x68] ss:$16 sps:$4 sm:$0xff]  }
  0x23   :  { %603 = vmatprep.subr.bf16.mxu0 %v6833_v7  ;;  %676 = vmatprep.subr.bf16.mxu1 %v6835_v8  ;;  %v6890_v7 = vcombine.low %v108_v62, %v112_v63  ;;  %v8669_v8 = vld [vmem:[%s11309_s3 + $0x4] ss:$16 sps:$4 sm:$0xff]   ;;  %v8984_v63 = vld [vmem:[%s11310_s4 + $0x8c] ss:$16 sps:$4 sm:$0xff]  }
  0x24   :  { %v8978_v62 = vld [vmem:[%s11310_s4 + $0x84] ss:$16 sps:$4 sm:$0xff]  }
  0x25   :  { %490 = vmatmul.mubr.bf16.vlgmr.msra.gmra.mrb[0].mxu0 %v8551_v6  ;;  %563 = vmatmul.mubr.bf16.vlgmr.msra.gmra.mrb[0].mxu1 %v8551_v6 }
  0x26   :  { %604 = vmatpush1.bf16.msra.mxu0 %v6832_v13  ;;  %677 = vmatpush1.bf16.msra.mxu1 %v6834_v14  ;;  %v8698_v13 = vld [vmem:[%s11309_s3 + $0x20] ss:$16 sps:$4 sm:$0xff]   ;;  %v8703_v14 = vld [vmem:[%s11309_s3 + $0x2c] ss:$16 sps:$4 sm:$0xff]  }
  0x27   :  { %605 = vmatprep.subr.bf16.mxu0 %v6841_v15  ;;  %678 = vmatprep.subr.bf16.mxu1 %v6843_v16  ;;  %v8709_v15 = vld [vmem:[%s11309_s3 + $0x28] ss:$16 sps:$4 sm:$0xff]   ;;  %v8714_v16 = vld [vmem:[%s11309_s3 + $0x44] ss:$16 sps:$4 sm:$0xff]  }
  0x28   :  { %499 = vmatprep.mubr.bf16.mxu0 %v11322_v3  ;;  %572 = vmatprep.mubr.bf16.mxu1 %v11322_v3 }
  0x2a   :  { %606 = vmatpush1.bf16.msra.mxu0 %v6840_v21  ;;  %679 = vmatpush1.bf16.msra.mxu1 %v6842_v22  ;;  %v8750_v21 = vld [vmem:[%s11309_s3 + $0x48] ss:$16 sps:$4 sm:$0xff]   ;;  %v8755_v22 = vld [vmem:[%s11309_s3 + $0x64] ss:$16 sps:$4 sm:$0xff]  }
  0x2b   :  { %607 = vmatprep.subr.bf16.mxu0 %v6849_v24  ;;  %680 = vmatprep.subr.bf16.mxu1 %v6851_v25  ;;  %v8761_v24 = vld [vmem:[%s11309_s3 + $0x6c] ss:$16 sps:$4 sm:$0xff]   ;;  %v1717_v25 = vsel %vm11403_vm1, 1, %v11322_v3 }
  0x2c   :  { %1719 = vperm.xlu0 %7650, %v1717_v25   ;;  %v9040_v25 = vld [vmem:[%s11310_s4 + $0xc0] ss:$16 sps:$4 sm:$0xff]  }
  0x2d   :  { %500 = vmatmul.mubr.bf16.gmra.mrb[4].mxu0 %v8582_v23  ;;  %573 = vmatmul.mubr.bf16.gmra.mrb[4].mxu1 %v8582_v23 }
  0x2e   :  { %608 = vmatpush1.bf16.msra.mxu0 %v6848_v30  ;;  %681 = vmatpush1.bf16.msra.mxu1 %v6850_v31  ;;  %v2691_v30 = vsel %vm2387_vm3, 1, %v11322_v3  ;;  %v2366_v31 = vsel %vm11404_vm4, 1, %v11322_v3 }
  0x2f   :  { %609 = vmatprep.subr.bf16.mxu0 %v6857_v32  ;;  %682 = vmatprep.subr.bf16.mxu1 %v6859_v33  ;;  %v8814_v32 = vld [vmem:[%s11309_s3 + $0x88] ss:$16 sps:$4 sm:$0xff]   ;;  %v8819_v33 = vld [vmem:[%s11309_s3 + $0xa4] ss:$16 sps:$4 sm:$0xff]  }
  0x30   :  { %509 = vmatprep.mubr.bf16.mxu0 %v11322_v3  ;;  %582 = vmatprep.mubr.bf16.mxu1 %v11322_v3 }
  0x31   :  { %2693 = vperm.xlu0 %7650, %v2691_v30   ;;  %2368 = vperm.xlu1 %7651, %v2366_v31   ;;  %v9045_v30 = vld [vmem:[%s11310_s4 + $0xc8] ss:$16 sps:$4 sm:$0xff]   ;;  %v9050_v31 = vld [vmem:[%s11310_s4 + $0xe4] ss:$16 sps:$4 sm:$0xff]  }
  0x32   :  { %610 = vmatpush1.bf16.msra.mxu0 %v6856_v38  ;;  %683 = vmatpush1.bf16.msra.mxu1 %v6858_v39  ;;  %v8847_v38 = vld [vmem:[%s11309_s3 + $0xc4] ss:$16 sps:$4 sm:$0xff]   ;;  %v8854_v39 = vld [vmem:[%s11309_s3 + $0xcc] ss:$16 sps:$4 sm:$0xff]  }
  0x33   :  { %611 = vmatprep.subr.bf16.mxu0 %v6865_v41  ;;  %684 = vmatprep.subr.bf16.mxu1 %v6867_v42  ;;  %v8863_v41 = vld [vmem:[%s11309_s3 + $0xc0] ss:$16 sps:$4 sm:$0xff]   ;;  %v8874_v42 = vld [vmem:[%s11309_s3 + $0xe4] ss:$16 sps:$4 sm:$0xff]  }
  0x35   :  { %510 = vmatmul.mubr.bf16.gmra.mrb[8].mxu0 %v8615_v40  ;;  %583 = vmatmul.mubr.bf16.gmra.mrb[8].mxu1 %v8615_v40 }
  0x36   :  { %612 = vmatpush1.bf16.msra.mxu0 %v6864_v47  ;;  %685 = vmatpush1.bf16.msra.mxu1 %v6866_v48  ;;  %v8906_v47 = vld [vmem:[%s11310_s4 + $0xc] ss:$16 sps:$4 sm:$0xff]   ;;  %v7704_v48 = vld [vmem:[%s11310_s4] ss:$16 sps:$4 sm:$0xff]  }
  0x37   :  { %613 = vmatprep.subr.bf16.mxu0 %v6873_v49  ;;  %686 = vmatprep.subr.bf16.mxu1 %v6875_v50  ;;  %v7707_v49 = vld [vmem:[%s11310_s4 + $0x8] ss:$16 sps:$4 sm:$0xff]   ;;  %v7712_v50 = vld [vmem:[%s11310_s4 + $0x24] ss:$16 sps:$4 sm:$0xff]  }
  0x38   :  { %519 = vmatprep.mubr.bf16.mxu0 %v11322_v3  ;;  %592 = vmatprep.mubr.bf16.mxu1 %v11322_v3 }
  0x39   :  { %3343 = vperm.xlu0 %7650, %v3341_v35   ;;  %v9059_v35 = vld [vmem:[%s11310_s4 + $0xe0] ss:$16 sps:$4 sm:$0xff]  }
  0x3a   :  { %614 = vmatpush1.bf16.msra.mxu0 %v6872_v55  ;;  %687 = vmatpush1.bf16.msra.mxu1 %v6874_v56  ;;  %v7721_v55 = vld [vmem:[%s11310_s4 + $0x4c] ss:$16 sps:$4 sm:$0xff]   ;;  %v8946_v56 = vld [vmem:[%s11310_s4 + $0x40] ss:$16 sps:$4 sm:$0xff]  }
  0x3b   :  { %615 = vmatprep.subr.bf16.mxu0 %v6881_v58  ;;  %688 = vmatprep.subr.bf16.mxu1 %v6883_v59  ;;  %v8957_v58 = vld [vmem:[%s11310_s4 + $0x64] ss:$16 sps:$4 sm:$0xff]   ;;  %v8963_v59 = vld [vmem:[%s11310_s4 + $0x6c] ss:$16 sps:$4 sm:$0xff]  }
  0x3d   :  { %520 = vmatmul.mubr.bf16.gmra.mrb[12].mxu0 %v8648_v57  ;;  %593 = vmatmul.mubr.bf16.gmra.mrb[12].mxu1 %v8648_v57 }
  0x3e   :  { %616 = vmatpush1.bf16.msra.mxu0 %v6880_v0  ;;  %689 = vmatpush1.bf16.msra.mxu1 %v6882_v1  ;;  %v8992_v0 = vld [vmem:[%s11310_s4 + $0x80] ss:$16 sps:$4 sm:$0xff]   ;;  %v8997_v1 = vld [vmem:[%s11310_s4 + $0x88] ss:$16 sps:$4 sm:$0xff]  }
  0x3f   :  { %617 = vmatprep.subr.bf16.mxu0 %v6889_v2  ;;  %690 = vmatprep.subr.bf16.mxu1 %v6891_v4  ;;  %v9002_v2 = vld [vmem:[%s11310_s4 + $0xa4] ss:$16 sps:$4 sm:$0xff]   ;;  %v9008_v4 = vld [vmem:[%s11310_s4 + $0xac] ss:$16 sps:$4 sm:$0xff]  }
  0x40   :  { %635 = vmatprep.mubr.bf16.mxu0 %v11322_v3  ;;  %708 = vmatprep.mubr.bf16.mxu1 %v11322_v3 }
  0x42   :  { %618 = vmatpush1.bf16.msra.mxu0 %v6888_v5  ;;  %691 = vmatpush1.bf16.msra.mxu1 %v6890_v7  ;;  %v9016_v5 = vld [vmem:[%s11310_s4 + $0xa0] ss:$16 sps:$4 sm:$0xff]   ;;  %v9021_v7 = vld [vmem:[%s11310_s4 + $0xa8] ss:$16 sps:$4 sm:$0xff]  }
  0x43   :  { %1264 = vmatprep.subr.bf16.mxu0 %v8669_v8  ;;  %1305 = vmatprep.subr.bf16.mxu1 %v8675_v9 }
  0x45   :  { %636 = vmatmul.mubr.bf16.vlgmr.msra.gmra.mrb[16].mxu0 %v8551_v6  ;;  %709 = vmatmul.mubr.bf16.vlgmr.msra.gmra.mrb[16].mxu1 %v8551_v6  ;;  %v8733_v6 = vld [vmem:[%s11309_s3 + $0x40] ss:$16 sps:$4 sm:$0xff]  }
  0x46   :  { %1265 = vmatpush1.bf16.msra.mxu0 %v8681_v10  ;;  %1306 = vmatpush1.bf16.msra.mxu1 %v8686_v11 }
  0x47   :  { %1266 = vmatprep.subr.bf16.mxu0 %v8692_v12  ;;  %1307 = vmatprep.subr.bf16.mxu1 %v8703_v14 }
  0x48   :  { %645 = vmatprep.mubr.bf16.mxu0 %v11322_v3  ;;  %718 = vmatprep.mubr.bf16.mxu1 %v11322_v3 }
  0x4a   :  { %1267 = vmatpush1.bf16.msra.mxu0 %v8698_v13  ;;  %1308 = vmatpush1.bf16.msra.mxu1 %v8709_v15 }
  0x4b   :  { %1268 = vmatprep.subr.bf16.mxu0 %v8714_v16  ;;  %1309 = vmatprep.subr.bf16.mxu1 %v8738_v18 }
  0x4d   :  { %646 = vmatmul.mubr.bf16.gmra.mrb[20].mxu0 %v8582_v23  ;;  %719 = vmatmul.mubr.bf16.gmra.mrb[20].mxu1 %v8582_v23  ;;  %v8808_v23 = vld [vmem:[%s11309_s3 + $0x80] ss:$16 sps:$4 sm:$0xff]  }
  0x4e   :  { %1269 = vmatpush1.bf16.msra.mxu0 %v8733_v6  ;;  %1310 = vmatpush1.bf16.msra.mxu1 %v8750_v21 }
  0x4f   :  { %1270 = vmatprep.subr.bf16.mxu0 %v8755_v22  ;;  %1311 = vmatprep.subr.bf16.mxu1 %v8761_v24 }
  0x50   :  { %655 = vmatprep.mubr.bf16.mxu0 %v11322_v3  ;;  %728 = vmatprep.mubr.bf16.mxu1 %v11322_v3 }
  0x52   :  { %1271 = vmatpush1.bf16.msra.mxu0 %v8773_v26  ;;  %1312 = vmatpush1.bf16.msra.mxu1 %v8780_v27 }
  0x53   :  { %1272 = vmatprep.subr.bf16.mxu0 %v8785_v28  ;;  %1313 = vmatprep.subr.bf16.mxu1 %v8792_v29 }
  0x55   :  { %656 = vmatmul.mubr.bf16.gmra.mrb[24].mxu0 %v8615_v40  ;;  %729 = vmatmul.mubr.bf16.gmra.mrb[24].mxu1 %v8615_v40  ;;  %v8869_v40 = vld [vmem:[%s11309_s3 + $0xc8] ss:$16 sps:$4 sm:$0xff]  }
  0x56   :  { %1273 = vmatpush1.bf16.msra.mxu0 %v8808_v23  ;;  %1314 = vmatpush1.bf16.msra.mxu1 %v8814_v32 }
  0x57   :  { %1274 = vmatprep.subr.bf16.mxu0 %v8819_v33  ;;  %1315 = vmatprep.subr.bf16.mxu1 %v8825_v34 }
  0x58   :  { %665 = vmatprep.mubr.bf16.mxu0 %v11322_v3  ;;  %738 = vmatprep.mubr.bf16.mxu1 %v11322_v3 }
  0x5a   :  { %1275 = vmatpush1.bf16.msra.mxu0 %v8836_v36  ;;  %1316 = vmatpush1.bf16.msra.mxu1 %v8842_v37 }
  0x5b   :  { %1276 = vmatprep.subr.bf16.mxu0 %v8847_v38  ;;  %1317 = vmatprep.subr.bf16.mxu1 %v8854_v39 }
  0x5d   :  { %666 = vmatmul.mubr.bf16.gmra.mrb[28].mxu0 %v8648_v57  ;;  %739 = vmatmul.mubr.bf16.gmra.mrb[28].mxu1 %v8648_v57  ;;  %v8952_v57 = vld [vmem:[%s11310_s4 + $0x48] ss:$16 sps:$4 sm:$0xff]  }
  0x5e   :  { %1277 = vmatpush1.bf16.msra.mxu0 %v8863_v41  ;;  %1318 = vmatpush1.bf16.msra.mxu1 %v8869_v40 }
  0x5f   :  { %1278 = vmatprep.subr.bf16.mxu0 %v8874_v42  ;;  %1319 = vmatprep.subr.bf16.mxu1 %v8880_v43 }
  0x60   :  { %1296 = vmatprep.mubr.bf16.mxu0 %v11322_v3  ;;  %1337 = vmatprep.mubr.bf16.mxu1 %v11322_v3 }
  0x62   :  { %1279 = vmatpush1.bf16.msra.mxu0 %v8888_v44  ;;  %1320 = vmatpush1.bf16.msra.mxu1 %v8894_v45 }
  0x63   :  { %1607 = vmatprep.subr.bf16.mxu0 %v8899_v46  ;;  %1648 = vmatprep.subr.bf16.mxu1 %v8906_v47 }
  0x65   :  { %1297 = vmatmul.mubr.bf16.vlgmr.msra.gmra.mrb[32].mxu0 %v11322_v3  ;;  %1338 = vmatmul.mubr.bf16.vlgmr.msra.gmra.mrb[32].mxu1 %v11322_v3 }
  0x66   :  { %1608 = vmatpush1.bf16.msra.mxu0 %v7704_v48  ;;  %1649 = vmatpush1.bf16.msra.mxu1 %v7707_v49  ;;  %v9064_v48 = vld [vmem:[%s11310_s4 + $0xec] ss:$16 sps:$4 sm:$0xff]   ;;  %v9069_v49 = vld [vmem:[%s11310_s4 + $0xe8] ss:$16 sps:$4 sm:$0xff]  }
  0x67   :  { %1609 = vmatprep.subr.bf16.mxu0 %v7712_v50  ;;  %1650 = vmatprep.subr.bf16.mxu1 %v7715_v51 }
  0x68   :  { %1639 = vmatprep.mubr.bf16.mxu0 %v11322_v3  ;;  %1680 = vmatprep.mubr.bf16.mxu1 %v11322_v3 }
  0x6a   :  { %1610 = vmatpush1.bf16.msra.mxu0 %v7710_v52  ;;  %1651 = vmatpush1.bf16.msra.mxu1 %v7713_v53 }
  0x6b   :  { %1611 = vmatprep.subr.bf16.mxu0 %v7718_v54  ;;  %1652 = vmatprep.subr.bf16.mxu1 %v7721_v55 }
  0x6e   :  { %1612 = vmatpush1.bf16.msra.mxu0 %v8946_v56  ;;  %1653 = vmatpush1.bf16.msra.mxu1 %v8952_v57 }
  0x6f   :  { %1613 = vmatprep.subr.bf16.mxu0 %v8957_v58  ;;  %1654 = vmatprep.subr.bf16.mxu1 %v8963_v59 }
  0x72   :  { %1614 = vmatpush1.bf16.msra.mxu0 %v8968_v60  ;;  %1655 = vmatpush1.bf16.msra.mxu1 %v8973_v61 }
  0x73   :  { %1615 = vmatprep.subr.bf16.mxu0 %v8978_v62  ;;  %1656 = vmatprep.subr.bf16.mxu1 %v8984_v63 }
  0x76   :  { %1616 = vmatpush1.bf16.msra.mxu0 %v8992_v0  ;;  %1657 = vmatpush1.bf16.msra.mxu1 %v8997_v1 }
  0x77   :  { %1617 = vmatprep.subr.bf16.mxu0 %v9002_v2  ;;  %1658 = vmatprep.subr.bf16.mxu1 %v9008_v4 }
  0x7a   :  { %1618 = vmatpush1.bf16.msra.mxu0 %v9016_v5  ;;  %1659 = vmatpush1.bf16.msra.mxu1 %v9021_v7 }
  0x7b   :  { %1619 = vmatprep.subr.bf16.mxu0 %v9026_v19  ;;  %1660 = vmatprep.subr.bf16.mxu1 %v9032_v20 }
  0x7e   :  { %1620 = vmatpush1.bf16.msra.mxu0 %v9040_v25  ;;  %1661 = vmatpush1.bf16.msra.mxu1 %v9045_v30 }
  0x7f   :  { %1621 = vmatprep.subr.bf16.mxu0 %v9050_v31  ;;  %1662 = vmatprep.subr.bf16.mxu1 %v9064_v48 }
  0x82   :  { %1622 = vmatpush1.bf16.msra.mxu0 %v9059_v35  ;;  %1663 = vmatpush1.bf16.msra.mxu1 %v9069_v49 }
  0x83   :  { %1931 = vmatprep.subr.bf16.mxu0 %v8669_v8  ;;  %1972 = vmatprep.subr.bf16.mxu1 %v8675_v9  ;;  %v1047_v8 = vlaneseq }
  0x85   :  { %1640 = vmatmul.mubr.bf16.vlgmr.msra.gmra.mrb[36].mxu0 %v11322_v3  ;;  %1681 = vmatmul.mubr.bf16.vlgmr.msra.gmra.mrb[36].mxu1 %v11322_v3  ;;  %v9115_v9 = vshrl.u32 %v1047_v8, 7 }
  0x86   :  { %1932 = vmatpush1.bf16.msra.mxu0 %v8681_v10  ;;  %1973 = vmatpush1.bf16.msra.mxu1 %v8686_v11 }
  0x87   :  { %1933 = vmatprep.subr.bf16.mxu0 %v8692_v12  ;;  %1974 = vmatprep.subr.bf16.mxu1 %v8703_v14  ;;  %v11320_v14 = vsub.s32 3, %v9115_v9 }
  0x88   :  { %1963 = vmatprep.mubr.bf16.mxu0 %v11322_v3  ;;  %2004 = vmatprep.mubr.bf16.mxu1 %v11322_v3 }
  0x8a   :  { %1934 = vmatpush1.bf16.msra.mxu0 %v8698_v13  ;;  %1975 = vmatpush1.bf16.msra.mxu1 %v8709_v15  ;;  %v11321_v13 = vsub.s32 2, %v9115_v9 }
  0x8b   :  { %1935 = vmatprep.subr.bf16.mxu0 %v8714_v16  ;;  %1976 = vmatprep.subr.bf16.mxu1 %v8738_v18  ;;  %v11325_v18 = vsub.s32 0, %v9115_v9 }
  0x8e   :  { %1936 = vmatpush1.bf16.msra.mxu0 %v8733_v6  ;;  %1977 = vmatpush1.bf16.msra.mxu1 %v8750_v21  ;;  %v11324_v21 = vsub.s32 1, %v9115_v9 }
  0x8f   :  { %1937 = vmatprep.subr.bf16.mxu0 %v8755_v22  ;;  %1978 = vmatprep.subr.bf16.mxu1 %v8761_v24 }
  0x92   :  { %1938 = vmatpush1.bf16.msra.mxu0 %v8773_v26  ;;  %1979 = vmatpush1.bf16.msra.mxu1 %v8780_v27  ;;  %v1038_v27 = vld [vmem:[%s11312_s5] sm:$0xf] }
  0x93   :  { %1939 = vmatprep.subr.bf16.mxu0 %v8785_v28  ;;  %1980 = vmatprep.subr.bf16.mxu1 %v8792_v29 }
  0x96   :  { %1940 = vmatpush1.bf16.msra.mxu0 %v8808_v23  ;;  %1981 = vmatpush1.bf16.msra.mxu1 %v8814_v32  ;;  %v9130_v32 = vrot.slane %v1038_v27, %v11321_v13 }
  0x97   :  { %1941 = vmatprep.subr.bf16.mxu0 %v8819_v33  ;;  %1982 = vmatprep.subr.bf16.mxu1 %v8825_v34  ;;  %v9134_v33 = vrot.slane %v1038_v27, %v11320_v14 }
  0x9a   :  { %1942 = vmatpush1.bf16.msra.mxu0 %v8836_v36  ;;  %1983 = vmatpush1.bf16.msra.mxu1 %v8842_v37  ;;  %v9138_v37 = vrot.slane %v1038_v27, %v11325_v18 }
  0x9b   :  { %1943 = vmatprep.subr.bf16.mxu0 %v8847_v38  ;;  %1984 = vmatprep.subr.bf16.mxu1 %v8854_v39  ;;  %v9142_v38 = vrot.slane %v1038_v27, %v11324_v21 }
  0x9e   :  { %1944 = vmatpush1.bf16.msra.mxu0 %v8863_v41  ;;  %1985 = vmatpush1.bf16.msra.mxu1 %v8869_v40 }
  0x9f   :  { %1945 = vmatprep.subr.bf16.mxu0 %v8874_v42  ;;  %1986 = vmatprep.subr.bf16.mxu1 %v8880_v43 }
  0xa2   :  { %1946 = vmatpush1.bf16.msra.mxu0 %v8888_v44  ;;  %1987 = vmatpush1.bf16.msra.mxu1 %v8894_v45 }
  0xa3   :  { %2256 = vmatprep.subr.bf16.mxu0 %v8899_v46  ;;  %2297 = vmatprep.subr.bf16.mxu1 %v8906_v47 }
  0xf8   :  { %v491_v10 = vpop.f32.mrb[0].mxu0  ;;  %v564_v12 = vpop.f32.mrb[0].mxu1 }
  0xf9   :  { %v493_v11 = vpop.f32.mrb[1].mxu0  ;;  %v566_v6 = vpop.f32.mrb[1].mxu1 }
  0xfa   :  { %v9119_v15 = vpack.c.bf16 %v493_v11, %v491_v10  ;;  %v495_v16 = vpop.f32.mrb[2].mxu0  ;;  %v9123_v24 = vpack.c.bf16 %v566_v6, %v564_v12  ;;  %v568_v26 = vpop.f32.mrb[2].mxu1 }
  0xfb   :  { %v497_v22 = vpop.f32.mrb[3].mxu0  ;;  %v570_v29 = vpop.f32.mrb[3].mxu1 }
  0xfc   :  { %v7533_v28 = vpack.c.bf16 %v497_v22, %v495_v16  ;;  %v7534_v23 = vpack.c.bf16 %v570_v29, %v568_v26 }
  0xfe   :  { %v1729_v34 = vunpack.c.l.bf16 %v7533_v28  ;;  %v1730_v36 = vunpack.c.h.bf16 %v7533_v28  ;;  %v1731_v39 = vunpack.c.l.bf16 %v7534_v23  ;;  %v1732_v41 = vunpack.c.h.bf16 %v7534_v23 }
 0x100   :  { %v501_v40 = vpop.f32.mrb[4].mxu0  ;;  %v9145_v42 = vadd.f32 %v1729_v34, %v9138_v37  ;;  %v9148_v43 = vadd.f32 %v1730_v36, %v9142_v38  ;;  %v574_v45 = vpop.f32.mrb[4].mxu1  ;;  %v9151_v46 = vadd.f32 %v1731_v39, %v9130_v32  ;;  %v9154_v47 = vadd.f32 %v1732_v41, %v9134_v33 }
 0x101   :  { %v503_v44 = vpop.f32.mrb[5].mxu0  ;;  %v576_v52 = vpop.f32.mrb[5].mxu1 }
 0x102   :  { %v7535_v50 = vpack.c.bf16 %v503_v44, %v501_v40  ;;  %v505_v51 = vpop.f32.mrb[6].mxu0  ;;  %v7536_v54 = vpack.c.bf16 %v576_v52, %v574_v45  ;;  %v578_v55 = vpop.f32.mrb[6].mxu1 }
 0x103   :  { %v507_v53 = vpop.f32.mrb[7].mxu0  ;;  %v580_v12 = vpop.f32.mrb[7].mxu1 }
 0x104   :  { %v2379_v8 = vunpack.c.l.bf16 %v7535_v50  ;;  %v2380_v10 = vunpack.c.h.bf16 %v7535_v50  ;;  %v7537_v11 = vpack.c.bf16 %v507_v53, %v505_v51  ;;  %v2381_v16 = vunpack.c.l.bf16 %v7536_v54 }
 0x105   :  { %v2382_v6 = vunpack.c.h.bf16 %v7536_v54  ;;  %v7538_v22 = vpack.c.bf16 %v580_v12, %v578_v55 }
 0x106   :  { %v3029_v26 = vunpack.c.l.bf16 %v7537_v11  ;;  %v3030_v27 = vunpack.c.h.bf16 %v7537_v11  ;;  %v9157_v28 = vadd.f32 %v2379_v8, %v9138_v37  ;;  %v9160_v29 = vadd.f32 %v2380_v10, %v9142_v38 }
 0x107   :  { %v3031_v23 = vunpack.c.l.bf16 %v7538_v22  ;;  %v3032_v34 = vunpack.c.h.bf16 %v7538_v22  ;;  %v9163_v36 = vadd.f32 %v2381_v16, %v9130_v32  ;;  %v9166_v39 = vadd.f32 %v2382_v6, %v9134_v33 }
 0x108   :  { %11407 = vst [vmem:[#allocation7_spill] sm:$0xff] %v9157_v28  ;;  %11408 = vst [vmem:[#allocation8_spill] sm:$0xff] %v9160_v29  ;;  %v511_v41 = vpop.f32.mrb[8].mxu0  ;;  %v9169_v40 = vadd.f32 %v3029_v26, %v9138_v37  ;;  %v9172_v44 = vadd.f32 %v3030_v27, %v9142_v38  ;;  %v584_v50 = vpop.f32.mrb[8].mxu1  ;;  %v3016_v8 = vsel %vm2712_vm6, 1, %v11322_v3  ;;  %v3666_v27 = vsel %vm3362_vm7, 1, %v11322_v3 }
 0x109   :  { %11409 = vst [vmem:[#allocation9_spill] sm:$0xff] %v9163_v36  ;;  %11410 = vst [vmem:[#allocation10_spill] sm:$0xff] %v9166_v39  ;;  %v513_v45 = vpop.f32.mrb[9].mxu0  ;;  %v9177_v51 = vadd.f32 %v3031_v23, %v9130_v32  ;;  %v9180_v52 = vadd.f32 %v3032_v34, %v9134_v33  ;;  %v586_v55 = vpop.f32.mrb[9].mxu1  ;;  %3018 = vperm.xlu1 %7651, %v3016_v8  }
 0x10a   :  { %11411 = vst [vmem:[#allocation11_spill] sm:$0xff] %v9169_v40  ;;  %11412 = vst [vmem:[#allocation12_spill] sm:$0xff] %v9172_v44  ;;  %v7539_v53 = vpack.c.bf16 %v513_v45, %v511_v41  ;;  %v515_v54 = vpop.f32.mrb[10].mxu0  ;;  %v7540_v11 = vpack.c.bf16 %v586_v55, %v584_v50  ;;  %v588_v12 = vpop.f32.mrb[10].mxu1 }
 0x10b   :  { %11413 = vst [vmem:[#allocation13_spill] sm:$0xff] %v9177_v51  ;;  %11414 = vst [vmem:[#allocation14_spill] sm:$0xff] %v9180_v52  ;;  %v517_v10 = vpop.f32.mrb[11].mxu0  ;;  %v590_v26 = vpop.f32.mrb[11].mxu1 }
 0x10c   :  { %v3679_v16 = vunpack.c.l.bf16 %v7539_v53  ;;  %v3680_v6 = vunpack.c.h.bf16 %v7539_v53  ;;  %v7541_v22 = vpack.c.bf16 %v517_v10, %v515_v54  ;;  %v3681_v23 = vunpack.c.l.bf16 %v7540_v11 }
 0x10d   :  { %v3682_v34 = vunpack.c.h.bf16 %v7540_v11  ;;  %v7542_v41 = vpack.c.bf16 %v590_v26, %v588_v12  ;;  %3668 = vperm.xlu1 %7651, %v3666_v27  }
 0x10e   :  { %v4317_v45 = vunpack.c.l.bf16 %v7541_v22  ;;  %v4318_v14 = vunpack.c.h.bf16 %v7541_v22  ;;  %v9189_v13 = vadd.f32 %v3679_v16, %v9138_v37  ;;  %v9192_v50 = vadd.f32 %v3680_v6, %v9142_v38 }
 0x10f   :  { %v4319_v55 = vunpack.c.l.bf16 %v7542_v41  ;;  %v4320_v8 = vunpack.c.h.bf16 %v7542_v41  ;;  %v9195_v53 = vadd.f32 %v3681_v23, %v9130_v32  ;;  %v9198_v54 = vadd.f32 %v3682_v34, %v9134_v33 }
 0x110   :  { %11415 = vst [vmem:[#allocation15_spill] sm:$0xff] %v9189_v13  ;;  %11416 = vst [vmem:[#allocation16_spill] sm:$0xff] %v9192_v50  ;;  %v521_v10 = vpop.f32.mrb[12].mxu0  ;;  %v9201_v11 = vadd.f32 %v4317_v45, %v9138_v37  ;;  %v9204_v12 = vadd.f32 %v4318_v14, %v9142_v38  ;;  %v594_v22 = vpop.f32.mrb[12].mxu1 }
 0x111   :  { %11417 = vst [vmem:[#allocation17_spill] sm:$0xff] %v9195_v53  ;;  %11418 = vst [vmem:[#allocation18_spill] sm:$0xff] %v9198_v54  ;;  %v523_v16 = vpop.f32.mrb[13].mxu0  ;;  %v9207_v6 = vadd.f32 %v4319_v55, %v9130_v32  ;;  %v9210_v26 = vadd.f32 %v4320_v8, %v9134_v33  ;;  %v596_v41 = vpop.f32.mrb[13].mxu1 }
 0x112   :  { %11419 = vst [vmem:[#allocation19_spill] sm:$0xff] %v9201_v11  ;;  %11420 = vst [vmem:[#allocation20_spill] sm:$0xff] %v9204_v12  ;;  %v7543_v27 = vpack.c.bf16 %v523_v16, %v521_v10  ;;  %v525_v23 = vpop.f32.mrb[14].mxu0  ;;  %v7544_v3 = vpack.c.bf16 %v596_v41, %v594_v22  ;;  %v598_v21 = vpop.f32.mrb[14].mxu1  ;;  %v1039_v22 = vld [vmem:[%s11312_s5 + $0x4] sm:$0xf] }
 0x113   :  { %11421 = vst [vmem:[#allocation21_spill] sm:$0xff] %v9207_v6  ;;  %11422 = vst [vmem:[#allocation22_spill] sm:$0xff] %v9210_v26  ;;  %v527_v34 = vpop.f32.mrb[15].mxu0  ;;  %v600_v11 = vpop.f32.mrb[15].mxu1 }
 0x114   :  { %v4955_v18 = vunpack.c.l.bf16 %v7543_v27  ;;  %v4956_v45 = vunpack.c.h.bf16 %v7543_v27  ;;  %v7545_v17 = vpack.c.bf16 %v527_v34, %v525_v23  ;;  %v4957_v14 = vunpack.c.l.bf16 %v7544_v3 }
 0x115   :  { %v4958_v12 = vunpack.c.h.bf16 %v7544_v3  ;;  %v7546_v54 = vpack.c.bf16 %v600_v11, %v598_v21 }
 0x116   :  { %v5593_v50 = vunpack.c.l.bf16 %v7545_v17  ;;  %v5594_v53 = vunpack.c.h.bf16 %v7545_v17  ;;  %v9213_v55 = vadd.f32 %v4955_v18, %v9138_v37  ;;  %v9216_v8 = vadd.f32 %v4956_v45, %v9142_v38 }
 0x117   :  { %v5595_v10 = vunpack.c.l.bf16 %v7546_v54  ;;  %v5596_v16 = vunpack.c.h.bf16 %v7546_v54  ;;  %v9222_v27 = vadd.f32 %v4957_v14, %v9130_v32  ;;  %v9225_v3 = vadd.f32 %v4958_v12, %v9134_v33 }
 0x118   :  { %11423 = vst [vmem:[#allocation23_spill] sm:$0xff] %v9213_v55  ;;  %11424 = vst [vmem:[#allocation24_spill] sm:$0xff] %v9216_v8  ;;  %v637_v21 = vpop.f32.mrb[16].mxu0  ;;  %v9228_v17 = vadd.f32 %v5593_v50, %v9138_v37  ;;  %v9231_v18 = vadd.f32 %v5594_v53, %v9142_v38  ;;  %v710_v23 = vpop.f32.mrb[16].mxu1  ;;  %v11431_v12 = vsub.s32 0, %v9115_v9  ;;  %v11432_v50 = vsub.s32 1, %v9115_v9 }
 0x119   :  { %11425 = vst [vmem:[#allocation25_spill] sm:$0xff] %v9222_v27  ;;  %11426 = vst [vmem:[#allocation26_spill] sm:$0xff] %v9225_v3  ;;  %v639_v11 = vpop.f32.mrb[17].mxu0  ;;  %v9234_v54 = vadd.f32 %v5595_v10, %v9130_v32  ;;  %v9237_v41 = vadd.f32 %v5596_v16, %v9134_v33  ;;  %v712_v14 = vpop.f32.mrb[17].mxu1  ;;  %v11433_v10 = vsub.s32 2, %v9115_v9  ;;  %v11434_v16 = vsub.s32 3, %v9115_v9 }
 0x11a   :  { %11427 = vst [vmem:[#allocation27_spill] sm:$0xff] %v9228_v17  ;;  %11428 = vst [vmem:[#allocation28_spill] sm:$0xff] %v9231_v18  ;;  %v7547_v34 = vpack.c.bf16 %v639_v11, %v637_v21  ;;  %v641_v45 = vpop.f32.mrb[18].mxu0  ;;  %v9241_v3 = vrot.slane %v1039_v22, %v11431_v12  ;;  %v9245_v17 = vrot.slane %v1039_v22, %v11432_v50  ;;  %v714_v8 = vpop.f32.mrb[18].mxu1 }
 0x11b   :  { %11429 = vst [vmem:[#allocation29_spill] sm:$0xff] %v9234_v54  ;;  %11430 = vst [vmem:[#allocation30_spill] sm:$0xff] %v9237_v41  ;;  %v643_v53 = vpop.f32.mrb[19].mxu0  ;;  %v7548_v18 = vpack.c.bf16 %v712_v14, %v710_v23  ;;  %v9249_v54 = vrot.slane %v1039_v22, %v11433_v10  ;;  %v9253_v21 = vrot.slane %v1039_v22, %v11434_v16  ;;  %v716_v12 = vpop.f32.mrb[19].mxu1 }
 0x11c   :  { %v5909_v11 = vunpack.c.l.bf16 %v7547_v34  ;;  %v5910_v41 = vunpack.c.h.bf16 %v7547_v34  ;;  %v7549_v27 = vpack.c.bf16 %v643_v53, %v641_v45  ;;  %v7550_v6 = vpack.c.bf16 %v716_v12, %v714_v8 }
 0x11d   :  { %v5911_v55 = vunpack.c.l.bf16 %v7548_v18  ;;  %v5912_v26 = vunpack.c.h.bf16 %v7548_v18 }
 0x11e   :  { %v5274_v50 = vunpack.c.l.bf16 %v7549_v27  ;;  %v5275_v13 = vunpack.c.h.bf16 %v7549_v27  ;;  %v9256_v23 = vadd.f32 %v5909_v11, %v9241_v3  ;;  %v9259_v14 = vadd.f32 %v5910_v41, %v9245_v17 }
 0x11f   :  { %v5276_v10 = vunpack.c.l.bf16 %v7550_v6  ;;  %v5277_v52 = vunpack.c.h.bf16 %v7550_v6  ;;  %v9262_v9 = vadd.f32 %v5911_v55, %v9249_v54  ;;  %v9265_v22 = vadd.f32 %v5912_v26, %v9253_v21 }
 0x120   :  { %11435 = vst [vmem:[#allocation31_spill] sm:$0xff] %v9256_v23  ;;  %11436 = vst [vmem:[#allocation32_spill] sm:$0xff] %v9259_v14  ;;  %v647_v34 = vpop.f32.mrb[20].mxu0  ;;  %v9268_v18 = vadd.f32 %v5274_v50, %v9241_v3  ;;  %v9271_v8 = vadd.f32 %v5275_v13, %v9245_v17  ;;  %v720_v45 = vpop.f32.mrb[20].mxu1 }
 0x121   :  { %11437 = vst [vmem:[#allocation33_spill] sm:$0xff] %v9262_v9  ;;  %11438 = vst [vmem:[#allocation34_spill] sm:$0xff] %v9265_v22  ;;  %v649_v27 = vpop.f32.mrb[21].mxu0  ;;  %v9274_v41 = vadd.f32 %v5276_v10, %v9249_v54  ;;  %v9277_v6 = vadd.f32 %v5277_v52, %v9253_v21  ;;  %v722_v16 = vpop.f32.mrb[21].mxu1 }
 0x122   :  { %11439 = vst [vmem:[#allocation35_spill] sm:$0xff] %v9268_v18  ;;  %11440 = vst [vmem:[#allocation36_spill] sm:$0xff] %v9271_v8  ;;  %v7551_v55 = vpack.c.bf16 %v649_v27, %v647_v34  ;;  %v651_v53 = vpop.f32.mrb[22].mxu0  ;;  %v7552_v11 = vpack.c.bf16 %v722_v16, %v720_v45  ;;  %v724_v12 = vpop.f32.mrb[22].mxu1 }
 0x123   :  { %11441 = vst [vmem:[#allocation37_spill] sm:$0xff] %v9274_v41  ;;  %11442 = vst [vmem:[#allocation38_spill] sm:$0xff] %v9277_v6  ;;  %v653_v26 = vpop.f32.mrb[23].mxu0  ;;  %v726_v9 = vpop.f32.mrb[23].mxu1 }
 0x124   :  { %v4636_v22 = vunpack.c.l.bf16 %v7551_v55  ;;  %v4637_v50 = vunpack.c.h.bf16 %v7551_v55  ;;  %v7553_v14 = vpack.c.bf16 %v653_v26, %v651_v53  ;;  %v4638_v13 = vunpack.c.l.bf16 %v7552_v11 }
 0x125   :  { %v4639_v23 = vunpack.c.h.bf16 %v7552_v11  ;;  %v7554_v8 = vpack.c.bf16 %v726_v9, %v724_v12 }
 0x126   :  { %v3998_v18 = vunpack.c.l.bf16 %v7553_v14  ;;  %v3999_v44 = vunpack.c.h.bf16 %v7553_v14  ;;  %v9280_v10 = vadd.f32 %v4636_v22, %v9241_v3  ;;  %v9283_v52 = vadd.f32 %v4637_v50, %v9245_v17 }
 0x127   :  { %v4000_v34 = vunpack.c.l.bf16 %v7554_v8  ;;  %v4001_v27 = vunpack.c.h.bf16 %v7554_v8  ;;  %v9286_v45 = vadd.f32 %v4638_v13, %v9249_v54  ;;  %v9289_v55 = vadd.f32 %v4639_v23, %v9253_v21 }
 0x128   :  { %11443 = vst [vmem:[#allocation39_spill] sm:$0xff] %v9280_v10  ;;  %11444 = vst [vmem:[#allocation40_spill] sm:$0xff] %v9283_v52  ;;  %v657_v53 = vpop.f32.mrb[24].mxu0  ;;  %v9292_v16 = vadd.f32 %v3998_v18, %v9241_v3  ;;  %v9295_v14 = vadd.f32 %v3999_v44, %v9245_v17  ;;  %v730_v22 = vpop.f32.mrb[24].mxu1 }
 0x129   :  { %11445 = vst [vmem:[#allocation41_spill] sm:$0xff] %v9286_v45  ;;  %11446 = vst [vmem:[#allocation42_spill] sm:$0xff] %v9289_v55  ;;  %v659_v9 = vpop.f32.mrb[25].mxu0  ;;  %v9298_v26 = vadd.f32 %v4000_v34, %v9249_v54  ;;  %v9301_v8 = vadd.f32 %v4001_v27, %v9253_v21  ;;  %v732_v50 = vpop.f32.mrb[25].mxu1 }
 0x12a   :  { %11447 = vst [vmem:[#allocation43_spill] sm:$0xff] %v9292_v16  ;;  %11448 = vst [vmem:[#allocation44_spill] sm:$0xff] %v9295_v14  ;;  %v7555_v11 = vpack.c.bf16 %v659_v9, %v657_v53  ;;  %v661_v12 = vpop.f32.mrb[26].mxu0  ;;  %v7556_v13 = vpack.c.bf16 %v732_v50, %v730_v22  ;;  %v734_v6 = vpop.f32.mrb[26].mxu1 }
 0x12b   :  { %11449 = vst [vmem:[#allocation45_spill] sm:$0xff] %v9298_v26  ;;  %11450 = vst [vmem:[#allocation46_spill] sm:$0xff] %v9301_v8  ;;  %v663_v23 = vpop.f32.mrb[27].mxu0  ;;  %v736_v52 = vpop.f32.mrb[27].mxu1 }
 0x12c   :  { %v3354_v41 = vunpack.c.l.bf16 %v7555_v11  ;;  %v3355_v18 = vunpack.c.h.bf16 %v7555_v11  ;;  %v7557_v55 = vpack.c.bf16 %v663_v23, %v661_v12  ;;  %v3356_v44 = vunpack.c.l.bf16 %v7556_v13 }
 0x12d   :  { %v3357_v45 = vunpack.c.h.bf16 %v7556_v13  ;;  %v7558_v10 = vpack.c.bf16 %v736_v52, %v734_v6 }
 0x12e   :  { %v2704_v14 = vunpack.c.l.bf16 %v7557_v55  ;;  %v2705_v16 = vunpack.c.h.bf16 %v7557_v55  ;;  %v9304_v34 = vadd.f32 %v3354_v41, %v9241_v3  ;;  %v9307_v27 = vadd.f32 %v3355_v18, %v9245_v17 }
 0x12f   :  { %v2706_v53 = vunpack.c.l.bf16 %v7558_v10  ;;  %v2707_v9 = vunpack.c.h.bf16 %v7558_v10  ;;  %v9310_v22 = vadd.f32 %v3356_v44, %v9249_v54  ;;  %v9313_v11 = vadd.f32 %v3357_v45, %v9253_v21 }
 0x130   :  { %11451 = vst [vmem:[#allocation47_spill] sm:$0xff] %v9304_v34  ;;  %11452 = vst [vmem:[#allocation48_spill] sm:$0xff] %v9307_v27  ;;  %v667_v12 = vpop.f32.mrb[28].mxu0  ;;  %v9316_v50 = vadd.f32 %v2704_v14, %v9241_v3  ;;  %v9319_v6 = vadd.f32 %v2705_v16, %v9245_v17  ;;  %v740_v52 = vpop.f32.mrb[28].mxu1  ;;  %v1042_v45 = vunpack.c.l.bf16 %v9119_v15  ;;  %v1043_v44 = vunpack.c.h.bf16 %v9119_v15 }
 0x131   :  { %11453 = vst [vmem:[#allocation49_spill] sm:$0xff] %v9310_v22  ;;  %11454 = vst [vmem:[#allocation50_spill] sm:$0xff] %v9313_v11  ;;  %v669_v41 = vpop.f32.mrb[29].mxu0  ;;  %v9322_v55 = vadd.f32 %v2706_v53, %v9249_v54  ;;  %v9325_v10 = vadd.f32 %v2707_v9, %v9253_v21  ;;  %v742_v18 = vpop.f32.mrb[29].mxu1  ;;  %v1044_v16 = vunpack.c.l.bf16 %v9123_v24  ;;  %v1045_v34 = vunpack.c.h.bf16 %v9123_v24 }
 0x132   :  { %11455 = vst [vmem:[#allocation51_spill] sm:$0xff] %v9316_v50  ;;  %11456 = vst [vmem:[#allocation52_spill] sm:$0xff] %v9319_v6  ;;  %v7559_v23 = vpack.c.bf16 %v669_v41, %v667_v12  ;;  %v671_v13 = vpop.f32.mrb[30].mxu0  ;;  %v7560_v8 = vpack.c.bf16 %v742_v18, %v740_v52  ;;  %v744_v26 = vpop.f32.mrb[30].mxu1  ;;  %v1067_v15 = vadd.f32 %v9138_v37, %v1042_v45 }
 0x133   :  { %11457 = vst [vmem:[#allocation53_spill] sm:$0xff] %v9322_v55  ;;  %11458 = vst [vmem:[#allocation54_spill] sm:$0xff] %v9325_v10  ;;  %v673_v14 = vpop.f32.mrb[31].mxu0  ;;  %v746_v53 = vpop.f32.mrb[31].mxu1  ;;  %v1069_v24 = vadd.f32 %v9130_v32, %v1044_v16 }
 0x134   :  { %v2054_v11 = vunpack.c.l.bf16 %v7559_v23  ;;  %v2055_v27 = vunpack.c.h.bf16 %v7559_v23  ;;  %v7561_v22 = vpack.c.bf16 %v673_v14, %v671_v13  ;;  %v2056_v9 = vunpack.c.l.bf16 %v7560_v8 }
 0x135   :  { %v2057_v51 = vunpack.c.h.bf16 %v7560_v8  ;;  %v7562_v12 = vpack.c.bf16 %v746_v53, %v744_v26  ;;  %v1068_v8 = vadd.f32 %v9142_v38, %v1043_v44  ;;  %v1070_v14 = vadd.f32 %v9134_v33, %v1045_v34 }
 0x136   :  { %v9332_v41 = vadd.f32 %v2054_v11, %v9241_v3  ;;  %v9335_v40 = vadd.f32 %v2055_v27, %v9245_v17  ;;  %v9339_v52 = vadd.f32 %v2056_v9, %v9249_v54 }
 0x137   :  { %v9342_v23 = vadd.f32 %v2057_v51, %v9253_v21 }
 0x138   :  { %v1298_v13 = vpop.f32.mrb[32].mxu0  ;;  %v1339_v18 = vpop.f32.mrb[32].mxu1 }
 0x139   :  { %v1346_v26 = vadd.f32 %v1298_v13, %v1067_v15  ;;  %v1300_v11 = vpop.f32.mrb[33].mxu0  ;;  %v1348_v27 = vadd.f32 %v1339_v18, %v1069_v24  ;;  %v1341_v10 = vpop.f32.mrb[33].mxu1  ;;  %v1385_v13 = vunpack.c.l.bf16 %v7561_v22 }
 0x13a   :  { %v1347_v53 = vadd.f32 %v1300_v11, %v1068_v8  ;;  %v1302_v37 = vpop.f32.mrb[34].mxu0  ;;  %v1349_v9 = vadd.f32 %v1341_v10, %v1070_v14  ;;  %v1343_v55 = vpop.f32.mrb[34].mxu1  ;;  %v1386_v10 = vunpack.c.h.bf16 %v7561_v22  ;;  %v1388_v8 = vunpack.c.h.bf16 %v7562_v12 }
 0x13b   :  { %v6956_v45 = vmul.f32 -1.442695, %v1346_v26  ;;  %v1303_v6 = vpop.f32.mrb[35].mxu0  ;;  %v1344_v50 = vpop.f32.mrb[35].mxu1  ;;  %v1410_v11 = vadd.f32 %v9241_v3, %v1385_v13 }
 0x13c   :  { %v6957_v51 = vmul.f32 -1.442695, %v1347_v53  ;;  %v6958_v32 = vmul.f32 -1.442695, %v1349_v9  ;;  %v1387_v6 = vunpack.c.l.bf16 %v7562_v12  ;;  %v1411_v37 = vadd.f32 %v9245_v17, %v1386_v10  ;;  %v9354_v17 = vpop.permute.xlu0 %1376 }
 0x13d   :  { %8072 = vpow2.f32 %v6956_v45  ;;  %v1413_v22 = vadd.f32 %v9253_v21, %v1388_v8  ;;  %11459 = vst [vmem:[#allocation55_spill] sm:$0xff] %v9354_v17  ;;  %vm11405_vm8 = vcmp.eq.s32.totalorder %v9354_v17, 1 }
 0x13e   :  { %8074 = vpow2.f32 %v6957_v51  ;;  %vm7026_vm9 = vmpackc.low %vm11405_vm8, %vm11405_vm8 }
 0x13f   :  { %8076 = vpow2.f32 %v6958_v32 }
 0x140   :  { %8078 = vtanh.f32 %v1348_v27  ;;  %v1412_v27 = vadd.f32 %v9249_v54, %v1387_v6 }
 0x147   :  { %v8073_v16 = vpop.eup %8072 }
 0x148   :  { %v8075_v38 = vpop.eup %8074  ;;  %v1353_v44 = vadd.f32 1.0, %v8073_v16 }
 0x149   :  { %v1359_v15 = vadd.f32 1.0, %v8075_v38  ;;  %v8077_v33 = vpop.eup %8076 }
 0x14a   :  { %8080 = vrcp.f32 %v1353_v44  ;;  %v8079_v34 = vpop.eup %8078  ;;  %v1366_v50 = vadd.f32 1.0, %v8077_v33 }
 0x14b   :  { %8082 = vrcp.f32 %v1359_v15 }
 0x14c   :  { %8084 = vrcp.f32 %v1366_v50 }
 0x154   :  { %v8081_v24 = vpop.eup %8080 }
 0x155   :  { %v8083_v55 = vpop.eup %8082  ;;  %v1370_v26 = vmul.f32 %v8081_v24, %v8079_v34 }
 0x156   :  { %v1369_v18 = vmul.f32 0.0, %v8083_v55  ;;  %v8085_v13 = vpop.eup %8084 }
 0x158   :  { %v9348_v14 = vadd.f32 %v1370_v26, %v1369_v18  ;;  %v1641_v53 = vpop.f32.mrb[36].mxu0  ;;  %v1682_v9 = vpop.f32.mrb[36].mxu1  ;;  %v8362_v18 = vld [vmem:[%s11310_s4] ss:$16 sps:$4 sm:$0xff]  }
 0x159   :  { %v1689_v45 = vadd.f32 %v1641_v53, %v1410_v11  ;;  %v1643_v51 = vpop.f32.mrb[37].mxu0  ;;  %v1691_v12 = vadd.f32 %v1682_v9, %v1412_v27  ;;  %v1684_v16 = vpop.f32.mrb[37].mxu1  ;;  %v8363_v11 = vld [vmem:[%s11310_s4 + $0x8] ss:$16 sps:$4 sm:$0xff]   ;;  %v8364_v53 = vld [vmem:[%s11310_s4 + $0x24] ss:$16 sps:$4 sm:$0xff]  }
 0x15a   :  { %8086 = vtanh.f32 %v9348_v14  ;;  %v1690_v32 = vadd.f32 %v1643_v51, %v1411_v37  ;;  %v1645_v38 = vpop.f32.mrb[38].mxu0  ;;  %v1692_v44 = vadd.f32 %v1684_v16, %v1413_v22  ;;  %v1686_v33 = vpop.f32.mrb[38].mxu1  ;;  %v8365_v27 = vld [vmem:[%s11310_s4 + $0x2c] ss:$16 sps:$4 sm:$0xff]   ;;  %v11461_v37 = vmov 0  }
 0x15b   :  { %v6991_v3 = vmul.f32 -1.442695, %v1689_v45  ;;  %v1646_v15 = vpop.f32.mrb[39].mxu0  ;;  %v1687_v54 = vpop.f32.mrb[39].mxu1  ;;  %v8366_v45 = vld [vmem:[%s11310_s4 + $0x20] ss:$16 sps:$4 sm:$0xff]  }
 0x15c   :  { %v6992_v34 = vmul.f32 -1.442695, %v1690_v32  ;;  %v6993_v10 = vmul.f32 -1.442695, %v1692_v44  ;;  %v8367_v9 = vld [vmem:[%s11310_s4 + $0x28] ss:$16 sps:$4 sm:$0xff]  }
 0x15d   :  { %8088 = vpow2.f32 %v6991_v3  ;;  %v8368_v51 = vld [vmem:[%s11310_s4 + $0x44] ss:$16 sps:$4 sm:$0xff]   ;;  %v8369_v22 = vld [vmem:[%s11310_s4 + $0x4c] ss:$16 sps:$4 sm:$0xff]   ;;  %v9536_v54 = vld [vmem:[%s11309_s3 + $0x80] ss:$16 sps:$4 sm:$0xff]  }
 0x15e   :  { %8090 = vpow2.f32 %v6992_v34  ;;  %v9526_v33 = vld [vmem:[%s11309_s3 + $0x84] ss:$16 sps:$4 sm:$0xff]   ;;  %v9531_v34 = vld [vmem:[%s11309_s3 + $0x8c] ss:$16 sps:$4 sm:$0xff]  }
 0x15f   :  { %8092 = vpow2.f32 %v6993_v10  ;;  %v9555_v10 = vld [vmem:[%s11309_s3 + $0xac] ss:$16 sps:$4 sm:$0xff]  }
 0x160   :  { %8094 = vtanh.f32 %v1691_v12 }
 0x164   :  { %v8087_v24 = vpop.eup %8086 }
 0x165   :  { %v9356_v21 = vmul.f32 %v8087_v24, %v8085_v13  ;;  %v9541_v13 = vld [vmem:[%s11309_s3 + $0x88] ss:$16 sps:$4 sm:$0xff]   ;;  %v9550_v24 = vld [vmem:[%s11309_s3 + $0xa4] ss:$16 sps:$4 sm:$0xff]  }
 0x167   :  { %11460 = vst [vmem:[#allocation56_spill] sm:$0xff] %v9356_v21  ;;  %v8089_v6 = vpop.eup %8088  ;;  %v7027_v55 = vpack.c.bf16 %v9356_v21, %v9356_v21 }
 0x168   :  { %v8091_v8 = vpop.eup %8090  ;;  %v1696_v50 = vadd.f32 1.0, %v8089_v6  ;;  %v9560_v6 = vld [vmem:[%s11309_s3 + $0xa0] ss:$16 sps:$4 sm:$0xff]  }
 0x169   :  { %v1702_v26 = vadd.f32 1.0, %v8091_v8  ;;  %7028 = vmatmul.mubr.msk.bf16.vlgmr.msra.gmra.mrb[40].mxu0 %vm7026_vm9, %v7027_v55  ;;  %7031 = vmatmul.mubr.msk.bf16.vlgmr.msra.gmra.mrb[40].mxu1 %vm7026_vm9, %v7027_v55  ;;  %v8093_v12 = vpop.eup %8092  ;;  %v9565_v55 = vld [vmem:[%s11309_s3 + $0xa8] ss:$16 sps:$4 sm:$0xff]   ;;  %v9574_v8 = vld [vmem:[%s11309_s3 + $0xc4] ss:$16 sps:$4 sm:$0xff]  }
 0x16a   :  { %8096 = vrcp.f32 %v1696_v50  ;;  %2257 = vmatpush1.bf16.msra.mxu0 %v8362_v18  ;;  %2298 = vmatpush1.bf16.msra.mxu1 %v8363_v11  ;;  %v8095_v32 = vpop.eup %8094  ;;  %v1709_v3 = vadd.f32 1.0, %v8093_v12  ;;  %v9579_v50 = vld [vmem:[%s11309_s3 + $0xcc] ss:$16 sps:$4 sm:$0xff]   ;;  %v9589_v18 = vld [vmem:[%s11309_s3 + $0xc8] ss:$16 sps:$4 sm:$0xff]  }
 0x16b   :  { %8098 = vrcp.f32 %v1702_v26  ;;  %2258 = vmatprep.subr.bf16.mxu0 %v8364_v53  ;;  %2299 = vmatprep.subr.bf16.mxu1 %v8365_v27  ;;  %v9584_v26 = vld [vmem:[%s11309_s3 + $0xc0] ss:$16 sps:$4 sm:$0xff]   ;;  %v9598_v11 = vld [vmem:[%s11309_s3 + $0xe4] ss:$16 sps:$4 sm:$0xff]   ;;  %v9603_v53 = vld [vmem:[%s11309_s3 + $0xec] ss:$16 sps:$4 sm:$0xff]  }
 0x16c   :  { %2288 = vmatprep.mubr.bf16.mxu0 %v11461_v37  ;;  %2329 = vmatprep.mubr.bf16.mxu1 %v11461_v37  ;;  %8100 = vrcp.f32 %v1709_v3  ;;  %v9608_v27 = vld [vmem:[%s11309_s3 + $0xe0] ss:$16 sps:$4 sm:$0xff]  }
 0x16e   :  { %2259 = vmatpush1.bf16.msra.mxu0 %v8366_v45  ;;  %2300 = vmatpush1.bf16.msra.mxu1 %v8367_v9  ;;  %v9613_v45 = vld [vmem:[%s11309_s3 + $0xe8] ss:$16 sps:$4 sm:$0xff]   ;;  %v9622_v9 = vld [vmem:[%s11310_s4 + $0x4] ss:$16 sps:$4 sm:$0xff]  }
 0x16f   :  { %2260 = vmatprep.subr.bf16.mxu0 %v8368_v51  ;;  %2301 = vmatprep.subr.bf16.mxu1 %v8369_v22  ;;  %11464 = vst [vmem:[#allocation59_spill] sm:$0xff] %v9622_v9  ;;  %v9627_v51 = vld [vmem:[%s11310_s4 + $0xc] ss:$16 sps:$4 sm:$0xff]  }
 0x170   :  { %11465 = vst [vmem:[#allocation60_spill] sm:$0xff] %v9627_v51 }
 0x172   :  { %2261 = vmatpush1.bf16.msra.mxu0 %v8946_v56  ;;  %2302 = vmatpush1.bf16.msra.mxu1 %v8952_v57 }
 0x173   :  { %2262 = vmatprep.subr.bf16.mxu0 %v8957_v58  ;;  %2303 = vmatprep.subr.bf16.mxu1 %v8963_v59  ;;  %v9413_v59 = vpop.permute.xlu0 %1719 }
 0x174   :  { %v8097_v16 = vpop.eup %8096  ;;  %11462 = vst [vmem:[#allocation57_spill] sm:$0xff] %v9413_v59  ;;  %vm1721_vm10 = vcmp.eq.s32.totalorder %v9413_v59, 1 }
 0x175   :  { %v8099_v38 = vpop.eup %8098  ;;  %v1713_v44 = vmul.f32 %v8097_v16, %v8095_v32  ;;  %vm7067_vm11 = vmpackc.low %vm1721_vm10, %vm1721_vm10 }
 0x176   :  { %v1712_v15 = vmul.f32 0.0, %v8099_v38  ;;  %2263 = vmatpush1.bf16.msra.mxu0 %v8968_v60  ;;  %2304 = vmatpush1.bf16.msra.mxu1 %v8973_v61  ;;  %v8101_v57 = vpop.eup %8100 }
 0x177   :  { %2264 = vmatprep.subr.bf16.mxu0 %v8978_v62  ;;  %2305 = vmatprep.subr.bf16.mxu1 %v8984_v63  ;;  %v9430_v62 = vld [vmem:[%s11309_s3 + $0x4] ss:$16 sps:$4 sm:$0xff]   ;;  %v9435_v63 = vld [vmem:[%s11309_s3 + $0xc] ss:$16 sps:$4 sm:$0xff]  }
 0x178   :  { %v9398_v56 = vadd.f32 %v1713_v44, %v1712_v15 }
 0x17a   :  { %8102 = vtanh.f32 %v9398_v56  ;;  %2265 = vmatpush1.bf16.msra.mxu0 %v8992_v0  ;;  %2306 = vmatpush1.bf16.msra.mxu1 %v8997_v1  ;;  %v9440_v0 = vld [vmem:[%s11309_s3] ss:$16 sps:$4 sm:$0xff]   ;;  %v9445_v1 = vld [vmem:[%s11309_s3 + $0x8] ss:$16 sps:$4 sm:$0xff]  }
 0x17b   :  { %2266 = vmatprep.subr.bf16.mxu0 %v9002_v2  ;;  %2307 = vmatprep.subr.bf16.mxu1 %v9008_v4  ;;  %v9454_v2 = vld [vmem:[%s11309_s3 + $0x24] ss:$16 sps:$4 sm:$0xff]   ;;  %v9459_v4 = vld [vmem:[%s11309_s3 + $0x2c] ss:$16 sps:$4 sm:$0xff]  }
 0x17e   :  { %2267 = vmatpush1.bf16.msra.mxu0 %v9016_v5  ;;  %2308 = vmatpush1.bf16.msra.mxu1 %v9021_v7  ;;  %v9464_v5 = vld [vmem:[%s11309_s3 + $0x20] ss:$16 sps:$4 sm:$0xff]   ;;  %v9469_v7 = vld [vmem:[%s11309_s3 + $0x28] ss:$16 sps:$4 sm:$0xff]  }
 0x17f   :  { %2268 = vmatprep.subr.bf16.mxu0 %v9026_v19  ;;  %2309 = vmatprep.subr.bf16.mxu1 %v9032_v20  ;;  %v9478_v19 = vld [vmem:[%s11309_s3 + $0x44] ss:$16 sps:$4 sm:$0xff]   ;;  %v9483_v20 = vld [vmem:[%s11309_s3 + $0x4c] ss:$16 sps:$4 sm:$0xff]  }
 0x182   :  { %2269 = vmatpush1.bf16.msra.mxu0 %v9040_v25  ;;  %2310 = vmatpush1.bf16.msra.mxu1 %v9045_v30  ;;  %v9488_v25 = vld [vmem:[%s11309_s3 + $0x40] ss:$16 sps:$4 sm:$0xff]   ;;  %v9493_v30 = vld [vmem:[%s11309_s3 + $0x48] ss:$16 sps:$4 sm:$0xff]  }
 0x183   :  { %2270 = vmatprep.subr.bf16.mxu0 %v9050_v31  ;;  %2311 = vmatprep.subr.bf16.mxu1 %v9064_v48  ;;  %v9502_v31 = vld [vmem:[%s11309_s3 + $0x64] ss:$16 sps:$4 sm:$0xff]   ;;  %v9512_v48 = vld [vmem:[%s11309_s3 + $0x60] ss:$16 sps:$4 sm:$0xff]  }
 0x184   :  { %v8103_v58 = vpop.eup %8102 }
 0x185   :  { %v9415_v60 = vmul.f32 %v8103_v58, %v8101_v57 }
 0x186   :  { %2271 = vmatpush1.bf16.msra.mxu0 %v9059_v35  ;;  %2312 = vmatpush1.bf16.msra.mxu1 %v9069_v49  ;;  %v9507_v35 = vld [vmem:[%s11309_s3 + $0x6c] ss:$16 sps:$4 sm:$0xff]   ;;  %v9517_v49 = vld [vmem:[%s11309_s3 + $0x68] ss:$16 sps:$4 sm:$0xff]  }
 0x187   :  { %11463 = vst [vmem:[#allocation58_spill] sm:$0xff] %v9415_v60  ;;  %v7068_v61 = vpack.c.bf16 %v9415_v60, %v9415_v60  ;;  %2581 = vmatprep.subr.bf16.mxu0 %v9430_v62  ;;  %2622 = vmatprep.subr.bf16.mxu1 %v9435_v63 }
 0x189   :  { %7069 = vmatmul.mubr.msk.bf16.vlgmr.msra.gmra.mrb[44].mxu0 %vm7067_vm11, %v7068_v61  ;;  %7072 = vmatmul.mubr.msk.bf16.vlgmr.msra.gmra.mrb[44].mxu1 %vm7067_vm11, %v7068_v61 }
 0x18a   :  { %2613 = vmatprep.mubr.bf16.mxu0 %v11461_v37  ;;  %2654 = vmatprep.mubr.bf16.mxu1 %v11461_v37 }
 0x18b   :  { %2582 = vmatpush1.bf16.msra.mxu0 %v9440_v0  ;;  %2623 = vmatpush1.bf16.msra.mxu1 %v9445_v1 }
 0x18c   :  { %2583 = vmatprep.subr.bf16.mxu0 %v9454_v2  ;;  %2624 = vmatprep.subr.bf16.mxu1 %v9459_v4 }
 0x18f   :  { %2584 = vmatpush1.bf16.msra.mxu0 %v9464_v5  ;;  %2625 = vmatpush1.bf16.msra.mxu1 %v9469_v7 }
 0x190   :  { %2585 = vmatprep.subr.bf16.mxu0 %v9478_v19  ;;  %2626 = vmatprep.subr.bf16.mxu1 %v9483_v20 }
 0x193   :  { %2586 = vmatpush1.bf16.msra.mxu0 %v9488_v25  ;;  %2627 = vmatpush1.bf16.msra.mxu1 %v9493_v30 }
 0x194   :  { %2587 = vmatprep.subr.bf16.mxu0 %v9502_v31  ;;  %2628 = vmatprep.subr.bf16.mxu1 %v9507_v35 }
 0x197   :  { %2588 = vmatpush1.bf16.msra.mxu0 %v9512_v48  ;;  %2629 = vmatpush1.bf16.msra.mxu1 %v9517_v49 }
 0x198   :  { %2589 = vmatprep.subr.bf16.mxu0 %v9526_v33  ;;  %2630 = vmatprep.subr.bf16.mxu1 %v9531_v34 }
 0x19b   :  { %2590 = vmatpush1.bf16.msra.mxu0 %v9536_v54  ;;  %2631 = vmatpush1.bf16.msra.mxu1 %v9541_v13 }
 0x19c   :  { %2591 = vmatprep.subr.bf16.mxu0 %v9550_v24  ;;  %2632 = vmatprep.subr.bf16.mxu1 %v9555_v10 }
 0x19f   :  { %2592 = vmatpush1.bf16.msra.mxu0 %v9560_v6  ;;  %2633 = vmatpush1.bf16.msra.mxu1 %v9565_v55 }
 0x1a0   :  { %2593 = vmatprep.subr.bf16.mxu0 %v9574_v8  ;;  %2634 = vmatprep.subr.bf16.mxu1 %v9579_v50 }
 0x1a3   :  { %2594 = vmatpush1.bf16.msra.mxu0 %v9584_v26  ;;  %2635 = vmatpush1.bf16.msra.mxu1 %v9589_v18 }
 0x1a4   :  { %2595 = vmatprep.subr.bf16.mxu0 %v9598_v11  ;;  %2636 = vmatprep.subr.bf16.mxu1 %v9603_v53 }
 0x1a7   :  { %2596 = vmatpush1.bf16.msra.mxu0 %v9608_v27  ;;  %2637 = vmatpush1.bf16.msra.mxu1 %v9613_v45 }
 0x1a8   :  { %2906 = vmatprep.subr.bf16.mxu0 %v9622_v9  ;;  %2947 = vmatprep.subr.bf16.mxu1 %v9627_v51 }
 0x23c   :  { %v1965_v22 = vpop.f32.mrb[40].mxu0  ;;  %v2006_v12 = vpop.f32.mrb[40].mxu1 }
 0x23d   :  { %v2013_v32 = vadd.f32 %v1965_v22, %v9145_v42  ;;  %v2015_v16 = vadd.f32 %v2006_v12, %v9151_v46  ;;  %v1967_v38 = vpop.f32.mrb[41].mxu0  ;;  %v2008_v3 = vpop.f32.mrb[41].mxu1 }
 0x23e   :  { %v2014_v44 = vadd.f32 %v1967_v38, %v9148_v43  ;;  %v2016_v15 = vadd.f32 %v2008_v3, %v9154_v47  ;;  %v1969_v57 = vpop.f32.mrb[42].mxu0  ;;  %v2010_v58 = vpop.f32.mrb[42].mxu1 }
 0x23f   :  { %v7032_v61 = vmul.f32 -1.442695, %v2013_v32  ;;  %v1970_v39 = vpop.f32.mrb[43].mxu0  ;;  %v2011_v29 = vpop.f32.mrb[43].mxu1 }
 0x240   :  { %v7033_v36 = vmul.f32 -1.442695, %v2014_v44  ;;  %v7034_v28 = vmul.f32 -1.442695, %v2016_v15  ;;  %v1380_v29 = vsel %vm11405_vm8, %v9348_v14, 0.0  ;;  %v9638_v38 = vpop.permute.xlu1 %2043 }
 0x241   :  { %8104 = vpow2.f32 %v7032_v61  ;;  %11466 = vst [vmem:[#allocation61_spill] sm:$0xff] %v9638_v38  ;;  %vm2045_vm12 = vcmp.eq.s32.totalorder %v9638_v38, 1  ;;  %v9768_v38 = vld [vmem:[%s11310_s4 + $0x80] ss:$16 sps:$4 sm:$0xff]  }
 0x242   :  { %8106 = vpow2.f32 %v7033_v36  ;;  %vm7563_vm1 = vmpackc.low %vm2045_vm12, %vm11405_vm8 }
 0x243   :  { %8108 = vpow2.f32 %v7034_v28 }
 0x244   :  { %8110 = vtanh.f32 %v2015_v16 }
 0x24b   :  { %v8105_v51 = vpop.eup %8104 }
 0x24c   :  { %v8107_v9 = vpop.eup %8106  ;;  %v2020_v42 = vadd.f32 1.0, %v8105_v51 }
 0x24d   :  { %v2026_v46 = vadd.f32 1.0, %v8107_v9  ;;  %v8109_v43 = vpop.eup %8108 }
 0x24e   :  { %8112 = vrcp.f32 %v2020_v42  ;;  %v8111_v22 = vpop.eup %8110  ;;  %v2033_v32 = vadd.f32 1.0, %v8109_v43 }
 0x24f   :  { %8114 = vrcp.f32 %v2026_v46 }
 0x250   :  { %8116 = vrcp.f32 %v2033_v32  ;;  %v9665_v32 = vld [vmem:[%s11310_s4] ss:$16 sps:$4 sm:$0xff]  }
 0x258   :  { %v8113_v47 = vpop.eup %8112 }
 0x259   :  { %v8115_v12 = vpop.eup %8114  ;;  %v2037_v39 = vmul.f32 %v8113_v47, %v8111_v22 }
 0x25a   :  { %v2036_v36 = vmul.f32 %v8115_v12, %v1380_v29 }
 0x25c   :  { %v2038_v3 = vadd.f32 %v2037_v39, %v2036_v36  ;;  %v2290_v51 = vpop.f32.mrb[44].mxu0  ;;  %v2331_v28 = vpop.f32.mrb[44].mxu1  ;;  %v9670_v36 = vld [vmem:[%s11310_s4 + $0x8] ss:$16 sps:$4 sm:$0xff]  }
 0x25d   :  { %v2338_v9 = vadd.f32 %v2290_v51, %v9332_v41  ;;  %v2340_v16 = vadd.f32 %v2331_v28, %v9339_v52  ;;  %v2292_v44 = vpop.f32.mrb[45].mxu0  ;;  %v2333_v15 = vpop.f32.mrb[45].mxu1 }
 0x25e   :  { %8118 = vtanh.f32 %v2038_v3  ;;  %v2339_v14 = vadd.f32 %v2292_v44, %v9335_v40  ;;  %v2341_v57 = vadd.f32 %v2333_v15, %v9342_v23  ;;  %v2294_v58 = vpop.f32.mrb[46].mxu0  ;;  %v2335_v61 = vpop.f32.mrb[46].mxu1  ;;  %v9647_v42 = vsel %vm2045_vm12, %v2038_v3, %v1380_v29  ;;  %v9682_v44 = vld [vmem:[%s11310_s4 + $0x2c] ss:$16 sps:$4 sm:$0xff]  }
 0x25f   :  { %v7073_v46 = vmul.f32 -1.442695, %v2338_v9  ;;  %v2295_v43 = vpop.f32.mrb[47].mxu0  ;;  %v2336_v22 = vpop.f32.mrb[47].mxu1  ;;  %v9654_v40 = vsel %vm11405_vm8, %v9356_v21, 0.0 }
 0x260   :  { %v7074_v47 = vmul.f32 -1.442695, %v2339_v14  ;;  %v8117_v41 = vpop.eup %8116  ;;  %v7075_v12 = vmul.f32 -1.442695, %v2341_v57  ;;  %11468 = vst [vmem:[#allocation63_spill] sm:$0xff] %v9654_v40  ;;  %v9761_v21 = vpop.permute.xlu1 %2368 }
 0x261   :  { %8120 = vpow2.f32 %v7073_v46  ;;  %v9677_v9 = vld [vmem:[%s11310_s4 + $0x24] ss:$16 sps:$4 sm:$0xff]   ;;  %v9689_v14 = vld [vmem:[%s11310_s4 + $0x20] ss:$16 sps:$4 sm:$0xff]   ;;  %v9694_v57 = vld [vmem:[%s11310_s4 + $0x28] ss:$16 sps:$4 sm:$0xff]  }
 0x262   :  { %8122 = vpow2.f32 %v7074_v47  ;;  %v9706_v58 = vld [vmem:[%s11310_s4 + $0x4c] ss:$16 sps:$4 sm:$0xff]   ;;  %v9715_v61 = vld [vmem:[%s11310_s4 + $0x40] ss:$16 sps:$4 sm:$0xff]   ;;  %v9720_v46 = vld [vmem:[%s11310_s4 + $0x48] ss:$16 sps:$4 sm:$0xff]  }
 0x263   :  { %8124 = vpow2.f32 %v7075_v12  ;;  %v9727_v43 = vld [vmem:[%s11310_s4 + $0x64] ss:$16 sps:$4 sm:$0xff]   ;;  %v9732_v22 = vld [vmem:[%s11310_s4 + $0x6c] ss:$16 sps:$4 sm:$0xff]   ;;  %v9744_v12 = vld [vmem:[%s11310_s4 + $0x68] ss:$16 sps:$4 sm:$0xff]  }
 0x264   :  { %8126 = vtanh.f32 %v2340_v16  ;;  %v9701_v16 = vld [vmem:[%s11310_s4 + $0x44] ss:$16 sps:$4 sm:$0xff]   ;;  %11469 = vst [vmem:[#allocation64_spill] sm:$0xff] %v9732_v22  ;;  %11470 = vst [vmem:[#allocation65_spill] sm:$0xff] %v9761_v21  ;;  %vm2370_vm13 = vcmp.eq.s32.totalorder %v9761_v21, 1 }
 0x268   :  { %v8119_v52 = vpop.eup %8118 }
 0x269   :  { %v9649_v39 = vmul.f32 %v8119_v52, %v8117_v41  ;;  %v9739_v52 = vld [vmem:[%s11310_s4 + $0x60] ss:$16 sps:$4 sm:$0xff]  }
 0x26b   :  { %11467 = vst [vmem:[#allocation62_spill] sm:$0xff] %v9649_v39  ;;  %v8121_v23 = vpop.eup %8120  ;;  %v9660_v29 = vsel %vm2045_vm12, %v9649_v39, %v9654_v40 }
 0x26c   :  { %v8123_v3 = vpop.eup %8122  ;;  %v2345_v51 = vadd.f32 1.0, %v8121_v23  ;;  %v2388_v28 = vpack.c.bf16 %v9660_v29, %v9660_v29 }
 0x26d   :  { %v2351_v15 = vadd.f32 1.0, %v8123_v3  ;;  %v8125_v47 = vpop.eup %8124  ;;  %v9751_v3 = vld [vmem:[%s11310_s4 + $0x84] ss:$16 sps:$4 sm:$0xff]  }
 0x26e   :  { %8128 = vrcp.f32 %v2345_v51  ;;  %2614 = vmatmul.mubr.bf16.vlgmr.msra.gmra.mrb[48].mxu0 %v2388_v28  ;;  %2655 = vmatmul.mubr.bf16.vlgmr.msra.gmra.mrb[48].mxu1 %v2388_v28  ;;  %v8127_v41 = vpop.eup %8126  ;;  %v9756_v51 = vld [vmem:[%s11310_s4 + $0x8c] ss:$16 sps:$4 sm:$0xff]   ;;  %v2358_v39 = vadd.f32 1.0, %v8125_v47  ;;  %v9780_v47 = vld [vmem:[%s11310_s4 + $0xa4] ss:$16 sps:$4 sm:$0xff]  }
 0x26f   :  { %8130 = vrcp.f32 %v2351_v15  ;;  %2907 = vmatpush1.bf16.msra.mxu0 %v9665_v32  ;;  %2948 = vmatpush1.bf16.msra.mxu1 %v9670_v36  ;;  %v1723_v15 = vsel %vm1721_vm10, %v9398_v56, 0.0  ;;  %11472 = vst [vmem:[#allocation67_spill] sm:$0xff] %v9780_v47 }
 0x270   :  { %2908 = vmatprep.subr.bf16.mxu0 %v9677_v9  ;;  %2949 = vmatprep.subr.bf16.mxu1 %v9682_v44  ;;  %8132 = vrcp.f32 %v2358_v39  ;;  %v9809_v39 = vld [vmem:[%s11310_s4 + $0xc4] ss:$16 sps:$4 sm:$0xff]  }
 0x271   :  { %2938 = vmatprep.mubr.bf16.mxu0 %v11461_v37  ;;  %2979 = vmatprep.mubr.bf16.mxu1 %v11461_v37  ;;  %11476 = vst [vmem:[#allocation71_spill] sm:$0xff] %v9809_v39 }
 0x273   :  { %2909 = vmatpush1.bf16.msra.mxu0 %v9689_v14  ;;  %2950 = vmatpush1.bf16.msra.mxu1 %v9694_v57 }
 0x274   :  { %2910 = vmatprep.subr.bf16.mxu0 %v9701_v16  ;;  %2951 = vmatprep.subr.bf16.mxu1 %v9706_v58 }
 0x277   :  { %2911 = vmatpush1.bf16.msra.mxu0 %v9715_v61  ;;  %2952 = vmatpush1.bf16.msra.mxu1 %v9720_v46 }
 0x278   :  { %v8129_v23 = vpop.eup %8128  ;;  %2912 = vmatprep.subr.bf16.mxu0 %v9727_v43  ;;  %2953 = vmatprep.subr.bf16.mxu1 %v9732_v22  ;;  %v9773_v22 = vld [vmem:[%s11310_s4 + $0x88] ss:$16 sps:$4 sm:$0xff]  }
 0x279   :  { %v8131_v28 = vpop.eup %8130  ;;  %v2362_v40 = vmul.f32 %v8129_v23, %v8127_v41  ;;  %11471 = vst [vmem:[#allocation66_spill] sm:$0xff] %v9773_v22  ;;  %v9785_v41 = vld [vmem:[%s11310_s4 + $0xac] ss:$16 sps:$4 sm:$0xff]   ;;  %v9802_v23 = vld [vmem:[%s11310_s4 + $0xa8] ss:$16 sps:$4 sm:$0xff]  }
 0x27a   :  { %v2361_v17 = vmul.f32 %v8131_v28, %v1723_v15  ;;  %11473 = vst [vmem:[#allocation68_spill] sm:$0xff] %v9785_v41  ;;  %11475 = vst [vmem:[#allocation70_spill] sm:$0xff] %v9802_v23  ;;  %v9814_v28 = vld [vmem:[%s11310_s4 + $0xcc] ss:$16 sps:$4 sm:$0xff]  }
 0x27b   :  { %2913 = vmatpush1.bf16.msra.mxu0 %v9739_v52  ;;  %2954 = vmatpush1.bf16.msra.mxu1 %v9744_v12  ;;  %11477 = vst [vmem:[#allocation72_spill] sm:$0xff] %v9814_v28 }
 0x27c   :  { %v2363_v56 = vadd.f32 %v2362_v40, %v2361_v17  ;;  %2914 = vmatprep.subr.bf16.mxu0 %v9751_v3  ;;  %2955 = vmatprep.subr.bf16.mxu1 %v9756_v51  ;;  %v9797_v40 = vld [vmem:[%s11310_s4 + $0xa0] ss:$16 sps:$4 sm:$0xff]  }
 0x27d   :  { %11474 = vst [vmem:[#allocation69_spill] sm:$0xff] %v9797_v40 }
 0x27e   :  { %8134 = vtanh.f32 %v2363_v56  ;;  %v9790_v17 = vsel %vm2370_vm13, %v2363_v56, %v1723_v15  ;;  %v9821_v15 = vld [vmem:[%s11310_s4 + $0xc0] ss:$16 sps:$4 sm:$0xff]   ;;  %v9826_v56 = vld [vmem:[%s11310_s4 + $0xc8] ss:$16 sps:$4 sm:$0xff]  }
 0x27f   :  { %2915 = vmatpush1.bf16.msra.mxu0 %v9768_v38  ;;  %2956 = vmatpush1.bf16.msra.mxu1 %v9773_v22  ;;  %11478 = vst [vmem:[#allocation73_spill] sm:$0xff] %v9821_v15  ;;  %11479 = vst [vmem:[#allocation74_spill] sm:$0xff] %v9826_v56 }
 0x280   :  { %2916 = vmatprep.subr.bf16.mxu0 %v9780_v47  ;;  %2957 = vmatprep.subr.bf16.mxu1 %v9785_v41  ;;  %v8133_v41 = vpop.eup %8132 }
 0x283   :  { %2917 = vmatpush1.bf16.msra.mxu0 %v9797_v40  ;;  %2958 = vmatpush1.bf16.msra.mxu1 %v9802_v23  ;;  %v9833_v40 = vld [vmem:[%s11310_s4 + $0xe4] ss:$16 sps:$4 sm:$0xff]   ;;  %v9838_v23 = vld [vmem:[%s11310_s4 + $0xec] ss:$16 sps:$4 sm:$0xff]  }
 0x284   :  { %2918 = vmatprep.subr.bf16.mxu0 %v9809_v39  ;;  %2959 = vmatprep.subr.bf16.mxu1 %v9814_v28  ;;  %11480 = vst [vmem:[#allocation75_spill] sm:$0xff] %v9838_v23  ;;  %v9845_v39 = vld [vmem:[%s11310_s4 + $0xe0] ss:$16 sps:$4 sm:$0xff]   ;;  %v9850_v28 = vld [vmem:[%s11310_s4 + $0xe8] ss:$16 sps:$4 sm:$0xff]  }
 0x287   :  { %2919 = vmatpush1.bf16.msra.mxu0 %v9821_v15  ;;  %2960 = vmatpush1.bf16.msra.mxu1 %v9826_v56  ;;  %v9859_v56 = vsel %vm1721_vm10, %v9415_v60, 0.0 }
 0x288   :  { %v8135_v47 = vpop.eup %8134  ;;  %2920 = vmatprep.subr.bf16.mxu0 %v9833_v40  ;;  %2961 = vmatprep.subr.bf16.mxu1 %v9838_v23  ;;  %11482 = vst [vmem:[#allocation77_spill] sm:$0xff] %v9859_v56 }
 0x289   :  { %v9854_v22 = vmul.f32 %v8135_v47, %v8133_v41  ;;  %v9912_v47 = vpop.permute.xlu0 %2693 }
 0x28a   :  { %vm2695_vm14 = vcmp.eq.s32.totalorder %v9912_v47, 1 }
 0x28b   :  { %11481 = vst [vmem:[#allocation76_spill] sm:$0xff] %v9854_v22  ;;  %2921 = vmatpush1.bf16.msra.mxu0 %v9845_v39  ;;  %2962 = vmatpush1.bf16.msra.mxu1 %v9850_v28  ;;  %v9867_v15 = vsel %vm2370_vm13, %v9854_v22, %v9859_v56 }
 0x28c   :  { %v2713_v23 = vpack.c.bf16 %v9867_v15, %v9867_v15  ;;  %3231 = vmatprep.subr.bf16.mxu0 %v9430_v62  ;;  %3272 = vmatprep.subr.bf16.mxu1 %v9435_v63  ;;  %v11483_v62 = vld [vmem:[#allocation59_spill] sm:$0xff]  ;;  %v11484_v63 = vld [vmem:[#allocation60_spill] sm:$0xff] }
 0x28d   :  { %11489 = vst [vmem:[#allocation59_spill] sm:$0xff] %v9912_v47 }
 0x28e   :  { %2939 = vmatmul.mubr.bf16.vlgmr.msra.gmra.mrb[52].mxu0 %v2713_v23  ;;  %2980 = vmatmul.mubr.bf16.vlgmr.msra.gmra.mrb[52].mxu1 %v2713_v23 }
 0x28f   :  { %3232 = vmatpush1.bf16.msra.mxu0 %v9440_v0  ;;  %3273 = vmatpush1.bf16.msra.mxu1 %v9445_v1 }
 0x290   :  { %3233 = vmatprep.subr.bf16.mxu0 %v9454_v2  ;;  %3274 = vmatprep.subr.bf16.mxu1 %v9459_v4  ;;  %v11485_v2 = vld [vmem:[#allocation7_spill] sm:$0xff] }
 0x291   :  { %3263 = vmatprep.mubr.bf16.mxu0 %v11461_v37  ;;  %3304 = vmatprep.mubr.bf16.mxu1 %v11461_v37 }
 0x293   :  { %3234 = vmatpush1.bf16.msra.mxu0 %v9464_v5  ;;  %3275 = vmatpush1.bf16.msra.mxu1 %v9469_v7  ;;  %v11486_v5 = vld [vmem:[#allocation9_spill] sm:$0xff] }
 0x294   :  { %3235 = vmatprep.subr.bf16.mxu0 %v9478_v19  ;;  %3276 = vmatprep.subr.bf16.mxu1 %v9483_v20 }
 0x297   :  { %3236 = vmatpush1.bf16.msra.mxu0 %v9488_v25  ;;  %3277 = vmatpush1.bf16.msra.mxu1 %v9493_v30  ;;  %v11487_v25 = vld [vmem:[#allocation8_spill] sm:$0xff] }
 0x298   :  { %3237 = vmatprep.subr.bf16.mxu0 %v9502_v31  ;;  %3278 = vmatprep.subr.bf16.mxu1 %v9507_v35  ;;  %v11488_v31 = vld [vmem:[#allocation10_spill] sm:$0xff] }
 0x29b   :  { %3238 = vmatpush1.bf16.msra.mxu0 %v9512_v48  ;;  %3279 = vmatpush1.bf16.msra.mxu1 %v9517_v49 }
 0x29c   :  { %3239 = vmatprep.subr.bf16.mxu0 %v9526_v33  ;;  %3280 = vmatprep.subr.bf16.mxu1 %v9531_v34 }
 0x29f   :  { %3240 = vmatpush1.bf16.msra.mxu0 %v9536_v54  ;;  %3281 = vmatpush1.bf16.msra.mxu1 %v9541_v13 }
 0x2a0   :  { %3241 = vmatprep.subr.bf16.mxu0 %v9550_v24  ;;  %3282 = vmatprep.subr.bf16.mxu1 %v9555_v10 }
 0x2a3   :  { %3242 = vmatpush1.bf16.msra.mxu0 %v9560_v6  ;;  %3283 = vmatpush1.bf16.msra.mxu1 %v9565_v55 }
 0x2a4   :  { %3243 = vmatprep.subr.bf16.mxu0 %v9574_v8  ;;  %3284 = vmatprep.subr.bf16.mxu1 %v9579_v50 }
 0x2a7   :  { %3244 = vmatpush1.bf16.msra.mxu0 %v9584_v26  ;;  %3285 = vmatpush1.bf16.msra.mxu1 %v9589_v18 }
 0x2a8   :  { %3245 = vmatprep.subr.bf16.mxu0 %v9598_v11  ;;  %3286 = vmatprep.subr.bf16.mxu1 %v9603_v53 }
 0x2ab   :  { %3246 = vmatpush1.bf16.msra.mxu0 %v9608_v27  ;;  %3287 = vmatpush1.bf16.msra.mxu1 %v9613_v45 }
 0x2ac   :  { %3556 = vmatprep.subr.bf16.mxu0 %v11483_v62  ;;  %3597 = vmatprep.subr.bf16.mxu1 %v11484_v63  ;;  %v11490_v63 = vld [vmem:[#allocation51_spill] sm:$0xff] }
 0x341   :  { %v2615_v0 = vpop.f32.mrb[48].mxu0  ;;  %v2656_v1 = vpop.f32.mrb[48].mxu1 }
 0x342   :  { %v2663_v4 = vadd.f32 %v2615_v0, %v11485_v2  ;;  %v2665_v7 = vadd.f32 %v2656_v1, %v11486_v5  ;;  %v2617_v19 = vpop.f32.mrb[49].mxu0  ;;  %v2658_v20 = vpop.f32.mrb[49].mxu1  ;;  %v11491_v1 = vld [vmem:[#allocation53_spill] sm:$0xff] }
 0x343   :  { %v2664_v30 = vadd.f32 %v2617_v19, %v11487_v25  ;;  %v2666_v35 = vadd.f32 %v2658_v20, %v11488_v31  ;;  %v2619_v48 = vpop.f32.mrb[50].mxu0  ;;  %v2660_v49 = vpop.f32.mrb[50].mxu1  ;;  %v11493_v20 = vld [vmem:[#allocation54_spill] sm:$0xff] }
 0x344   :  { %v7108_v33 = vmul.f32 -1.442695, %v2663_v4  ;;  %v2620_v34 = vpop.f32.mrb[51].mxu0  ;;  %v2661_v54 = vpop.f32.mrb[51].mxu1 }
 0x345   :  { %v7109_v13 = vmul.f32 -1.442695, %v2664_v30  ;;  %v7110_v24 = vmul.f32 -1.442695, %v2666_v35 }
 0x346   :  { %8136 = vpow2.f32 %v7108_v33 }
 0x347   :  { %8138 = vpow2.f32 %v7109_v13 }
 0x348   :  { %8140 = vpow2.f32 %v7110_v24 }
 0x349   :  { %8142 = vtanh.f32 %v2665_v7  ;;  %v11492_v7 = vld [vmem:[#allocation52_spill] sm:$0xff] }
 0x350   :  { %v8137_v10 = vpop.eup %8136 }
 0x351   :  { %v8139_v6 = vpop.eup %8138  ;;  %v2670_v55 = vadd.f32 1.0, %v8137_v10 }
 0x352   :  { %v2676_v8 = vadd.f32 1.0, %v8139_v6  ;;  %v8141_v50 = vpop.eup %8140 }
 0x353   :  { %8144 = vrcp.f32 %v2670_v55  ;;  %v8143_v26 = vpop.eup %8142  ;;  %v2683_v27 = vadd.f32 1.0, %v8141_v50 }
 0x354   :  { %8146 = vrcp.f32 %v2676_v8 }
 0x355   :  { %8148 = vrcp.f32 %v2683_v27  ;;  %v11504_v27 = vld [vmem:[#allocation73_spill] sm:$0xff] }
 0x35d   :  { %v8145_v18 = vpop.eup %8144 }
 0x35e   :  { %v8147_v11 = vpop.eup %8146  ;;  %v2687_v53 = vmul.f32 %v8145_v18, %v8143_v26 }
 0x35f   :  { %v2686_v45 = vmul.f32 %v8147_v11, %v9647_v42  ;;  %v8149_v54 = vpop.eup %8148  ;;  %v11503_v11 = vld [vmem:[#allocation72_spill] sm:$0xff] }
 0x361   :  { %v2688_v41 = vadd.f32 %v2687_v53, %v2686_v45  ;;  %v2940_v23 = vpop.f32.mrb[52].mxu0  ;;  %v2981_v62 = vpop.f32.mrb[52].mxu1  ;;  %v11506_v45 = vld [vmem:[#allocation75_spill] sm:$0xff] }
 0x362   :  { %v2988_v0 = vadd.f32 %v2940_v23, %v11490_v63  ;;  %v2990_v2 = vadd.f32 %v2981_v62, %v11491_v1  ;;  %v2942_v4 = vpop.f32.mrb[53].mxu0  ;;  %v2983_v5 = vpop.f32.mrb[53].mxu1  ;;  %v10014_v63 = vld [vmem:[%s11309_s3 + $0x24] ss:$16 sps:$4 sm:$0xff]   ;;  %v10024_v1 = vld [vmem:[%s11309_s3 + $0x20] ss:$16 sps:$4 sm:$0xff]  }
 0x363   :  { %8150 = vtanh.f32 %v2688_v41  ;;  %v2989_v19 = vadd.f32 %v2942_v4, %v11492_v7  ;;  %v2991_v25 = vadd.f32 %v2983_v5, %v11493_v20  ;;  %v2944_v30 = vpop.f32.mrb[54].mxu0  ;;  %v2985_v31 = vpop.f32.mrb[54].mxu1  ;;  %v9922_v35 = vsel %vm2695_vm14, %v2688_v41, %v9647_v42  ;;  %v10038_v4 = vld [vmem:[%s11309_s3 + $0x44] ss:$16 sps:$4 sm:$0xff]   ;;  %v10043_v5 = vld [vmem:[%s11309_s3 + $0x4c] ss:$16 sps:$4 sm:$0xff]  }
 0x364   :  { %v7143_v48 = vmul.f32 -1.442695, %v2988_v0  ;;  %v2945_v49 = vpop.f32.mrb[55].mxu0  ;;  %v2986_v33 = vpop.f32.mrb[55].mxu1  ;;  %v10019_v0 = vld [vmem:[%s11309_s3 + $0x2c] ss:$16 sps:$4 sm:$0xff]  }
 0x365   :  { %v7144_v34 = vmul.f32 -1.442695, %v2989_v19  ;;  %v7145_v24 = vmul.f32 -1.442695, %v2991_v25  ;;  %v10048_v7 = vld [vmem:[%s11309_s3 + $0x40] ss:$16 sps:$4 sm:$0xff]  }
 0x366   :  { %8152 = vpow2.f32 %v7143_v48  ;;  %v10053_v19 = vld [vmem:[%s11309_s3 + $0x48] ss:$16 sps:$4 sm:$0xff]   ;;  %v10062_v20 = vld [vmem:[%s11309_s3 + $0x64] ss:$16 sps:$4 sm:$0xff]   ;;  %v10067_v25 = vld [vmem:[%s11309_s3 + $0x6c] ss:$16 sps:$4 sm:$0xff]  }
 0x367   :  { %8154 = vpow2.f32 %v7144_v34  ;;  %v10072_v30 = vld [vmem:[%s11309_s3 + $0x60] ss:$16 sps:$4 sm:$0xff]   ;;  %v10077_v31 = vld [vmem:[%s11309_s3 + $0x68] ss:$16 sps:$4 sm:$0xff]   ;;  %v10086_v48 = vld [vmem:[%s11309_s3 + $0x84] ss:$16 sps:$4 sm:$0xff]  }
 0x368   :  { %8156 = vpow2.f32 %v7145_v24  ;;  %v10091_v49 = vld [vmem:[%s11309_s3 + $0x8c] ss:$16 sps:$4 sm:$0xff]   ;;  %v10096_v33 = vld [vmem:[%s11309_s3 + $0x80] ss:$16 sps:$4 sm:$0xff]   ;;  %v10101_v34 = vld [vmem:[%s11309_s3 + $0x88] ss:$16 sps:$4 sm:$0xff]  }
 0x369   :  { %8158 = vtanh.f32 %v2990_v2  ;;  %v10029_v2 = vld [vmem:[%s11309_s3 + $0x28] ss:$16 sps:$4 sm:$0xff]   ;;  %v10120_v24 = vld [vmem:[%s11309_s3 + $0xa0] ss:$16 sps:$4 sm:$0xff]  }
 0x36d   :  { %v8151_v13 = vpop.eup %8150 }
 0x36e   :  { %v9924_v10 = vmul.f32 %v8151_v13, %v8149_v54  ;;  %v10110_v54 = vld [vmem:[%s11309_s3 + $0xa4] ss:$16 sps:$4 sm:$0xff]   ;;  %v10115_v13 = vld [vmem:[%s11309_s3 + $0xac] ss:$16 sps:$4 sm:$0xff]  }
 0x370   :  { %11494 = vst [vmem:[#allocation60_spill] sm:$0xff] %v9924_v10  ;;  %v8153_v6 = vpop.eup %8152  ;;  %v9930_v55 = vsel %vm2695_vm14, %v9924_v10, %v9660_v29 }
 0x371   :  { %v8155_v42 = vpop.eup %8154  ;;  %v2995_v8 = vadd.f32 1.0, %v8153_v6  ;;  %v3038_v50 = vpack.c.bf16 %v9930_v55, %v9930_v55  ;;  %v10125_v6 = vld [vmem:[%s11309_s3 + $0xa8] ss:$16 sps:$4 sm:$0xff]  }
 0x372   :  { %v3001_v26 = vadd.f32 1.0, %v8155_v42  ;;  %v8157_v29 = vpop.eup %8156  ;;  %v10134_v42 = vld [vmem:[%s11309_s3 + $0xc4] ss:$16 sps:$4 sm:$0xff]  }
 0x373   :  { %8160 = vrcp.f32 %v2995_v8  ;;  %3264 = vmatmul.mubr.bf16.vlgmr.msra.gmra.mrb[56].mxu0 %v3038_v50  ;;  %3305 = vmatmul.mubr.bf16.vlgmr.msra.gmra.mrb[56].mxu1 %v3038_v50  ;;  %v10139_v8 = vld [vmem:[%s11309_s3 + $0xcc] ss:$16 sps:$4 sm:$0xff]   ;;  %v10144_v50 = vld [vmem:[%s11309_s3 + $0xc0] ss:$16 sps:$4 sm:$0xff]  }
 0x374   :  { %8162 = vrcp.f32 %v3001_v26  ;;  %3557 = vmatpush1.bf16.msra.mxu0 %v9665_v32  ;;  %3598 = vmatpush1.bf16.msra.mxu1 %v9670_v36  ;;  %v8159_v32 = vpop.eup %8158  ;;  %v10149_v26 = vld [vmem:[%s11309_s3 + $0xc8] ss:$16 sps:$4 sm:$0xff]  }
 0x375   :  { %3558 = vmatprep.subr.bf16.mxu0 %v9677_v9  ;;  %3599 = vmatprep.subr.bf16.mxu1 %v9682_v44  ;;  %v11495_v9 = vld [vmem:[#allocation64_spill] sm:$0xff] }
 0x376   :  { %3588 = vmatprep.mubr.bf16.mxu0 %v11461_v37  ;;  %3629 = vmatprep.mubr.bf16.mxu1 %v11461_v37 }
 0x378   :  { %3559 = vmatpush1.bf16.msra.mxu0 %v9689_v14  ;;  %3600 = vmatpush1.bf16.msra.mxu1 %v9694_v57  ;;  %v3008_v14 = vadd.f32 1.0, %v8157_v29  ;;  %v10158_v29 = vld [vmem:[%s11309_s3 + $0xe4] ss:$16 sps:$4 sm:$0xff]  }
 0x379   :  { %3560 = vmatprep.subr.bf16.mxu0 %v9701_v16  ;;  %3601 = vmatprep.subr.bf16.mxu1 %v9706_v58  ;;  %v9951_v16 = vpop.permute.xlu1 %3018 }
 0x37a   :  { %11496 = vst [vmem:[#allocation7_spill] sm:$0xff] %v9951_v16  ;;  %vm3020_vm15 = vcmp.eq.s32.totalorder %v9951_v16, 1  ;;  %8164 = vrcp.f32 %v3008_v14 }
 0x37c   :  { %3561 = vmatpush1.bf16.msra.mxu0 %v9715_v61  ;;  %3602 = vmatpush1.bf16.msra.mxu1 %v9720_v46  ;;  %v11497_v46 = vld [vmem:[#allocation66_spill] sm:$0xff] }
 0x37d   :  { %v8161_v36 = vpop.eup %8160  ;;  %3562 = vmatprep.subr.bf16.mxu0 %v9727_v43  ;;  %3603 = vmatprep.subr.bf16.mxu1 %v11495_v9  ;;  %v11498_v43 = vld [vmem:[#allocation67_spill] sm:$0xff]  ;;  %v10312_v47 = vpop.permute.xlu1 %3668 }
 0x37e   :  { %v8163_v44 = vpop.eup %8162  ;;  %v3012_v18 = vmul.f32 %v8161_v36, %v8159_v32  ;;  %v10163_v32 = vld [vmem:[%s11309_s3 + $0xec] ss:$16 sps:$4 sm:$0xff]   ;;  %v10168_v36 = vld [vmem:[%s11309_s3 + $0xe0] ss:$16 sps:$4 sm:$0xff]   ;;  %v10173_v9 = vld [vmem:[%s11309_s3 + $0xe8] ss:$16 sps:$4 sm:$0xff]  }
 0x37f   :  { %v3011_v57 = vmul.f32 %v8163_v44, %v9790_v17  ;;  %v10182_v44 = vld [vmem:[%s11310_s4 + $0x4] ss:$16 sps:$4 sm:$0xff]   ;;  %11519 = vst [vmem:[#allocation53_spill] sm:$0xff] %v10312_v47  ;;  %vm3670_vm11 = vcmp.eq.s32.totalorder %v10312_v47, 1 }
 0x380   :  { %3563 = vmatpush1.bf16.msra.mxu0 %v9739_v52  ;;  %3604 = vmatpush1.bf16.msra.mxu1 %v9744_v12  ;;  %v11499_v52 = vld [vmem:[#allocation68_spill] sm:$0xff]  ;;  %v11500_v12 = vld [vmem:[#allocation69_spill] sm:$0xff]  ;;  %vm7575_vm8 = vmpackc.low %vm3020_vm15, %vm3670_vm11 }
 0x381   :  { %v3013_v58 = vadd.f32 %v3012_v18, %v3011_v57  ;;  %3564 = vmatprep.subr.bf16.mxu0 %v9751_v3  ;;  %3605 = vmatprep.subr.bf16.mxu1 %v9756_v51  ;;  %v11501_v3 = vld [vmem:[#allocation70_spill] sm:$0xff]  ;;  %v11502_v51 = vld [vmem:[#allocation71_spill] sm:$0xff] }
 0x382   :  { %v10187_v18 = vld [vmem:[%s11310_s4 + $0xc] ss:$16 sps:$4 sm:$0xff]  }
 0x383   :  { %8166 = vtanh.f32 %v3013_v58  ;;  %v9959_v61 = vsel %vm3020_vm15, %v3013_v58, %v9790_v17  ;;  %v11505_v17 = vld [vmem:[#allocation74_spill] sm:$0xff]  ;;  %v11508_v58 = vld [vmem:[#allocation11_spill] sm:$0xff] }
 0x384   :  { %3565 = vmatpush1.bf16.msra.mxu0 %v9768_v38  ;;  %3606 = vmatpush1.bf16.msra.mxu1 %v11497_v46  ;;  %v8165_v53 = vpop.eup %8164 }
 0x385   :  { %3566 = vmatprep.subr.bf16.mxu0 %v11498_v43  ;;  %3607 = vmatprep.subr.bf16.mxu1 %v11499_v52  ;;  %v11509_v43 = vld [vmem:[#allocation13_spill] sm:$0xff] }
 0x388   :  { %3567 = vmatpush1.bf16.msra.mxu0 %v11500_v12  ;;  %3608 = vmatpush1.bf16.msra.mxu1 %v11501_v3 }
 0x389   :  { %3568 = vmatprep.subr.bf16.mxu0 %v11502_v51  ;;  %3609 = vmatprep.subr.bf16.mxu1 %v11503_v11  ;;  %v11510_v51 = vld [vmem:[#allocation12_spill] sm:$0xff] }
 0x38c   :  { %3569 = vmatpush1.bf16.msra.mxu0 %v11504_v27  ;;  %3610 = vmatpush1.bf16.msra.mxu1 %v11505_v17 }
 0x38d   :  { %v8167_v38 = vpop.eup %8166  ;;  %3570 = vmatprep.subr.bf16.mxu0 %v9833_v40  ;;  %3611 = vmatprep.subr.bf16.mxu1 %v11506_v45  ;;  %v9990_v40 = vld [vmem:[%s11309_s3 + $0x4] ss:$16 sps:$4 sm:$0xff]  }
 0x38e   :  { %v9973_v41 = vmul.f32 %v8167_v38, %v8165_v53  ;;  %v11511_v53 = vld [vmem:[#allocation14_spill] sm:$0xff] }
 0x390   :  { %11507 = vst [vmem:[#allocation9_spill] sm:$0xff] %v9973_v41  ;;  %3571 = vmatpush1.bf16.msra.mxu0 %v9845_v39  ;;  %3612 = vmatpush1.bf16.msra.mxu1 %v9850_v28  ;;  %v9981_v23 = vsel %vm3020_vm15, %v9973_v41, %v9867_v15  ;;  %v9995_v39 = vld [vmem:[%s11309_s3 + $0xc] ss:$16 sps:$4 sm:$0xff]   ;;  %v10000_v28 = vld [vmem:[%s11309_s3] ss:$16 sps:$4 sm:$0xff]  }
 0x391   :  { %v3363_v62 = vpack.c.bf16 %v9981_v23, %v9981_v23  ;;  %v10005_v15 = vld [vmem:[%s11309_s3 + $0x8] ss:$16 sps:$4 sm:$0xff]   ;;  %3880 = vmatprep.subr.bf16.mxu0 %v9990_v40  ;;  %3921 = vmatprep.subr.bf16.mxu1 %v9995_v39 }
 0x393   :  { %3589 = vmatmul.mubr.bf16.vlgmr.msra.gmra.mrb[60].mxu0 %v3363_v62  ;;  %3630 = vmatmul.mubr.bf16.vlgmr.msra.gmra.mrb[60].mxu1 %v3363_v62 }
 0x394   :  { %3912 = vmatprep.mubr.bf16.mxu0 %v11461_v37  ;;  %3953 = vmatprep.mubr.bf16.mxu1 %v11461_v37 }
 0x395   :  { %3881 = vmatpush1.bf16.msra.mxu0 %v10000_v28  ;;  %3922 = vmatpush1.bf16.msra.mxu1 %v10005_v15 }
 0x396   :  { %3882 = vmatprep.subr.bf16.mxu0 %v10014_v63  ;;  %3923 = vmatprep.subr.bf16.mxu1 %v10019_v0 }
 0x399   :  { %3883 = vmatpush1.bf16.msra.mxu0 %v10024_v1  ;;  %3924 = vmatpush1.bf16.msra.mxu1 %v10029_v2 }
 0x39a   :  { %3884 = vmatprep.subr.bf16.mxu0 %v10038_v4  ;;  %3925 = vmatprep.subr.bf16.mxu1 %v10043_v5 }
 0x39d   :  { %3885 = vmatpush1.bf16.msra.mxu0 %v10048_v7  ;;  %3926 = vmatpush1.bf16.msra.mxu1 %v10053_v19 }
 0x39e   :  { %3886 = vmatprep.subr.bf16.mxu0 %v10062_v20  ;;  %3927 = vmatprep.subr.bf16.mxu1 %v10067_v25 }
 0x3a1   :  { %3887 = vmatpush1.bf16.msra.mxu0 %v10072_v30  ;;  %3928 = vmatpush1.bf16.msra.mxu1 %v10077_v31 }
 0x3a2   :  { %3888 = vmatprep.subr.bf16.mxu0 %v10086_v48  ;;  %3929 = vmatprep.subr.bf16.mxu1 %v10091_v49 }
 0x3a5   :  { %3889 = vmatpush1.bf16.msra.mxu0 %v10096_v33  ;;  %3930 = vmatpush1.bf16.msra.mxu1 %v10101_v34 }
 0x3a6   :  { %3890 = vmatprep.subr.bf16.mxu0 %v10110_v54  ;;  %3931 = vmatprep.subr.bf16.mxu1 %v10115_v13 }
 0x3a9   :  { %3891 = vmatpush1.bf16.msra.mxu0 %v10120_v24  ;;  %3932 = vmatpush1.bf16.msra.mxu1 %v10125_v6 }
 0x3aa   :  { %3892 = vmatprep.subr.bf16.mxu0 %v10134_v42  ;;  %3933 = vmatprep.subr.bf16.mxu1 %v10139_v8 }
 0x3ad   :  { %3893 = vmatpush1.bf16.msra.mxu0 %v10144_v50  ;;  %3934 = vmatpush1.bf16.msra.mxu1 %v10149_v26 }
 0x3ae   :  { %3894 = vmatprep.subr.bf16.mxu0 %v10158_v29  ;;  %3935 = vmatprep.subr.bf16.mxu1 %v10163_v32 }
 0x3b1   :  { %3895 = vmatpush1.bf16.msra.mxu0 %v10168_v36  ;;  %3936 = vmatpush1.bf16.msra.mxu1 %v10173_v9 }
 0x3b2   :  { %4199 = vmatprep.subr.bf16.mxu0 %v10182_v44  ;;  %4240 = vmatprep.subr.bf16.mxu1 %v10187_v18 }
 0x446   :  { %v3265_v14 = vpop.f32.mrb[56].mxu0  ;;  %v3306_v57 = vpop.f32.mrb[56].mxu1 }
 0x447   :  { %v3313_v46 = vadd.f32 %v3265_v14, %v11508_v58  ;;  %v3315_v52 = vadd.f32 %v3306_v57, %v11509_v43  ;;  %v3267_v12 = vpop.f32.mrb[57].mxu0  ;;  %v3308_v3 = vpop.f32.mrb[57].mxu1 }
 0x448   :  { %v3314_v11 = vadd.f32 %v3267_v12, %v11510_v51  ;;  %v3316_v27 = vadd.f32 %v3308_v3, %v11511_v53  ;;  %v3269_v17 = vpop.f32.mrb[58].mxu0  ;;  %v3310_v38 = vpop.f32.mrb[58].mxu1 }
 0x449   :  { %v7178_v45 = vmul.f32 -1.442695, %v3313_v46  ;;  %v3270_v62 = vpop.f32.mrb[59].mxu0  ;;  %v3311_v56 = vpop.f32.mrb[59].mxu1 }
 0x44a   :  { %v7179_v59 = vmul.f32 -1.442695, %v3314_v11  ;;  %v7180_v60 = vmul.f32 -1.442695, %v3316_v27  ;;  %v10195_v53 = vpop.permute.xlu0 %3343 }
 0x44b   :  { %8168 = vpow2.f32 %v7178_v45  ;;  %11512 = vst [vmem:[#allocation8_spill] sm:$0xff] %v10195_v53  ;;  %vm3345_vm9 = vcmp.eq.s32.totalorder %v10195_v53, 1  ;;  %v11515_v45 = vld [vmem:[#allocation48_spill] sm:$0xff] }
 0x44c   :  { %8170 = vpow2.f32 %v7179_v59  ;;  %v10320_v53 = vld [vmem:[%s11310_s4 + $0x80] ss:$16 sps:$4 sm:$0xff]   ;;  %vm7569_vm4 = vmpackc.low %vm3345_vm9, %vm2695_vm14 }
 0x44d   :  { %8172 = vpow2.f32 %v7180_v60  ;;  %v11513_v60 = vld [vmem:[#allocation47_spill] sm:$0xff]  ;;  %11520 = vst [vmem:[#allocation52_spill] sm:$0xff] %v10320_v53 }
 0x44e   :  { %8174 = vtanh.f32 %v3315_v52 }
 0x455   :  { %v8169_v22 = vpop.eup %8168 }
 0x456   :  { %v8171_v41 = vpop.eup %8170  ;;  %v3320_v14 = vadd.f32 1.0, %v8169_v22 }
 0x457   :  { %v3326_v57 = vadd.f32 1.0, %v8171_v41  ;;  %v8173_v58 = vpop.eup %8172  ;;  %v11514_v41 = vld [vmem:[#allocation49_spill] sm:$0xff] }
 0x458   :  { %8176 = vrcp.f32 %v3320_v14  ;;  %v8175_v43 = vpop.eup %8174  ;;  %v3333_v46 = vadd.f32 1.0, %v8173_v58  ;;  %v11516_v14 = vld [vmem:[#allocation50_spill] sm:$0xff] }
 0x459   :  { %8178 = vrcp.f32 %v3326_v57 }
 0x45a   :  { %8180 = vrcp.f32 %v3333_v46 }
 0x462   :  { %v8177_v12 = vpop.eup %8176 }
 0x463   :  { %v8179_v3 = vpop.eup %8178  ;;  %v3337_v51 = vmul.f32 %v8177_v12, %v8175_v43 }
 0x464   :  { %v3336_v56 = vmul.f32 %v8179_v3, %v9922_v35 }
 0x466   :  { %v3338_v59 = vadd.f32 %v3337_v51, %v3336_v56  ;;  %v3590_v11 = vpop.f32.mrb[60].mxu0  ;;  %v3631_v27 = vpop.f32.mrb[60].mxu1 }
 0x467   :  { %v3638_v22 = vadd.f32 %v3590_v11, %v11513_v60  ;;  %v3640_v52 = vadd.f32 %v3631_v27, %v11514_v41  ;;  %v3592_v17 = vpop.f32.mrb[61].mxu0  ;;  %v3633_v38 = vpop.f32.mrb[61].mxu1 }
 0x468   :  { %8182 = vtanh.f32 %v3338_v59  ;;  %v3639_v62 = vadd.f32 %v3592_v17, %v11515_v45  ;;  %v3641_v57 = vadd.f32 %v3633_v38, %v11516_v14  ;;  %v3594_v58 = vpop.f32.mrb[62].mxu0  ;;  %v3635_v43 = vpop.f32.mrb[62].mxu1  ;;  %v10206_v12 = vsel %vm3345_vm9, %v3338_v59, %v9922_v35  ;;  %v10219_v35 = vld [vmem:[%s11310_s4] ss:$16 sps:$4 sm:$0xff]   ;;  %v10224_v59 = vld [vmem:[%s11310_s4 + $0x8] ss:$16 sps:$4 sm:$0xff]  }
 0x469   :  { %v7213_v3 = vmul.f32 -1.442695, %v3638_v22  ;;  %v3595_v51 = vpop.f32.mrb[63].mxu0  ;;  %v3636_v46 = vpop.f32.mrb[63].mxu1  ;;  %v10236_v14 = vld [vmem:[%s11310_s4 + $0x2c] ss:$16 sps:$4 sm:$0xff]  }
 0x46a   :  { %v7214_v56 = vmul.f32 -1.442695, %v3639_v62  ;;  %v8181_v11 = vpop.eup %8180  ;;  %v7215_v60 = vmul.f32 -1.442695, %v3641_v57  ;;  %v10243_v58 = vld [vmem:[%s11310_s4 + $0x20] ss:$16 sps:$4 sm:$0xff]  }
 0x46b   :  { %8184 = vpow2.f32 %v7213_v3  ;;  %v10248_v43 = vld [vmem:[%s11310_s4 + $0x28] ss:$16 sps:$4 sm:$0xff]   ;;  %v10260_v3 = vld [vmem:[%s11310_s4 + $0x4c] ss:$16 sps:$4 sm:$0xff]   ;;  %v10269_v51 = vld [vmem:[%s11310_s4 + $0x40] ss:$16 sps:$4 sm:$0xff]  }
 0x46c   :  { %8186 = vpow2.f32 %v7214_v56  ;;  %v10274_v46 = vld [vmem:[%s11310_s4 + $0x48] ss:$16 sps:$4 sm:$0xff]   ;;  %v10281_v56 = vld [vmem:[%s11310_s4 + $0x64] ss:$16 sps:$4 sm:$0xff]  }
 0x46d   :  { %8188 = vpow2.f32 %v7215_v60 }
 0x46e   :  { %8190 = vtanh.f32 %v3640_v52  ;;  %v10255_v52 = vld [vmem:[%s11310_s4 + $0x44] ss:$16 sps:$4 sm:$0xff]  }
 0x472   :  { %v8183_v27 = vpop.eup %8182 }
 0x473   :  { %v10208_v41 = vmul.f32 %v8183_v27, %v8181_v11  ;;  %v10286_v11 = vld [vmem:[%s11310_s4 + $0x6c] ss:$16 sps:$4 sm:$0xff]  }
 0x474   :  { %11518 = vst [vmem:[#allocation51_spill] sm:$0xff] %v10286_v11 }
 0x475   :  { %11517 = vst [vmem:[#allocation10_spill] sm:$0xff] %v10208_v41  ;;  %v8185_v17 = vpop.eup %8184  ;;  %v10214_v38 = vsel %vm3345_vm9, %v10208_v41, %v9930_v55  ;;  %v10231_v55 = vld [vmem:[%s11310_s4 + $0x24] ss:$16 sps:$4 sm:$0xff]  }
 0x476   :  { %v8187_v22 = vpop.eup %8186  ;;  %v3645_v45 = vadd.f32 1.0, %v8185_v17  ;;  %v3687_v62 = vpack.c.bf16 %v10214_v38, %v10214_v38  ;;  %v10293_v17 = vld [vmem:[%s11310_s4 + $0x60] ss:$16 sps:$4 sm:$0xff]  }
 0x477   :  { %v3651_v57 = vadd.f32 1.0, %v8187_v22  ;;  %v8189_v27 = vpop.eup %8188  ;;  %v10298_v22 = vld [vmem:[%s11310_s4 + $0x68] ss:$16 sps:$4 sm:$0xff]  }
 0x478   :  { %8192 = vrcp.f32 %v3645_v45  ;;  %3913 = vmatmul.mubr.bf16.vlgmr.msra.gmra.mrb[64].mxu0 %v3687_v62  ;;  %3954 = vmatmul.mubr.bf16.vlgmr.msra.gmra.mrb[64].mxu1 %v3687_v62  ;;  %v8191_v60 = vpop.eup %8190  ;;  %v10305_v62 = vld [vmem:[%s11310_s4 + $0x84] ss:$16 sps:$4 sm:$0xff]   ;;  %v3658_v21 = vadd.f32 1.0, %v8189_v27  ;;  %v10337_v27 = vld [vmem:[%s11310_s4 + $0xac] ss:$16 sps:$4 sm:$0xff]  }
 0x479   :  { %8194 = vrcp.f32 %v3651_v57  ;;  %4200 = vmatpush1.bf16.msra.mxu0 %v10219_v35  ;;  %4241 = vmatpush1.bf16.msra.mxu1 %v10224_v59  ;;  %v10310_v57 = vld [vmem:[%s11310_s4 + $0x8c] ss:$16 sps:$4 sm:$0xff]   ;;  %11523 = vst [vmem:[#allocation66_spill] sm:$0xff] %v10337_v27 }
 0x47a   :  { %4201 = vmatprep.subr.bf16.mxu0 %v10231_v55  ;;  %4242 = vmatprep.subr.bf16.mxu1 %v10236_v14  ;;  %8196 = vrcp.f32 %v3658_v21  ;;  %v10362_v21 = vld [vmem:[%s11310_s4 + $0xc4] ss:$16 sps:$4 sm:$0xff]  }
 0x47b   :  { %4231 = vmatprep.mubr.bf16.mxu0 %v11461_v37  ;;  %4272 = vmatprep.mubr.bf16.mxu1 %v11461_v37  ;;  %11526 = vst [vmem:[#allocation69_spill] sm:$0xff] %v10362_v21 }
 0x47d   :  { %4202 = vmatpush1.bf16.msra.mxu0 %v10243_v58  ;;  %4243 = vmatpush1.bf16.msra.mxu1 %v10248_v43 }
 0x47e   :  { %4203 = vmatprep.subr.bf16.mxu0 %v10255_v52  ;;  %4244 = vmatprep.subr.bf16.mxu1 %v10260_v3 }
 0x481   :  { %4204 = vmatpush1.bf16.msra.mxu0 %v10269_v51  ;;  %4245 = vmatpush1.bf16.msra.mxu1 %v10274_v46 }
 0x482   :  { %v8193_v45 = vpop.eup %8192  ;;  %4205 = vmatprep.subr.bf16.mxu0 %v10281_v56  ;;  %4246 = vmatprep.subr.bf16.mxu1 %v10286_v11  ;;  %v10325_v11 = vld [vmem:[%s11310_s4 + $0x88] ss:$16 sps:$4 sm:$0xff]  }
 0x483   :  { %v8195_v41 = vpop.eup %8194  ;;  %v3662_v10 = vmul.f32 %v8193_v45, %v8191_v60  ;;  %11521 = vst [vmem:[#allocation54_spill] sm:$0xff] %v10325_v11  ;;  %v10355_v45 = vld [vmem:[%s11310_s4 + $0xa8] ss:$16 sps:$4 sm:$0xff]  }
 0x484   :  { %v3661_v16 = vmul.f32 %v8195_v41, %v9959_v61  ;;  %v10332_v41 = vld [vmem:[%s11310_s4 + $0xa4] ss:$16 sps:$4 sm:$0xff]   ;;  %11525 = vst [vmem:[#allocation68_spill] sm:$0xff] %v10355_v45 }
 0x485   :  { %4206 = vmatpush1.bf16.msra.mxu0 %v10293_v17  ;;  %4247 = vmatpush1.bf16.msra.mxu1 %v10298_v22  ;;  %11522 = vst [vmem:[#allocation64_spill] sm:$0xff] %v10332_v41 }
 0x486   :  { %v3663_v60 = vadd.f32 %v3662_v10, %v3661_v16  ;;  %4207 = vmatprep.subr.bf16.mxu0 %v10305_v62  ;;  %4248 = vmatprep.subr.bf16.mxu1 %v10310_v57  ;;  %v10350_v16 = vld [vmem:[%s11310_s4 + $0xa0] ss:$16 sps:$4 sm:$0xff]  }
 0x487   :  { %11524 = vst [vmem:[#allocation67_spill] sm:$0xff] %v10350_v16 }
 0x488   :  { %8198 = vtanh.f32 %v3663_v60  ;;  %v10343_v10 = vsel %vm3670_vm11, %v3663_v60, %v9959_v61  ;;  %v10367_v61 = vld [vmem:[%s11310_s4 + $0xcc] ss:$16 sps:$4 sm:$0xff]   ;;  %v10374_v60 = vld [vmem:[%s11310_s4 + $0xc0] ss:$16 sps:$4 sm:$0xff]  }
 0x489   :  { %4208 = vmatpush1.bf16.msra.mxu0 %v10320_v53  ;;  %4249 = vmatpush1.bf16.msra.mxu1 %v10325_v11  ;;  %11527 = vst [vmem:[#allocation70_spill] sm:$0xff] %v10367_v61  ;;  %11528 = vst [vmem:[#allocation71_spill] sm:$0xff] %v10374_v60 }
 0x48a   :  { %4209 = vmatprep.subr.bf16.mxu0 %v10332_v41  ;;  %4250 = vmatprep.subr.bf16.mxu1 %v10337_v27  ;;  %v10379_v27 = vld [vmem:[%s11310_s4 + $0xc8] ss:$16 sps:$4 sm:$0xff]   ;;  %v8197_v41 = vpop.eup %8196 }
 0x48b   :  { %11529 = vst [vmem:[#allocation72_spill] sm:$0xff] %v10379_v27 }
 0x48d   :  { %4210 = vmatpush1.bf16.msra.mxu0 %v10350_v16  ;;  %4251 = vmatpush1.bf16.msra.mxu1 %v10355_v45  ;;  %v10386_v16 = vld [vmem:[%s11310_s4 + $0xe4] ss:$16 sps:$4 sm:$0xff]   ;;  %v10391_v45 = vld [vmem:[%s11310_s4 + $0xec] ss:$16 sps:$4 sm:$0xff]  }
 0x48e   :  { %4211 = vmatprep.subr.bf16.mxu0 %v10362_v21  ;;  %4252 = vmatprep.subr.bf16.mxu1 %v10367_v61  ;;  %v10398_v21 = vld [vmem:[%s11310_s4 + $0xe0] ss:$16 sps:$4 sm:$0xff]   ;;  %v10403_v61 = vld [vmem:[%s11310_s4 + $0xe8] ss:$16 sps:$4 sm:$0xff]  }
 0x491   :  { %4212 = vmatpush1.bf16.msra.mxu0 %v10374_v60  ;;  %4253 = vmatpush1.bf16.msra.mxu1 %v10379_v27 }
 0x492   :  { %v8199_v11 = vpop.eup %8198  ;;  %4213 = vmatprep.subr.bf16.mxu0 %v10386_v16  ;;  %4254 = vmatprep.subr.bf16.mxu1 %v10391_v45 }
 0x493   :  { %v10407_v53 = vmul.f32 %v8199_v11, %v8197_v41  ;;  %v11536_v11 = vld [vmem:[#allocation45_spill] sm:$0xff] }
 0x495   :  { %11530 = vst [vmem:[#allocation73_spill] sm:$0xff] %v10407_v53  ;;  %4214 = vmatpush1.bf16.msra.mxu0 %v10398_v21  ;;  %4255 = vmatpush1.bf16.msra.mxu1 %v10403_v61  ;;  %v10415_v27 = vsel %vm3670_vm11, %v10407_v53, %v9981_v23 }
 0x496   :  { %v4006_v60 = vpack.c.bf16 %v10415_v27, %v10415_v27  ;;  %4518 = vmatprep.subr.bf16.mxu0 %v9990_v40  ;;  %4559 = vmatprep.subr.bf16.mxu1 %v9995_v39  ;;  %v11531_v39 = vld [vmem:[#allocation15_spill] sm:$0xff] }
 0x498   :  { %4232 = vmatmul.mubr.bf16.vlgmr.msra.gmra.mrb[68].mxu0 %v4006_v60  ;;  %4273 = vmatmul.mubr.bf16.vlgmr.msra.gmra.mrb[68].mxu1 %v4006_v60 }
 0x499   :  { %4519 = vmatpush1.bf16.msra.mxu0 %v10000_v28  ;;  %4560 = vmatpush1.bf16.msra.mxu1 %v10005_v15  ;;  %v11532_v15 = vld [vmem:[#allocation17_spill] sm:$0xff] }
 0x49a   :  { %4520 = vmatprep.subr.bf16.mxu0 %v10014_v63  ;;  %4561 = vmatprep.subr.bf16.mxu1 %v10019_v0 }
 0x49b   :  { %4550 = vmatprep.mubr.bf16.mxu0 %v11461_v37  ;;  %4591 = vmatprep.mubr.bf16.mxu1 %v11461_v37 }
 0x49d   :  { %4521 = vmatpush1.bf16.msra.mxu0 %v10024_v1  ;;  %4562 = vmatpush1.bf16.msra.mxu1 %v10029_v2  ;;  %v11533_v2 = vld [vmem:[#allocation16_spill] sm:$0xff] }
 0x49e   :  { %4522 = vmatprep.subr.bf16.mxu0 %v10038_v4  ;;  %4563 = vmatprep.subr.bf16.mxu1 %v10043_v5  ;;  %v11534_v5 = vld [vmem:[#allocation18_spill] sm:$0xff] }
 0x4a1   :  { %4523 = vmatpush1.bf16.msra.mxu0 %v10048_v7  ;;  %4564 = vmatpush1.bf16.msra.mxu1 %v10053_v19 }
 0x4a2   :  { %4524 = vmatprep.subr.bf16.mxu0 %v10062_v20  ;;  %4565 = vmatprep.subr.bf16.mxu1 %v10067_v25 }
 0x4a5   :  { %4525 = vmatpush1.bf16.msra.mxu0 %v10072_v30  ;;  %4566 = vmatpush1.bf16.msra.mxu1 %v10077_v31 }
 0x4a6   :  { %4526 = vmatprep.subr.bf16.mxu0 %v10086_v48  ;;  %4567 = vmatprep.subr.bf16.mxu1 %v10091_v49 }
 0x4a9   :  { %4527 = vmatpush1.bf16.msra.mxu0 %v10096_v33  ;;  %4568 = vmatpush1.bf16.msra.mxu1 %v10101_v34 }
 0x4aa   :  { %4528 = vmatprep.subr.bf16.mxu0 %v10110_v54  ;;  %4569 = vmatprep.subr.bf16.mxu1 %v10115_v13 }
 0x4ad   :  { %4529 = vmatpush1.bf16.msra.mxu0 %v10120_v24  ;;  %4570 = vmatpush1.bf16.msra.mxu1 %v10125_v6 }
 0x4ae   :  { %4530 = vmatprep.subr.bf16.mxu0 %v10134_v42  ;;  %4571 = vmatprep.subr.bf16.mxu1 %v10139_v8 }
 0x4b1   :  { %4531 = vmatpush1.bf16.msra.mxu0 %v10144_v50  ;;  %4572 = vmatpush1.bf16.msra.mxu1 %v10149_v26 }
 0x4b2   :  { %4532 = vmatprep.subr.bf16.mxu0 %v10158_v29  ;;  %4573 = vmatprep.subr.bf16.mxu1 %v10163_v32 }
 0x4b5   :  { %4533 = vmatpush1.bf16.msra.mxu0 %v10168_v36  ;;  %4574 = vmatpush1.bf16.msra.mxu1 %v10173_v9 }
 0x4b6   :  { %4837 = vmatprep.subr.bf16.mxu0 %v10182_v44  ;;  %4878 = vmatprep.subr.bf16.mxu1 %v10187_v18  ;;  %v11535_v44 = vld [vmem:[#allocation43_spill] sm:$0xff] }
 0x54b   :  { %v3914_v23 = vpop.f32.mrb[64].mxu0  ;;  %v3955_v40 = vpop.f32.mrb[64].mxu1 }
 0x54c   :  { %v3962_v28 = vadd.f32 %v3914_v23, %v11531_v39  ;;  %v3964_v63 = vadd.f32 %v3955_v40, %v11532_v15  ;;  %v3916_v0 = vpop.f32.mrb[65].mxu0  ;;  %v3957_v1 = vpop.f32.mrb[65].mxu1  ;;  %v11537_v40 = vld [vmem:[#allocation44_spill] sm:$0xff] }
 0x54d   :  { %v3963_v4 = vadd.f32 %v3916_v0, %v11533_v2  ;;  %v3965_v7 = vadd.f32 %v3957_v1, %v11534_v5  ;;  %v3918_v19 = vpop.f32.mrb[66].mxu0  ;;  %v3959_v20 = vpop.f32.mrb[66].mxu1 }
 0x54e   :  { %v7248_v25 = vmul.f32 -1.442695, %v3962_v28  ;;  %v3919_v30 = vpop.f32.mrb[67].mxu0  ;;  %v3960_v31 = vpop.f32.mrb[67].mxu1  ;;  %v11538_v28 = vld [vmem:[#allocation46_spill] sm:$0xff] }
 0x54f   :  { %v7249_v48 = vmul.f32 -1.442695, %v3963_v4  ;;  %v7250_v49 = vmul.f32 -1.442695, %v3965_v7 }
 0x550   :  { %8200 = vpow2.f32 %v7248_v25 }
 0x551   :  { %8202 = vpow2.f32 %v7249_v48 }
 0x552   :  { %8204 = vpow2.f32 %v7250_v49 }
 0x553   :  { %8206 = vtanh.f32 %v3964_v63 }
 0x55a   :  { %v8201_v33 = vpop.eup %8200 }
 0x55b   :  { %v8203_v34 = vpop.eup %8202  ;;  %v3969_v54 = vadd.f32 1.0, %v8201_v33 }
 0x55c   :  { %v3975_v13 = vadd.f32 1.0, %v8203_v34  ;;  %v8205_v24 = vpop.eup %8204 }
 0x55d   :  { %8208 = vrcp.f32 %v3969_v54  ;;  %v8207_v6 = vpop.eup %8206  ;;  %v3982_v26 = vadd.f32 1.0, %v8205_v24  ;;  %v11549_v24 = vld [vmem:[#allocation70_spill] sm:$0xff] }
 0x55e   :  { %8210 = vrcp.f32 %v3975_v13  ;;  %v11544_v13 = vld [vmem:[#allocation64_spill] sm:$0xff] }
 0x55f   :  { %8212 = vrcp.f32 %v3982_v26 }
 0x567   :  { %v8209_v42 = vpop.eup %8208 }
 0x568   :  { %v8211_v8 = vpop.eup %8210  ;;  %v3986_v50 = vmul.f32 %v8209_v42, %v8207_v6  ;;  %v11550_v42 = vld [vmem:[#allocation71_spill] sm:$0xff] }
 0x569   :  { %v3985_v29 = vmul.f32 %v8211_v8, %v10206_v12  ;;  %v8213_v19 = vpop.eup %8212 }
 0x56b   :  { %v3987_v32 = vadd.f32 %v3986_v50, %v3985_v29  ;;  %v4233_v36 = vpop.f32.mrb[68].mxu0  ;;  %v4274_v9 = vpop.f32.mrb[68].mxu1 }
 0x56c   :  { %v4281_v18 = vadd.f32 %v4233_v36, %v11535_v44  ;;  %v4283_v41 = vadd.f32 %v4274_v9, %v11536_v11  ;;  %v4235_v60 = vpop.f32.mrb[69].mxu0  ;;  %v4276_v23 = vpop.f32.mrb[69].mxu1  ;;  %v10566_v36 = vld [vmem:[%s11309_s3 + $0x20] ss:$16 sps:$4 sm:$0xff]   ;;  %v10571_v9 = vld [vmem:[%s11309_s3 + $0x28] ss:$16 sps:$4 sm:$0xff]  }
 0x56d   :  { %8214 = vtanh.f32 %v3987_v32  ;;  %v4282_v39 = vadd.f32 %v4235_v60, %v11537_v40  ;;  %v4284_v15 = vadd.f32 %v4276_v23, %v11538_v28  ;;  %v4237_v63 = vpop.f32.mrb[70].mxu0  ;;  %v4278_v0 = vpop.f32.mrb[70].mxu1  ;;  %v10467_v1 = vsel %vm3670_vm11, %v3987_v32, %v10206_v12  ;;  %v10561_v32 = vld [vmem:[%s11309_s3 + $0x2c] ss:$16 sps:$4 sm:$0xff]   ;;  %v10580_v44 = vld [vmem:[%s11309_s3 + $0x44] ss:$16 sps:$4 sm:$0xff]  }
 0x56e   :  { %v7283_v2 = vmul.f32 -1.442695, %v4281_v18  ;;  %v4238_v4 = vpop.f32.mrb[71].mxu0  ;;  %v4279_v5 = vpop.f32.mrb[71].mxu1  ;;  %v10585_v18 = vld [vmem:[%s11309_s3 + $0x4c] ss:$16 sps:$4 sm:$0xff]  }
 0x56f   :  { %v7284_v7 = vmul.f32 -1.442695, %v4282_v39  ;;  %v7285_v25 = vmul.f32 -1.442695, %v4284_v15  ;;  %v10590_v11 = vld [vmem:[%s11309_s3 + $0x40] ss:$16 sps:$4 sm:$0xff]  }
 0x570   :  { %8216 = vpow2.f32 %v7283_v2  ;;  %v10604_v60 = vld [vmem:[%s11309_s3 + $0x64] ss:$16 sps:$4 sm:$0xff]   ;;  %v10609_v23 = vld [vmem:[%s11309_s3 + $0x6c] ss:$16 sps:$4 sm:$0xff]   ;;  %v10614_v40 = vld [vmem:[%s11309_s3 + $0x60] ss:$16 sps:$4 sm:$0xff]  }
 0x571   :  { %8218 = vpow2.f32 %v7284_v7  ;;  %v10619_v39 = vld [vmem:[%s11309_s3 + $0x68] ss:$16 sps:$4 sm:$0xff]   ;;  %v10628_v28 = vld [vmem:[%s11309_s3 + $0x84] ss:$16 sps:$4 sm:$0xff]   ;;  %v10633_v15 = vld [vmem:[%s11309_s3 + $0x8c] ss:$16 sps:$4 sm:$0xff]  }
 0x572   :  { %8220 = vpow2.f32 %v7285_v25  ;;  %v10638_v63 = vld [vmem:[%s11309_s3 + $0x80] ss:$16 sps:$4 sm:$0xff]   ;;  %v10643_v0 = vld [vmem:[%s11309_s3 + $0x88] ss:$16 sps:$4 sm:$0xff]   ;;  %v10652_v2 = vld [vmem:[%s11309_s3 + $0xa4] ss:$16 sps:$4 sm:$0xff]  }
 0x573   :  { %8222 = vtanh.f32 %v4283_v41  ;;  %v10595_v41 = vld [vmem:[%s11309_s3 + $0x48] ss:$16 sps:$4 sm:$0xff]   ;;  %v10657_v4 = vld [vmem:[%s11309_s3 + $0xac] ss:$16 sps:$4 sm:$0xff]   ;;  %v10662_v5 = vld [vmem:[%s11309_s3 + $0xa0] ss:$16 sps:$4 sm:$0xff]  }
 0x574   :  { %v10667_v7 = vld [vmem:[%s11309_s3 + $0xa8] ss:$16 sps:$4 sm:$0xff]   ;;  %v10686_v25 = vld [vmem:[%s11309_s3 + $0xc0] ss:$16 sps:$4 sm:$0xff]  }
 0x577   :  { %v8215_v20 = vpop.eup %8214 }
 0x578   :  { %v10469_v30 = vmul.f32 %v8215_v20, %v8213_v19  ;;  %v10676_v19 = vld [vmem:[%s11309_s3 + $0xc4] ss:$16 sps:$4 sm:$0xff]   ;;  %v10681_v20 = vld [vmem:[%s11309_s3 + $0xcc] ss:$16 sps:$4 sm:$0xff]  }
 0x57a   :  { %11539 = vst [vmem:[#allocation74_spill] sm:$0xff] %v10469_v30  ;;  %v8217_v31 = vpop.eup %8216  ;;  %v10475_v48 = vsel %vm3670_vm11, %v10469_v30, %v10214_v38 }
 0x57b   :  { %v8219_v12 = vpop.eup %8218  ;;  %v4288_v49 = vadd.f32 1.0, %v8217_v31  ;;  %v4325_v33 = vpack.c.bf16 %v10475_v48, %v10475_v48  ;;  %v10691_v31 = vld [vmem:[%s11309_s3 + $0xc8] ss:$16 sps:$4 sm:$0xff]  }
 0x57c   :  { %v4294_v34 = vadd.f32 1.0, %v8219_v12  ;;  %v8221_v38 = vpop.eup %8220  ;;  %v10700_v12 = vld [vmem:[%s11309_s3 + $0xe4] ss:$16 sps:$4 sm:$0xff]  }
 0x57d   :  { %8224 = vrcp.f32 %v4288_v49  ;;  %4551 = vmatmul.mubr.bf16.vlgmr.msra.gmra.mrb[72].mxu0 %v4325_v33  ;;  %4592 = vmatmul.mubr.bf16.vlgmr.msra.gmra.mrb[72].mxu1 %v4325_v33  ;;  %v10705_v49 = vld [vmem:[%s11309_s3 + $0xec] ss:$16 sps:$4 sm:$0xff]   ;;  %v10710_v33 = vld [vmem:[%s11309_s3 + $0xe0] ss:$16 sps:$4 sm:$0xff]  }
 0x57e   :  { %8226 = vrcp.f32 %v4294_v34  ;;  %4838 = vmatpush1.bf16.msra.mxu0 %v10219_v35  ;;  %4879 = vmatpush1.bf16.msra.mxu1 %v10224_v59  ;;  %v8223_v35 = vpop.eup %8222  ;;  %v10715_v34 = vld [vmem:[%s11309_s3 + $0xe8] ss:$16 sps:$4 sm:$0xff]  }
 0x57f   :  { %4839 = vmatprep.subr.bf16.mxu0 %v10231_v55  ;;  %4880 = vmatprep.subr.bf16.mxu1 %v10236_v14  ;;  %v11540_v55 = vld [vmem:[#allocation51_spill] sm:$0xff] }
 0x580   :  { %4869 = vmatprep.mubr.bf16.mxu0 %v11461_v37  ;;  %4910 = vmatprep.mubr.bf16.mxu1 %v11461_v37 }
 0x582   :  { %4840 = vmatpush1.bf16.msra.mxu0 %v10243_v58  ;;  %4881 = vmatpush1.bf16.msra.mxu1 %v10248_v43  ;;  %v4301_v58 = vadd.f32 1.0, %v8221_v38  ;;  %v10724_v38 = vld [vmem:[%s11310_s4 + $0x4] ss:$16 sps:$4 sm:$0xff]  }
 0x583   :  { %4841 = vmatprep.subr.bf16.mxu0 %v10255_v52  ;;  %4882 = vmatprep.subr.bf16.mxu1 %v10260_v3  ;;  %v10857_v3 = vld [vmem:[%s11310_s4 + $0x80] ss:$16 sps:$4 sm:$0xff]  }
 0x584   :  { %8228 = vrcp.f32 %v4301_v58  ;;  %v11554_v58 = vld [vmem:[#allocation21_spill] sm:$0xff]  ;;  %11564 = vst [vmem:[#allocation12_spill] sm:$0xff] %v10857_v3 }
 0x586   :  { %4842 = vmatpush1.bf16.msra.mxu0 %v10269_v51  ;;  %4883 = vmatpush1.bf16.msra.mxu1 %v10274_v46  ;;  %v11542_v46 = vld [vmem:[#allocation52_spill] sm:$0xff] }
 0x587   :  { %v8225_v59 = vpop.eup %8224  ;;  %4843 = vmatprep.subr.bf16.mxu0 %v10281_v56  ;;  %4884 = vmatprep.subr.bf16.mxu1 %v11540_v55  ;;  %v11543_v56 = vld [vmem:[#allocation54_spill] sm:$0xff] }
 0x588   :  { %v8227_v14 = vpop.eup %8226  ;;  %v4305_v54 = vmul.f32 %v8225_v59, %v8223_v35  ;;  %v10729_v35 = vld [vmem:[%s11310_s4 + $0xc] ss:$16 sps:$4 sm:$0xff]  }
 0x589   :  { %v4304_v43 = vmul.f32 %v8227_v14, %v10343_v10  ;;  %v11553_v14 = vld [vmem:[#allocation19_spill] sm:$0xff] }
 0x58a   :  { %4844 = vmatpush1.bf16.msra.mxu0 %v10293_v17  ;;  %4885 = vmatpush1.bf16.msra.mxu1 %v10298_v22  ;;  %v11545_v17 = vld [vmem:[#allocation66_spill] sm:$0xff]  ;;  %v11546_v22 = vld [vmem:[#allocation67_spill] sm:$0xff] }
 0x58b   :  { %v4306_v52 = vadd.f32 %v4305_v54, %v4304_v43  ;;  %4845 = vmatprep.subr.bf16.mxu0 %v10305_v62  ;;  %4886 = vmatprep.subr.bf16.mxu1 %v10310_v57  ;;  %v11547_v62 = vld [vmem:[#allocation68_spill] sm:$0xff]  ;;  %v11548_v57 = vld [vmem:[#allocation69_spill] sm:$0xff] }
 0x58d   :  { %8230 = vtanh.f32 %v4306_v52  ;;  %v10501_v51 = vsel %vm3345_vm9, %v4306_v52, %v10343_v10  ;;  %v11551_v10 = vld [vmem:[#allocation72_spill] sm:$0xff] }
 0x58e   :  { %4846 = vmatpush1.bf16.msra.mxu0 %v11542_v46  ;;  %4887 = vmatpush1.bf16.msra.mxu1 %v11543_v56  ;;  %v8229_v6 = vpop.eup %8228  ;;  %v11555_v56 = vld [vmem:[#allocation20_spill] sm:$0xff] }
 0x58f   :  { %4847 = vmatprep.subr.bf16.mxu0 %v11544_v13  ;;  %4888 = vmatprep.subr.bf16.mxu1 %v11545_v17  ;;  %v11556_v17 = vld [vmem:[#allocation22_spill] sm:$0xff] }
 0x592   :  { %4848 = vmatpush1.bf16.msra.mxu0 %v11546_v22  ;;  %4889 = vmatpush1.bf16.msra.mxu1 %v11547_v62 }
 0x593   :  { %4849 = vmatprep.subr.bf16.mxu0 %v11548_v57  ;;  %4890 = vmatprep.subr.bf16.mxu1 %v11549_v24 }
 0x596   :  { %4850 = vmatpush1.bf16.msra.mxu0 %v11550_v42  ;;  %4891 = vmatpush1.bf16.msra.mxu1 %v11551_v10 }
 0x597   :  { %v8231_v8 = vpop.eup %8230  ;;  %4851 = vmatprep.subr.bf16.mxu0 %v10386_v16  ;;  %4892 = vmatprep.subr.bf16.mxu1 %v10391_v45  ;;  %v10532_v16 = vld [vmem:[%s11309_s3 + $0x4] ss:$16 sps:$4 sm:$0xff]   ;;  %v10537_v45 = vld [vmem:[%s11309_s3 + $0xc] ss:$16 sps:$4 sm:$0xff]  }
 0x598   :  { %v10515_v50 = vmul.f32 %v8231_v8, %v8229_v6 }
 0x59a   :  { %11552 = vst [vmem:[#allocation75_spill] sm:$0xff] %v10515_v50  ;;  %4852 = vmatpush1.bf16.msra.mxu0 %v10398_v21  ;;  %4893 = vmatpush1.bf16.msra.mxu1 %v10403_v61  ;;  %v10523_v26 = vsel %vm3345_vm9, %v10515_v50, %v10415_v27  ;;  %v10542_v27 = vld [vmem:[%s11309_s3] ss:$16 sps:$4 sm:$0xff]   ;;  %v10547_v21 = vld [vmem:[%s11309_s3 + $0x8] ss:$16 sps:$4 sm:$0xff]  }
 0x59b   :  { %v4644_v29 = vpack.c.bf16 %v10523_v26, %v10523_v26  ;;  %5156 = vmatprep.subr.bf16.mxu0 %v10532_v16  ;;  %5197 = vmatprep.subr.bf16.mxu1 %v10537_v45  ;;  %v10556_v61 = vld [vmem:[%s11309_s3 + $0x24] ss:$16 sps:$4 sm:$0xff]   ;;  %v10862_v50 = vld [vmem:[%s11310_s4 + $0x88] ss:$16 sps:$4 sm:$0xff]  }
 0x59c   :  { %11565 = vst [vmem:[#allocation14_spill] sm:$0xff] %v10862_v50 }
 0x59d   :  { %4870 = vmatmul.mubr.bf16.vlgmr.msra.gmra.mrb[76].mxu0 %v4644_v29  ;;  %4911 = vmatmul.mubr.bf16.vlgmr.msra.gmra.mrb[76].mxu1 %v4644_v29 }
 0x59e   :  { %5188 = vmatprep.mubr.bf16.mxu0 %v11461_v37  ;;  %5229 = vmatprep.mubr.bf16.mxu1 %v11461_v37 }
 0x59f   :  { %5157 = vmatpush1.bf16.msra.mxu0 %v10542_v27  ;;  %5198 = vmatpush1.bf16.msra.mxu1 %v10547_v21 }
 0x5a0   :  { %5158 = vmatprep.subr.bf16.mxu0 %v10556_v61  ;;  %5199 = vmatprep.subr.bf16.mxu1 %v10561_v32 }
 0x5a3   :  { %5159 = vmatpush1.bf16.msra.mxu0 %v10566_v36  ;;  %5200 = vmatpush1.bf16.msra.mxu1 %v10571_v9 }
 0x5a4   :  { %5160 = vmatprep.subr.bf16.mxu0 %v10580_v44  ;;  %5201 = vmatprep.subr.bf16.mxu1 %v10585_v18 }
 0x5a7   :  { %5161 = vmatpush1.bf16.msra.mxu0 %v10590_v11  ;;  %5202 = vmatpush1.bf16.msra.mxu1 %v10595_v41 }
 0x5a8   :  { %5162 = vmatprep.subr.bf16.mxu0 %v10604_v60  ;;  %5203 = vmatprep.subr.bf16.mxu1 %v10609_v23 }
 0x5ab   :  { %5163 = vmatpush1.bf16.msra.mxu0 %v10614_v40  ;;  %5204 = vmatpush1.bf16.msra.mxu1 %v10619_v39 }
 0x5ac   :  { %5164 = vmatprep.subr.bf16.mxu0 %v10628_v28  ;;  %5205 = vmatprep.subr.bf16.mxu1 %v10633_v15 }
 0x5af   :  { %5165 = vmatpush1.bf16.msra.mxu0 %v10638_v63  ;;  %5206 = vmatpush1.bf16.msra.mxu1 %v10643_v0 }
 0x5b0   :  { %5166 = vmatprep.subr.bf16.mxu0 %v10652_v2  ;;  %5207 = vmatprep.subr.bf16.mxu1 %v10657_v4 }
 0x5b3   :  { %5167 = vmatpush1.bf16.msra.mxu0 %v10662_v5  ;;  %5208 = vmatpush1.bf16.msra.mxu1 %v10667_v7 }
 0x5b4   :  { %5168 = vmatprep.subr.bf16.mxu0 %v10676_v19  ;;  %5209 = vmatprep.subr.bf16.mxu1 %v10681_v20 }
 0x5b7   :  { %5169 = vmatpush1.bf16.msra.mxu0 %v10686_v25  ;;  %5210 = vmatpush1.bf16.msra.mxu1 %v10691_v31 }
 0x5b8   :  { %5170 = vmatprep.subr.bf16.mxu0 %v10700_v12  ;;  %5211 = vmatprep.subr.bf16.mxu1 %v10705_v49 }
 0x5bb   :  { %5171 = vmatpush1.bf16.msra.mxu0 %v10710_v33  ;;  %5212 = vmatpush1.bf16.msra.mxu1 %v10715_v34 }
 0x5bc   :  { %5475 = vmatprep.subr.bf16.mxu0 %v10724_v38  ;;  %5516 = vmatprep.subr.bf16.mxu1 %v10729_v35 }
 0x650   :  { %v4552_v59 = vpop.f32.mrb[72].mxu0  ;;  %v4593_v55 = vpop.f32.mrb[72].mxu1 }
 0x651   :  { %v4600_v54 = vadd.f32 %v4552_v59, %v11553_v14  ;;  %v4602_v43 = vadd.f32 %v4593_v55, %v11554_v58  ;;  %v4554_v52 = vpop.f32.mrb[73].mxu0  ;;  %v4595_v46 = vpop.f32.mrb[73].mxu1 }
 0x652   :  { %v4601_v13 = vadd.f32 %v4554_v52, %v11555_v56  ;;  %v4603_v22 = vadd.f32 %v4595_v46, %v11556_v17  ;;  %v4556_v62 = vpop.f32.mrb[74].mxu0  ;;  %v4597_v57 = vpop.f32.mrb[74].mxu1 }
 0x653   :  { %v7318_v24 = vmul.f32 -1.442695, %v4600_v54  ;;  %v4557_v6 = vpop.f32.mrb[75].mxu0  ;;  %v4598_v42 = vpop.f32.mrb[75].mxu1 }
 0x654   :  { %v7319_v10 = vmul.f32 -1.442695, %v4601_v13  ;;  %v7320_v8 = vmul.f32 -1.442695, %v4603_v22  ;;  %v11557_v22 = vld [vmem:[#allocation39_spill] sm:$0xff]  ;;  %v11558_v6 = vld [vmem:[#allocation41_spill] sm:$0xff] }
 0x655   :  { %8232 = vpow2.f32 %v7318_v24 }
 0x656   :  { %8234 = vpow2.f32 %v7319_v10  ;;  %v11559_v10 = vld [vmem:[#allocation40_spill] sm:$0xff] }
 0x657   :  { %8236 = vpow2.f32 %v7320_v8 }
 0x658   :  { %8238 = vtanh.f32 %v4602_v43 }
 0x65f   :  { %v8233_v29 = vpop.eup %8232 }
 0x660   :  { %v8235_v30 = vpop.eup %8234  ;;  %v4607_v59 = vadd.f32 1.0, %v8233_v29  ;;  %v11560_v29 = vld [vmem:[#allocation42_spill] sm:$0xff] }
 0x661   :  { %v4613_v55 = vadd.f32 1.0, %v8235_v30  ;;  %v8237_v14 = vpop.eup %8236 }
 0x662   :  { %8240 = vrcp.f32 %v4607_v59  ;;  %v8239_v58 = vpop.eup %8238  ;;  %v4620_v54 = vadd.f32 1.0, %v8237_v14 }
 0x663   :  { %8242 = vrcp.f32 %v4613_v55 }
 0x664   :  { %8244 = vrcp.f32 %v4620_v54 }
 0x66c   :  { %v8241_v52 = vpop.eup %8240 }
 0x66d   :  { %v8243_v46 = vpop.eup %8242  ;;  %v4624_v56 = vmul.f32 %v8241_v52, %v8239_v58 }
 0x66e   :  { %v4623_v17 = vmul.f32 %v8243_v46, %v10467_v1 }
 0x670   :  { %v4625_v13 = vadd.f32 %v4624_v56, %v4623_v17  ;;  %v4871_v62 = vpop.f32.mrb[76].mxu0  ;;  %v4912_v57 = vpop.f32.mrb[76].mxu1 }
 0x671   :  { %v4919_v24 = vadd.f32 %v4871_v62, %v11557_v22  ;;  %v4921_v42 = vadd.f32 %v4912_v57, %v11558_v6  ;;  %v4873_v43 = vpop.f32.mrb[77].mxu0  ;;  %v4914_v30 = vpop.f32.mrb[77].mxu1 }
 0x672   :  { %8246 = vtanh.f32 %v4625_v13  ;;  %v4920_v8 = vadd.f32 %v4873_v43, %v11559_v10  ;;  %v4922_v59 = vadd.f32 %v4914_v30, %v11560_v29  ;;  %v4875_v55 = vpop.f32.mrb[78].mxu0  ;;  %v4916_v58 = vpop.f32.mrb[78].mxu1  ;;  %v10745_v52 = vsel %vm3020_vm15, %v4625_v13, %v10467_v1  ;;  %v10758_v1 = vld [vmem:[%s11310_s4] ss:$16 sps:$4 sm:$0xff]   ;;  %v10763_v13 = vld [vmem:[%s11310_s4 + $0x8] ss:$16 sps:$4 sm:$0xff]  }
 0x673   :  { %v7353_v46 = vmul.f32 -1.442695, %v4919_v24  ;;  %v4876_v56 = vpop.f32.mrb[79].mxu0  ;;  %v4917_v54 = vpop.f32.mrb[79].mxu1  ;;  %v10775_v29 = vld [vmem:[%s11310_s4 + $0x2c] ss:$16 sps:$4 sm:$0xff]  }
 0x674   :  { %v7354_v17 = vmul.f32 -1.442695, %v4920_v8  ;;  %v8245_v62 = vpop.eup %8244  ;;  %v7355_v22 = vmul.f32 -1.442695, %v4922_v59  ;;  %v10782_v55 = vld [vmem:[%s11310_s4 + $0x20] ss:$16 sps:$4 sm:$0xff]  }
 0x675   :  { %8248 = vpow2.f32 %v7353_v46  ;;  %v10787_v58 = vld [vmem:[%s11310_s4 + $0x28] ss:$16 sps:$4 sm:$0xff]   ;;  %v10799_v46 = vld [vmem:[%s11310_s4 + $0x4c] ss:$16 sps:$4 sm:$0xff]   ;;  %v10808_v56 = vld [vmem:[%s11310_s4 + $0x40] ss:$16 sps:$4 sm:$0xff]  }
 0x676   :  { %8250 = vpow2.f32 %v7354_v17  ;;  %v10813_v54 = vld [vmem:[%s11310_s4 + $0x48] ss:$16 sps:$4 sm:$0xff]   ;;  %v10820_v17 = vld [vmem:[%s11310_s4 + $0x64] ss:$16 sps:$4 sm:$0xff]  }
 0x677   :  { %8252 = vpow2.f32 %v7355_v22 }
 0x678   :  { %8254 = vtanh.f32 %v4921_v42  ;;  %v10794_v42 = vld [vmem:[%s11310_s4 + $0x44] ss:$16 sps:$4 sm:$0xff]  }
 0x67c   :  { %v8247_v57 = vpop.eup %8246 }
 0x67d   :  { %v10747_v6 = vmul.f32 %v8247_v57, %v8245_v62  ;;  %v10825_v62 = vld [vmem:[%s11310_s4 + $0x6c] ss:$16 sps:$4 sm:$0xff]  }
 0x67e   :  { %11563 = vst [vmem:[#allocation13_spill] sm:$0xff] %v10825_v62 }
 0x67f   :  { %11562 = vst [vmem:[#allocation11_spill] sm:$0xff] %v10747_v6  ;;  %v8249_v43 = vpop.eup %8248  ;;  %v10753_v30 = vsel %vm3020_vm15, %v10747_v6, %v10475_v48  ;;  %v10770_v48 = vld [vmem:[%s11310_s4 + $0x24] ss:$16 sps:$4 sm:$0xff]  }
 0x680   :  { %v8251_v24 = vpop.eup %8250  ;;  %v4926_v10 = vadd.f32 1.0, %v8249_v43  ;;  %v4963_v8 = vpack.c.bf16 %v10753_v30, %v10753_v30  ;;  %v10832_v43 = vld [vmem:[%s11310_s4 + $0x60] ss:$16 sps:$4 sm:$0xff]  }
 0x681   :  { %v4932_v59 = vadd.f32 1.0, %v8251_v24  ;;  %v8253_v57 = vpop.eup %8252  ;;  %v10837_v24 = vld [vmem:[%s11310_s4 + $0x68] ss:$16 sps:$4 sm:$0xff]  }
 0x682   :  { %8256 = vrcp.f32 %v4926_v10  ;;  %5189 = vmatmul.mubr.bf16.vlgmr.msra.gmra.mrb[80].mxu0 %v4963_v8  ;;  %5230 = vmatmul.mubr.bf16.vlgmr.msra.gmra.mrb[80].mxu1 %v4963_v8  ;;  %v8255_v22 = vpop.eup %8254  ;;  %v10844_v8 = vld [vmem:[%s11310_s4 + $0x84] ss:$16 sps:$4 sm:$0xff]   ;;  %v4939_v47 = vadd.f32 1.0, %v8253_v57  ;;  %v10874_v57 = vld [vmem:[%s11310_s4 + $0xac] ss:$16 sps:$4 sm:$0xff]  }
 0x683   :  { %8258 = vrcp.f32 %v4932_v59  ;;  %5476 = vmatpush1.bf16.msra.mxu0 %v10758_v1  ;;  %5517 = vmatpush1.bf16.msra.mxu1 %v10763_v13  ;;  %v10849_v59 = vld [vmem:[%s11310_s4 + $0x8c] ss:$16 sps:$4 sm:$0xff]   ;;  %11567 = vst [vmem:[#allocation49_spill] sm:$0xff] %v10874_v57 }
 0x684   :  { %5477 = vmatprep.subr.bf16.mxu0 %v10770_v48  ;;  %5518 = vmatprep.subr.bf16.mxu1 %v10775_v29  ;;  %8260 = vrcp.f32 %v4939_v47  ;;  %v10898_v47 = vld [vmem:[%s11310_s4 + $0xc4] ss:$16 sps:$4 sm:$0xff]  }
 0x685   :  { %5507 = vmatprep.mubr.bf16.mxu0 %v11461_v37  ;;  %5548 = vmatprep.mubr.bf16.mxu1 %v11461_v37  ;;  %11571 = vst [vmem:[#allocation15_spill] sm:$0xff] %v10898_v47 }
 0x687   :  { %5478 = vmatpush1.bf16.msra.mxu0 %v10782_v55  ;;  %5519 = vmatpush1.bf16.msra.mxu1 %v10787_v58 }
 0x688   :  { %5479 = vmatprep.subr.bf16.mxu0 %v10794_v42  ;;  %5520 = vmatprep.subr.bf16.mxu1 %v10799_v46 }
 0x68b   :  { %5480 = vmatpush1.bf16.msra.mxu0 %v10808_v56  ;;  %5521 = vmatpush1.bf16.msra.mxu1 %v10813_v54 }
 0x68c   :  { %v8257_v10 = vpop.eup %8256  ;;  %5481 = vmatprep.subr.bf16.mxu0 %v10820_v17  ;;  %5522 = vmatprep.subr.bf16.mxu1 %v10825_v62 }
 0x68d   :  { %v8259_v6 = vpop.eup %8258  ;;  %v4943_v14 = vmul.f32 %v8257_v10, %v8255_v22  ;;  %v10891_v10 = vld [vmem:[%s11310_s4 + $0xa8] ss:$16 sps:$4 sm:$0xff]  }
 0x68e   :  { %v4942_v53 = vmul.f32 %v8259_v6, %v10501_v51  ;;  %v10869_v6 = vld [vmem:[%s11310_s4 + $0xa4] ss:$16 sps:$4 sm:$0xff]   ;;  %11570 = vst [vmem:[#allocation50_spill] sm:$0xff] %v10891_v10 }
 0x68f   :  { %5482 = vmatpush1.bf16.msra.mxu0 %v10832_v43  ;;  %5523 = vmatpush1.bf16.msra.mxu1 %v10837_v24  ;;  %11566 = vst [vmem:[#allocation47_spill] sm:$0xff] %v10869_v6 }
 0x690   :  { %v4944_v62 = vadd.f32 %v4943_v14, %v4942_v53  ;;  %5483 = vmatprep.subr.bf16.mxu0 %v10844_v8  ;;  %5524 = vmatprep.subr.bf16.mxu1 %v10849_v59  ;;  %v10886_v14 = vld [vmem:[%s11310_s4 + $0xa0] ss:$16 sps:$4 sm:$0xff]  }
 0x691   :  { %11569 = vst [vmem:[#allocation48_spill] sm:$0xff] %v10886_v14 }
 0x692   :  { %8262 = vtanh.f32 %v4944_v62  ;;  %v10879_v53 = vsel %vm2695_vm14, %v4944_v62, %v10501_v51  ;;  %v10903_v51 = vld [vmem:[%s11310_s4 + $0xcc] ss:$16 sps:$4 sm:$0xff]   ;;  %v10910_v62 = vld [vmem:[%s11310_s4 + $0xc0] ss:$16 sps:$4 sm:$0xff]  }
 0x693   :  { %5484 = vmatpush1.bf16.msra.mxu0 %v10857_v3  ;;  %5525 = vmatpush1.bf16.msra.mxu1 %v10862_v50  ;;  %11572 = vst [vmem:[#allocation17_spill] sm:$0xff] %v10903_v51  ;;  %11573 = vst [vmem:[#allocation16_spill] sm:$0xff] %v10910_v62 }
 0x694   :  { %5485 = vmatprep.subr.bf16.mxu0 %v10869_v6  ;;  %5526 = vmatprep.subr.bf16.mxu1 %v10874_v57  ;;  %v10915_v57 = vld [vmem:[%s11310_s4 + $0xc8] ss:$16 sps:$4 sm:$0xff]   ;;  %v8261_v6 = vpop.eup %8260 }
 0x695   :  { %11574 = vst [vmem:[#allocation18_spill] sm:$0xff] %v10915_v57 }
 0x697   :  { %5486 = vmatpush1.bf16.msra.mxu0 %v10886_v14  ;;  %5527 = vmatpush1.bf16.msra.mxu1 %v10891_v10  ;;  %v10922_v14 = vld [vmem:[%s11310_s4 + $0xe4] ss:$16 sps:$4 sm:$0xff]   ;;  %v10927_v10 = vld [vmem:[%s11310_s4 + $0xec] ss:$16 sps:$4 sm:$0xff]  }
 0x698   :  { %5487 = vmatprep.subr.bf16.mxu0 %v10898_v47  ;;  %5528 = vmatprep.subr.bf16.mxu1 %v10903_v51  ;;  %v10934_v47 = vld [vmem:[%s11310_s4 + $0xe0] ss:$16 sps:$4 sm:$0xff]   ;;  %v10939_v51 = vld [vmem:[%s11310_s4 + $0xe8] ss:$16 sps:$4 sm:$0xff]  }
 0x69b   :  { %5488 = vmatpush1.bf16.msra.mxu0 %v10910_v62  ;;  %5529 = vmatpush1.bf16.msra.mxu1 %v10915_v57 }
 0x69c   :  { %v8263_v50 = vpop.eup %8262  ;;  %5489 = vmatprep.subr.bf16.mxu0 %v10922_v14  ;;  %5530 = vmatprep.subr.bf16.mxu1 %v10927_v10 }
 0x69d   :  { %v10943_v3 = vmul.f32 %v8263_v50, %v8261_v6 }
 0x69f   :  { %5490 = vmatpush1.bf16.msra.mxu0 %v10934_v47  ;;  %5531 = vmatpush1.bf16.msra.mxu1 %v10939_v51  ;;  %v10951_v57 = vsel %vm2695_vm14, %v10943_v3, %v10523_v26 }
 0x6a0   :  { %v5282_v62 = vpack.c.bf16 %v10951_v57, %v10951_v57  ;;  %5794 = vmatprep.subr.bf16.mxu0 %v10532_v16  ;;  %5835 = vmatprep.subr.bf16.mxu1 %v10537_v45  ;;  %v11575_v16 = vld [vmem:[#allocation23_spill] sm:$0xff] }
 0x6a2   :  { %5508 = vmatmul.mubr.bf16.vlgmr.msra.gmra.mrb[84].mxu0 %v5282_v62  ;;  %5549 = vmatmul.mubr.bf16.vlgmr.msra.gmra.mrb[84].mxu1 %v5282_v62 }
 0x6a3   :  { %5795 = vmatpush1.bf16.msra.mxu0 %v10542_v27  ;;  %5836 = vmatpush1.bf16.msra.mxu1 %v10547_v21  ;;  %v11576_v27 = vld [vmem:[#allocation25_spill] sm:$0xff] }
 0x6a4   :  { %5796 = vmatprep.subr.bf16.mxu0 %v10556_v61  ;;  %5837 = vmatprep.subr.bf16.mxu1 %v10561_v32 }
 0x6a5   :  { %5826 = vmatprep.mubr.bf16.mxu0 %v11461_v37  ;;  %5867 = vmatprep.mubr.bf16.mxu1 %v11461_v37 }
 0x6a7   :  { %5797 = vmatpush1.bf16.msra.mxu0 %v10566_v36  ;;  %5838 = vmatpush1.bf16.msra.mxu1 %v10571_v9  ;;  %v11577_v36 = vld [vmem:[#allocation24_spill] sm:$0xff] }
 0x6a8   :  { %5798 = vmatprep.subr.bf16.mxu0 %v10580_v44  ;;  %5839 = vmatprep.subr.bf16.mxu1 %v10585_v18  ;;  %v11578_v44 = vld [vmem:[#allocation26_spill] sm:$0xff] }
 0x6ab   :  { %5799 = vmatpush1.bf16.msra.mxu0 %v10590_v11  ;;  %5840 = vmatpush1.bf16.msra.mxu1 %v10595_v41 }
 0x6ac   :  { %5800 = vmatprep.subr.bf16.mxu0 %v10604_v60  ;;  %5841 = vmatprep.subr.bf16.mxu1 %v10609_v23 }
 0x6af   :  { %5801 = vmatpush1.bf16.msra.mxu0 %v10614_v40  ;;  %5842 = vmatpush1.bf16.msra.mxu1 %v10619_v39 }
 0x6b0   :  { %5802 = vmatprep.subr.bf16.mxu0 %v10628_v28  ;;  %5843 = vmatprep.subr.bf16.mxu1 %v10633_v15 }
 0x6b3   :  { %5803 = vmatpush1.bf16.msra.mxu0 %v10638_v63  ;;  %5844 = vmatpush1.bf16.msra.mxu1 %v10643_v0 }
 0x6b4   :  { %5804 = vmatprep.subr.bf16.mxu0 %v10652_v2  ;;  %5845 = vmatprep.subr.bf16.mxu1 %v10657_v4 }
 0x6b7   :  { %5805 = vmatpush1.bf16.msra.mxu0 %v10662_v5  ;;  %5846 = vmatpush1.bf16.msra.mxu1 %v10667_v7 }
 0x6b8   :  { %5806 = vmatprep.subr.bf16.mxu0 %v10676_v19  ;;  %5847 = vmatprep.subr.bf16.mxu1 %v10681_v20 }
 0x6bb   :  { %5807 = vmatpush1.bf16.msra.mxu0 %v10686_v25  ;;  %5848 = vmatpush1.bf16.msra.mxu1 %v10691_v31 }
 0x6bc   :  { %5808 = vmatprep.subr.bf16.mxu0 %v10700_v12  ;;  %5849 = vmatprep.subr.bf16.mxu1 %v10705_v49 }
 0x6bf   :  { %5809 = vmatpush1.bf16.msra.mxu0 %v10710_v33  ;;  %5850 = vmatpush1.bf16.msra.mxu1 %v10715_v34  ;;  %v11579_v34 = vld [vmem:[#allocation35_spill] sm:$0xff] }
 0x6c0   :  { %6110 = vmatprep.subr.bf16.mxu0 %v10724_v38  ;;  %6151 = vmatprep.subr.bf16.mxu1 %v10729_v35  ;;  %v11580_v35 = vld [vmem:[#allocation37_spill] sm:$0xff] }
 0x755   :  { %v5190_v50 = vpop.f32.mrb[80].mxu0  ;;  %v5231_v26 = vpop.f32.mrb[80].mxu1 }
 0x756   :  { %v5238_v45 = vadd.f32 %v5190_v50, %v11575_v16  ;;  %v5240_v21 = vadd.f32 %v5231_v26, %v11576_v27  ;;  %v5192_v61 = vpop.f32.mrb[81].mxu0  ;;  %v5233_v32 = vpop.f32.mrb[81].mxu1  ;;  %v11581_v26 = vld [vmem:[#allocation36_spill] sm:$0xff] }
 0x757   :  { %v5239_v9 = vadd.f32 %v5192_v61, %v11577_v36  ;;  %v5241_v18 = vadd.f32 %v5233_v32, %v11578_v44  ;;  %v5194_v11 = vpop.f32.mrb[82].mxu0  ;;  %v5235_v41 = vpop.f32.mrb[82].mxu1 }
 0x758   :  { %v7388_v60 = vmul.f32 -1.442695, %v5238_v45  ;;  %v5195_v23 = vpop.f32.mrb[83].mxu0  ;;  %v5236_v40 = vpop.f32.mrb[83].mxu1  ;;  %v11582_v45 = vld [vmem:[#allocation38_spill] sm:$0xff] }
 0x759   :  { %v7389_v39 = vmul.f32 -1.442695, %v5239_v9  ;;  %v7390_v28 = vmul.f32 -1.442695, %v5241_v18 }
 0x75a   :  { %8264 = vpow2.f32 %v7388_v60 }
 0x75b   :  { %8266 = vpow2.f32 %v7389_v39 }
 0x75c   :  { %8268 = vpow2.f32 %v7390_v28 }
 0x75d   :  { %8270 = vtanh.f32 %v5240_v21 }
 0x764   :  { %v8265_v15 = vpop.eup %8264 }
 0x765   :  { %v8267_v63 = vpop.eup %8266  ;;  %v5245_v0 = vadd.f32 1.0, %v8265_v15 }
 0x766   :  { %v5251_v2 = vadd.f32 1.0, %v8267_v63  ;;  %v8269_v4 = vpop.eup %8268 }
 0x767   :  { %8272 = vrcp.f32 %v5245_v0  ;;  %v8271_v5 = vpop.eup %8270  ;;  %v5258_v25 = vadd.f32 1.0, %v8269_v4  ;;  %v11593_v4 = vld [vmem:[#allocation17_spill] sm:$0xff] }
 0x768   :  { %8274 = vrcp.f32 %v5251_v2  ;;  %v11588_v2 = vld [vmem:[#allocation47_spill] sm:$0xff] }
 0x769   :  { %8276 = vrcp.f32 %v5258_v25 }
 0x771   :  { %v8273_v7 = vpop.eup %8272 }
 0x772   :  { %v8275_v19 = vpop.eup %8274  ;;  %v5262_v20 = vmul.f32 %v8273_v7, %v8271_v5  ;;  %v11594_v7 = vld [vmem:[#allocation16_spill] sm:$0xff] }
 0x773   :  { %v5261_v31 = vmul.f32 %v8275_v19, %v10745_v52  ;;  %v8277_v41 = vpop.eup %8276 }
 0x775   :  { %v5263_v12 = vadd.f32 %v5262_v20, %v5261_v31  ;;  %v5509_v49 = vpop.f32.mrb[84].mxu0  ;;  %v5550_v33 = vpop.f32.mrb[84].mxu1 }
 0x776   :  { %v5557_v38 = vadd.f32 %v5509_v49, %v11579_v34  ;;  %v5559_v6 = vadd.f32 %v5550_v33, %v11580_v35  ;;  %v5511_v62 = vpop.f32.mrb[85].mxu0  ;;  %v5552_v50 = vpop.f32.mrb[85].mxu1  ;;  %v8046_v49 = vld [vmem:[%s11313_s6 + $0x58] sm:$0xff]   ;;  %v8048_v34 = vld [vmem:[%s11313_s6 + $0x60] sm:$0xff]   ;;  %v8050_v35 = vld [vmem:[%s11313_s6 + $0x68] sm:$0xff]  }
 0x777   :  { %8278 = vtanh.f32 %v5263_v12  ;;  %v5558_v16 = vadd.f32 %v5511_v62, %v11581_v26  ;;  %v5560_v27 = vadd.f32 %v5552_v50, %v11582_v45  ;;  %v5513_v21 = vpop.f32.mrb[86].mxu0  ;;  %v5554_v61 = vpop.f32.mrb[86].mxu1  ;;  %v11003_v36 = vsel %vm2370_vm13, %v5263_v12, %v10745_v52  ;;  %v8045_v12 = vld [vmem:[%s11313_s6 + $0x10] sm:$0xff]   ;;  %v8047_v33 = vld [vmem:[%s11313_s6 + $0x18] sm:$0xff]  }
 0x778   :  { %v7423_v9 = vmul.f32 -1.442695, %v5557_v38  ;;  %v5514_v44 = vpop.f32.mrb[87].mxu0  ;;  %v5555_v18 = vpop.f32.mrb[87].mxu1  ;;  %v8049_v38 = vld [vmem:[%s11313_s6 + $0x20] sm:$0xff]   ;;  %v8052_v62 = vld [vmem:[%s11313_s6 + $0x70] sm:$0xff]  }
 0x779   :  { %v7424_v11 = vmul.f32 -1.442695, %v5558_v16  ;;  %v7425_v23 = vmul.f32 -1.442695, %v5560_v27  ;;  %v8053_v50 = vld [vmem:[%s11313_s6 + $0x30] sm:$0xff]   ;;  %v8054_v26 = vld [vmem:[%s11313_s6 + $0x78] sm:$0xff]  }
 0x77a   :  { %8280 = vpow2.f32 %v7423_v9  ;;  %v8055_v16 = vld [vmem:[%s11313_s6 + $0x38] sm:$0xff]   ;;  %v11596_v21 = vld [vmem:[#allocation27_spill] sm:$0xff] }
 0x77b   :  { %8282 = vpow2.f32 %v7424_v11  ;;  %v11597_v9 = vld [vmem:[#allocation29_spill] sm:$0xff] }
 0x77c   :  { %8284 = vpow2.f32 %v7425_v23  ;;  %v11599_v23 = vld [vmem:[#allocation30_spill] sm:$0xff] }
 0x77d   :  { %8286 = vtanh.f32 %v5559_v6  ;;  %v8051_v6 = vld [vmem:[%s11313_s6 + $0x28] sm:$0xff]  }
 0x781   :  { %v8279_v60 = vpop.eup %8278 }
 0x782   :  { %v11005_v40 = vmul.f32 %v8279_v60, %v8277_v41  ;;  %v11598_v41 = vld [vmem:[#allocation28_spill] sm:$0xff] }
 0x784   :  { %v8281_v39 = vpop.eup %8280  ;;  %v5267_v28 = vsel %vm2370_vm13, %v11005_v40, %v10753_v30 }
 0x785   :  { %v8283_v15 = vpop.eup %8282  ;;  %v5564_v52 = vadd.f32 1.0, %v8281_v39  ;;  %v5601_v63 = vpack.c.bf16 %v5267_v28, %v5267_v28 }
 0x786   :  { %v5570_v0 = vadd.f32 1.0, %v8283_v15  ;;  %v8285_v30 = vpop.eup %8284 }
 0x787   :  { %8288 = vrcp.f32 %v5564_v52  ;;  %5827 = vmatmul.mubr.bf16.vlgmr.msra.gmra.mrb[88].mxu0 %v5601_v63  ;;  %5868 = vmatmul.mubr.bf16.vlgmr.msra.gmra.mrb[88].mxu1 %v5601_v63 }
 0x788   :  { %8290 = vrcp.f32 %v5570_v0  ;;  %6111 = vmatpush1.bf16.msra.mxu0 %v10758_v1  ;;  %6152 = vmatpush1.bf16.msra.mxu1 %v10763_v13  ;;  %v8287_v1 = vpop.eup %8286 }
 0x789   :  { %6112 = vmatprep.subr.bf16.mxu0 %v10770_v48  ;;  %6153 = vmatprep.subr.bf16.mxu1 %v10775_v29  ;;  %v11584_v48 = vld [vmem:[#allocation13_spill] sm:$0xff] }
 0x78a   :  { %6142 = vmatprep.mubr.bf16.mxu0 %v11461_v37  ;;  %6183 = vmatprep.mubr.bf16.mxu1 %v11461_v37 }
 0x78c   :  { %6113 = vmatpush1.bf16.msra.mxu0 %v10782_v55  ;;  %6154 = vmatpush1.bf16.msra.mxu1 %v10787_v58  ;;  %v5577_v55 = vadd.f32 1.0, %v8285_v30 }
 0x78d   :  { %6114 = vmatprep.subr.bf16.mxu0 %v10794_v42  ;;  %6155 = vmatprep.subr.bf16.mxu1 %v10799_v46 }
 0x78e   :  { %8292 = vrcp.f32 %v5577_v55 }
 0x790   :  { %6115 = vmatpush1.bf16.msra.mxu0 %v10808_v56  ;;  %6156 = vmatpush1.bf16.msra.mxu1 %v10813_v54  ;;  %v11586_v54 = vld [vmem:[#allocation12_spill] sm:$0xff] }
 0x791   :  { %v8289_v13 = vpop.eup %8288  ;;  %6116 = vmatprep.subr.bf16.mxu0 %v10820_v17  ;;  %6157 = vmatprep.subr.bf16.mxu1 %v11584_v48  ;;  %v11587_v17 = vld [vmem:[#allocation14_spill] sm:$0xff] }
 0x792   :  { %v8291_v37 = vpop.eup %8290  ;;  %v5581_v29 = vmul.f32 %v8289_v13, %v8287_v1 }
 0x793   :  { %v5580_v58 = vmul.f32 %v8291_v37, %v10879_v53 }
 0x794   :  { %6117 = vmatpush1.bf16.msra.mxu0 %v10832_v43  ;;  %6158 = vmatpush1.bf16.msra.mxu1 %v10837_v24  ;;  %v11589_v43 = vld [vmem:[#allocation49_spill] sm:$0xff]  ;;  %v11590_v24 = vld [vmem:[#allocation48_spill] sm:$0xff] }
 0x795   :  { %v5582_v42 = vadd.f32 %v5581_v29, %v5580_v58  ;;  %6118 = vmatprep.subr.bf16.mxu0 %v10844_v8  ;;  %6159 = vmatprep.subr.bf16.mxu1 %v10849_v59  ;;  %v11591_v8 = vld [vmem:[#allocation50_spill] sm:$0xff]  ;;  %v11592_v59 = vld [vmem:[#allocation15_spill] sm:$0xff] }
 0x797   :  { %8294 = vtanh.f32 %v5582_v42  ;;  %v11033_v56 = vsel %vm2045_vm12, %v5582_v42, %v10879_v53  ;;  %v11595_v53 = vld [vmem:[#allocation18_spill] sm:$0xff] }
 0x798   :  { %6119 = vmatpush1.bf16.msra.mxu0 %v11586_v54  ;;  %6160 = vmatpush1.bf16.msra.mxu1 %v11587_v17  ;;  %v8293_v5 = vpop.eup %8292 }
 0x799   :  { %6120 = vmatprep.subr.bf16.mxu0 %v11588_v2  ;;  %6161 = vmatprep.subr.bf16.mxu1 %v11589_v43 }
 0x79c   :  { %6121 = vmatpush1.bf16.msra.mxu0 %v11590_v24  ;;  %6162 = vmatpush1.bf16.msra.mxu1 %v11591_v8 }
 0x79d   :  { %6122 = vmatprep.subr.bf16.mxu0 %v11592_v59  ;;  %6163 = vmatprep.subr.bf16.mxu1 %v11593_v4  ;;  %v11600_v4 = vld [vmem:[#allocation31_spill] sm:$0xff] }
 0x7a0   :  { %6123 = vmatpush1.bf16.msra.mxu0 %v11594_v7  ;;  %6164 = vmatpush1.bf16.msra.mxu1 %v11595_v53  ;;  %v11601_v7 = vld [vmem:[#allocation33_spill] sm:$0xff] }
 0x7a1   :  { %v8295_v19 = vpop.eup %8294  ;;  %6124 = vmatprep.subr.bf16.mxu0 %v10922_v14  ;;  %6165 = vmatprep.subr.bf16.mxu1 %v10927_v10  ;;  %v8040_v14 = vld [vmem:[%s11313_s6 + $0x40] sm:$0xff]  }
 0x7a2   :  { %v11047_v20 = vmul.f32 %v8295_v19, %v8293_v5  ;;  %v8041_v10 = vld [vmem:[%s11313_s6] sm:$0xff]  }
 0x7a4   :  { %6125 = vmatpush1.bf16.msra.mxu0 %v10934_v47  ;;  %6166 = vmatpush1.bf16.msra.mxu1 %v10939_v51  ;;  %v5586_v25 = vsel %vm2045_vm12, %v11047_v20, %v10951_v57  ;;  %v8042_v47 = vld [vmem:[%s11313_s6 + $0x48] sm:$0xff]   ;;  %v8044_v51 = vld [vmem:[%s11313_s6 + $0x50] sm:$0xff]  }
 0x7a5   :  { %v5917_v31 = vpack.c.bf16 %v5586_v25, %v5586_v25  ;;  %7587 = vmatprep.subr.bf16.mxu0 %v8040_v14  ;;  %v8043_v57 = vld [vmem:[%s11313_s6 + $0x8] sm:$0xff]  }
 0x7a7   :  { %6143 = vmatmul.mubr.bf16.vlgmr.msra.gmra.mrb[92].mxu0 %v5917_v31  ;;  %6184 = vmatmul.mubr.bf16.vlgmr.msra.gmra.mrb[92].mxu1 %v5917_v31  ;;  %v11602_v31 = vld [vmem:[#allocation32_spill] sm:$0xff] }
 0x7a8   :  { %7588 = vmatpush3.bf16.msra.mxu0 %v8041_v10  ;;  %v11603_v10 = vld [vmem:[#allocation34_spill] sm:$0xff] }
 0x7a9   :  { %7589 = vmatprep.subr.bf16.mxu0 %v8042_v47 }
 0x7ac   :  { %7590 = vmatpush3.bf16.msra.mxu0 %v8043_v57 }
 0x7ad   :  { %7591 = vmatprep.subr.bf16.mxu0 %v8044_v51 }
 0x7b0   :  { %7592 = vmatpush3.bf16.msra.mxu0 %v8045_v12 }
 0x7b1   :  { %7593 = vmatprep.subr.bf16.mxu0 %v8046_v49 }
 0x7b4   :  { %7594 = vmatpush3.bf16.msra.mxu0 %v8047_v33 }
 0x7b5   :  { %7595 = vmatprep.subr.bf16.mxu0 %v8048_v34 }
 0x7b8   :  { %7596 = vmatpush3.bf16.msra.mxu0 %v8049_v38 }
 0x7b9   :  { %7597 = vmatprep.subr.bf16.mxu0 %v8050_v35 }
 0x7bc   :  { %7598 = vmatpush3.bf16.msra.mxu0 %v8051_v6 }
 0x7bd   :  { %7599 = vmatprep.subr.bf16.mxu0 %v8052_v62 }
 0x7c0   :  { %7600 = vmatpush3.bf16.msra.mxu0 %v8053_v50 }
 0x7c1   :  { %7601 = vmatprep.subr.bf16.mxu0 %v8054_v26 }
 0x7c4   :  { %7602 = vmatpush3.bf16.msra.mxu0 %v8055_v16 }
 0x85a   :  { %v5828_v45 = vpop.f32.mrb[88].mxu0  ;;  %v5869_v27 = vpop.f32.mrb[88].mxu1 }
 0x85b   :  { %v5876_v61 = vadd.f32 %v5828_v45, %v11596_v21  ;;  %v5878_v44 = vadd.f32 %v5869_v27, %v11597_v9  ;;  %v5830_v18 = vpop.f32.mrb[89].mxu0  ;;  %v5871_v11 = vpop.f32.mrb[89].mxu1 }
 0x85c   :  { %v5877_v60 = vadd.f32 %v5830_v18, %v11598_v41  ;;  %v5879_v39 = vadd.f32 %v5871_v11, %v11599_v23  ;;  %v5832_v28 = vpop.f32.mrb[90].mxu0  ;;  %v5873_v15 = vpop.f32.mrb[90].mxu1 }
 0x85d   :  { %v7458_v52 = vmul.f32 -1.442695, %v5876_v61  ;;  %v5833_v63 = vpop.f32.mrb[91].mxu0  ;;  %v5874_v0 = vpop.f32.mrb[91].mxu1  ;;  %v11604_v28 = vld [vmem:[#allocation55_spill] sm:$0xff]  ;;  %v11605_v15 = vld [vmem:[#allocation56_spill] sm:$0xff] }
 0x85e   :  { %v7459_v30 = vmul.f32 -1.442695, %v5877_v60  ;;  %v7460_v1 = vmul.f32 -1.442695, %v5879_v39 }
 0x85f   :  { %8296 = vpow2.f32 %v7458_v52  ;;  %v11606_v52 = vld [vmem:[#allocation62_spill] sm:$0xff] }
 0x860   :  { %8298 = vpow2.f32 %v7459_v30  ;;  %v7567_v63 = vpack.c.bf16 %v11606_v52, %v11605_v15 }
 0x861   :  { %8300 = vpow2.f32 %v7460_v1  ;;  %v11609_v1 = vld [vmem:[#allocation60_spill] sm:$0xff] }
 0x862   :  { %8302 = vtanh.f32 %v5878_v44 }
 0x869   :  { %v8297_v13 = vpop.eup %8296 }
 0x86a   :  { %v8299_v48 = vpop.eup %8298  ;;  %v5883_v37 = vadd.f32 1.0, %v8297_v13  ;;  %v11610_v13 = vld [vmem:[#allocation10_spill] sm:$0xff] }
 0x86b   :  { %v5889_v29 = vadd.f32 1.0, %v8299_v48  ;;  %v8301_v55 = vpop.eup %8300  ;;  %v7573_v48 = vpack.c.bf16 %v11610_v13, %v11609_v1  ;;  %v3346_v46 = vsel %vm3345_vm9, %v11610_v13, 0.0 }
 0x86c   :  { %8304 = vrcp.f32 %v5883_v37  ;;  %v8303_v58 = vpop.eup %8302  ;;  %v5896_v2 = vadd.f32 1.0, %v8301_v55  ;;  %v11611_v37 = vld [vmem:[#allocation73_spill] sm:$0xff] }
 0x86d   :  { %8306 = vrcp.f32 %v5889_v29  ;;  %v11612_v29 = vld [vmem:[#allocation9_spill] sm:$0xff] }
 0x86e   :  { %8308 = vrcp.f32 %v5896_v2  ;;  %v7576_v55 = vpack.c.bf16 %v11612_v29, %v11611_v37 }
 0x876   :  { %v8305_v42 = vpop.eup %8304 }
 0x877   :  { %v8307_v54 = vpop.eup %8306  ;;  %v5900_v17 = vmul.f32 %v8305_v42, %v8303_v58 }
 0x878   :  { %v5899_v43 = vmul.f32 %v8307_v54, %v11003_v36  ;;  %v8309_v34 = vpop.eup %8308  ;;  %v11615_v54 = vld [vmem:[#allocation74_spill] sm:$0xff] }
 0x87a   :  { %v5901_v24 = vadd.f32 %v5900_v17, %v5899_v43  ;;  %v6144_v8 = vpop.f32.mrb[92].mxu0  ;;  %v6185_v59 = vpop.f32.mrb[92].mxu1  ;;  %v11616_v17 = vld [vmem:[#allocation11_spill] sm:$0xff]  ;;  %v11617_v43 = vld [vmem:[#allocation76_spill] sm:$0xff] }
 0x87b   :  { %v6192_v5 = vadd.f32 %v6144_v8, %v11600_v4  ;;  %v6194_v53 = vadd.f32 %v6185_v59, %v11601_v7  ;;  %v6146_v19 = vpop.f32.mrb[93].mxu0  ;;  %v6187_v25 = vpop.f32.mrb[93].mxu1  ;;  %v7579_v2 = vpack.c.bf16 %v11616_v17, %v11615_v54  ;;  %v7496_v7 = vld [vmem:[%s11314_s7] ss:$0 sm:$0xff]  ;;  %v4628_v30 = vsel %vm3020_vm15, %v11616_v17, 0.0 }
 0x87c   :  { %8310 = vtanh.f32 %v5901_v24  ;;  %v6193_v14 = vadd.f32 %v6146_v19, %v11602_v31  ;;  %v6195_v47 = vadd.f32 %v6187_v25, %v11603_v10  ;;  %v6148_v57 = vpop.f32.mrb[94].mxu0  ;;  %v6189_v51 = vpop.f32.mrb[94].mxu1  ;;  %v11618_v24 = vld [vmem:[#allocation58_spill] sm:$0xff]  ;;  %v2371_v58 = vsel %vm2370_vm13, %v11617_v43, 0.0 }
 0x87d   :  { %v7493_v12 = vmul.f32 -1.442695, %v6192_v5  ;;  %v6149_v49 = vpop.f32.mrb[95].mxu0  ;;  %v6190_v36 = vpop.f32.mrb[95].mxu1  ;;  %v7582_v8 = vpack.c.bf16 %v11618_v24, %v11617_v43 }
 0x87e   :  { %v7494_v33 = vmul.f32 -1.442695, %v6193_v14  ;;  %v7495_v35 = vmul.f32 -1.442695, %v6195_v47 }
 0x87f   :  { %8312 = vpow2.f32 %v7493_v12 }
 0x880   :  { %8314 = vpow2.f32 %v7494_v33 }
 0x881   :  { %8316 = vpow2.f32 %v7495_v35  ;;  %v7513_v35 = vld [vmem:[%s11315_s8] ss:$0 sm:$0xff] }
 0x882   :  { %8318 = vtanh.f32 %v6194_v53 }
 0x886   :  { %v8311_v38 = vpop.eup %8310 }
 0x887   :  { %v11112_v6 = vmul.f32 %v8311_v38, %v8309_v34 }
 0x889   :  { %v8313_v62 = vpop.eup %8312  ;;  %v7585_v4 = vpack.c.bf16 %v11112_v6, %v11005_v40  ;;  %v5904_v42 = vsel %vm1721_vm10, %v11112_v6, 0.0  ;;  %v7514_v6 = vld [vmem:[%s11318_s10] ss:$0 sm:$0xff] }
 0x88a   :  { %v8315_v50 = vpop.eup %8314  ;;  %v6199_v26 = vadd.f32 1.0, %v8313_v62 }
 0x88b   :  { %v6205_v16 = vadd.f32 1.0, %v8315_v50  ;;  %v8317_v45 = vpop.eup %8316 }
 0x88c   :  { %8320 = vrcp.f32 %v6199_v26  ;;  %v8319_v27 = vpop.eup %8318  ;;  %v6212_v44 = vadd.f32 1.0, %v8317_v45 }
 0x88d   :  { %8322 = vrcp.f32 %v6205_v16 }
 0x88e   :  { %8324 = vrcp.f32 %v6212_v44 }
 0x896   :  { %v8321_v21 = vpop.eup %8320 }
 0x897   :  { %v8323_v61 = vpop.eup %8322  ;;  %v6216_v9 = vmul.f32 %v8321_v21, %v8319_v27 }
 0x898   :  { %v6215_v18 = vmul.f32 %v8323_v61, %v11033_v56  ;;  %v8325_v41 = vpop.eup %8324  ;;  %v11607_v56 = vld [vmem:[#allocation75_spill] sm:$0xff] }
 0x899   :  { %v7570_v0 = vpack.c.bf16 %v11607_v56, %v10943_v3 }
 0x89a   :  { %v6217_v11 = vadd.f32 %v6216_v9, %v6215_v18 }
 0x89c   :  { %8326 = vtanh.f32 %v6217_v11 }
 0x8a6   :  { %v8327_v60 = vpop.eup %8326 }
 0x8a7   :  { %v11115_v23 = vmul.f32 %v8327_v60, %v8325_v41 }
 0x8a9   :  { %v7564_v39 = vpack.c.bf16 %v11047_v20, %v11115_v23 }
 0x8ab   :  { %7565 = vmatprep.mubr.msk.bf16.mxu0 %vm7563_vm1, %v7564_v39 }
 0x8ac   :  { %7568 = vmatmul.mubr.msk.bf16.vlgmr.msra.gmra.mrb[96].mxu0 %vm7563_vm1, %v7567_v63  ;;  %vm7581_vm1 = vmpackc.low %vm1721_vm10, %vm2370_vm13 }
 0x8ad   :  { %7571 = vmatprep.mubr.msk.bf16.mxu0 %vm7569_vm4, %v7570_v0 }
 0x8b4   :  { %7574 = vmatmul.mubr.msk.bf16.gmra.mrb[100].mxu0 %vm7569_vm4, %v7573_v48  ;;  %vm6493_vm4 = vcmask 7168  }
 0x8b5   :  { %7577 = vmatprep.mubr.msk.bf16.mxu0 %vm7575_vm8, %v7576_v55 }
 0x8bc   :  { %7580 = vmatmul.mubr.msk.bf16.gmra.mrb[104].mxu0 %vm7575_vm8, %v7579_v2 }
 0x8bd   :  { %7583 = vmatprep.mubr.msk.bf16.mxu0 %vm7581_vm1, %v7582_v8 }
 0x8c4   :  { %7586 = vmatmul.mubr.msk.bf16.gmra.mrb[108].mxu0 %vm7581_vm1, %v7585_v4 }
 0x97f   :  { %v7603_v5 = vpop.f32.mrb[96].mxu0 }
 0x980   :  { %v7604_v53 = vpop.f32.mrb[97].mxu0 }
 0x981   :  { %v7605_v19 = vadd.f32 %v7604_v53, %v7603_v5  ;;  %v7606_v25 = vpop.f32.mrb[98].mxu0 }
 0x982   :  { %v7607_v31 = vpop.f32.mrb[99].mxu0 }
 0x983   :  { %v6416_v14 = vadd.f32 %v7605_v19, %v7496_v7  ;;  %v7608_v10 = vadd.f32 %v7607_v31, %v7606_v25 }
 0x985   :  { %8328 = vtanh.f32 %v6416_v14  ;;  %v6419_v47 = vadd.f32 %v7608_v10, %v7496_v7 }
 0x987   :  { %8330 = vtanh.f32 %v6419_v47  ;;  %v7609_v57 = vpop.f32.mrb[100].mxu0 }
 0x988   :  { %v7610_v51 = vpop.f32.mrb[101].mxu0 }
 0x989   :  { %v7611_v12 = vadd.f32 %v7610_v51, %v7609_v57  ;;  %v7612_v49 = vpop.f32.mrb[102].mxu0  ;;  %v8056_v57 = vld [vmem:[%s11316_s9 + $0x40] sm:$0xff]   ;;  %v8058_v51 = vld [vmem:[%s11316_s9 + $0x48] sm:$0xff]  }
 0x98a   :  { %v7613_v36 = vpop.f32.mrb[103].mxu0  ;;  %7627 = vmatprep.subr.bf16.mxu1 %v8056_v57 }
 0x98b   :  { %v6424_v33 = vadd.f32 %v7611_v12, %v7496_v7  ;;  %v7614_v34 = vadd.f32 %v7613_v36, %v7612_v49  ;;  %v8059_v12 = vld [vmem:[%s11316_s9 + $0x8] sm:$0xff]   ;;  %v8060_v49 = vld [vmem:[%s11316_s9 + $0x50] sm:$0xff]  }
 0x98d   :  { %8332 = vtanh.f32 %v6424_v33  ;;  %v6427_v38 = vadd.f32 %v7614_v34, %v7496_v7 }
 0x98f   :  { %v8329_v62 = vpop.eup %8328  ;;  %8334 = vtanh.f32 %v6427_v38  ;;  %v7615_v50 = vpop.f32.mrb[104].mxu0 }
 0x990   :  { %v7616_v26 = vpop.f32.mrb[105].mxu0  ;;  %v6461_v16 = vmul.f32 %v8329_v62, %v7513_v35 }
 0x991   :  { %v8331_v45 = vpop.eup %8330  ;;  %v7617_v27 = vadd.f32 %v7616_v26, %v7615_v50  ;;  %v7618_v21 = vpop.f32.mrb[106].mxu0  ;;  %v11620_v50 = vld [vmem:[#allocation6_spill] sm:$0xff] }
 0x992   :  { %v7619_v61 = vpop.f32.mrb[107].mxu0  ;;  %6469 = vadd.xlane.f32.xlu0 %v6461_v16  ;;  %v6462_v9 = vmul.f32 %v8331_v45, %v7513_v35  ;;  %vm11621_vm8 = vcmp.gt.s32.totalorder %v11620_v50, 6  ;;  %vm11622_vm1 = vcmp.gt.s32.totalorder %v11620_v50, 7  ;;  %v8061_v50 = vld [vmem:[%s11316_s9 + $0x10] sm:$0xff]  }
 0x993   :  { %v6432_v44 = vadd.f32 %v7617_v27, %v7496_v7  ;;  %v7620_v18 = vadd.f32 %v7619_v61, %v7618_v21 }
 0x994   :  { %6471 = vadd.xlane.f32.xlu1 %v6462_v9 }
 0x995   :  { %8336 = vtanh.f32 %v6432_v44  ;;  %v6435_v11 = vadd.f32 %v7620_v18, %v7496_v7 }
 0x997   :  { %v8333_v41 = vpop.eup %8332  ;;  %8338 = vtanh.f32 %v6435_v11  ;;  %v7621_v60 = vpop.f32.mrb[108].mxu0 }
 0x998   :  { %v7622_v39 = vpop.f32.mrb[109].mxu0  ;;  %v6463_v15 = vmul.f32 %v8333_v41, %v7513_v35 }
 0x999   :  { %v8335_v63 = vpop.eup %8334  ;;  %v7623_v0 = vadd.f32 %v7622_v39, %v7621_v60  ;;  %v7624_v48 = vpop.f32.mrb[110].mxu0 }
 0x99a   :  { %v7625_v55 = vpop.f32.mrb[111].mxu0  ;;  %6473 = vadd.xlane.f32.xlu0 %v6463_v15  ;;  %v6464_v8 = vmul.f32 %v8335_v63, %v7513_v35 }
 0x99b   :  { %v6440_v2 = vadd.f32 %v7623_v0, %v7496_v7  ;;  %v7626_v24 = vadd.f32 %v7625_v55, %v7624_v48 }
 0x99d   :  { %8340 = vtanh.f32 %v6440_v2  ;;  %v6443_v4 = vadd.f32 %v7626_v24, %v7496_v7  ;;  %v8057_v7 = vld [vmem:[%s11316_s9] sm:$0xff]  }
 0x99e   :  { %6475 = vadd.xlane.f32.xlu0 %v6464_v8  ;;  %7628 = vmatpush3.bf16.msra.mxu1 %v8057_v7 }
 0x99f   :  { %v8337_v5 = vpop.eup %8336  ;;  %8342 = vtanh.f32 %v6443_v4  ;;  %7629 = vmatprep.subr.bf16.mxu1 %v8058_v51 }
 0x9a0   :  { %v6465_v53 = vmul.f32 %v8337_v5, %v7513_v35 }
 0x9a1   :  { %v8339_v19 = vpop.eup %8338 }
 0x9a2   :  { %6477 = vadd.xlane.f32.xlu1 %v6465_v53  ;;  %v6466_v25 = vmul.f32 %v8339_v19, %v7513_v35  ;;  %7630 = vmatpush3.bf16.msra.mxu1 %v8059_v12 }
 0x9a3   :  { %7631 = vmatprep.subr.bf16.mxu1 %v8060_v49 }
 0x9a4   :  { %6479 = vadd.xlane.f32.xlu0 %v6466_v25 }
 0x9a6   :  { %7632 = vmatpush3.bf16.msra.mxu1 %v8061_v50 }
 0x9a7   :  { %v8341_v31 = vpop.eup %8340 }
 0x9a8   :  { %v6467_v14 = vmul.f32 %v8341_v31, %v7513_v35 }
 0x9a9   :  { %v8343_v10 = vpop.eup %8342 }
 0x9aa   :  { %6481 = vadd.xlane.f32.xlu1 %v6467_v14  ;;  %v6468_v47 = vmul.f32 %v8343_v10, %v7513_v35 }
 0x9ac   :  { %6483 = vadd.xlane.f32.xlu0 %v6468_v47 }
 0xa1f   :  { %v6470_v36 = vpop.xlane.xlu0 %6469 }
 0xa20   :  { %v6485_v27 = vsel %vm1071_vm0, %v6470_v36, -1e+30 }
 0xa21   :  { %v6472_v38 = vpop.xlane.xlu1 %6471  ;;  %v6494_v0 = vsel %vm6493_vm4, %v6485_v27, -inf }
 0xa22   :  { %v6486_v16 = vsel %vm1737_vm2, %v6472_v38, -1e+30 }
 0xa23   :  { %v6495_v11 = vsel %vm6493_vm4, %v6486_v16, -inf }
 0xa27   :  { %v6474_v33 = vpop.xlane.xlu0 %6473 }
 0xa28   :  { %v6487_v9 = vsel %vm2387_vm3, %v6474_v33, -1e+30 }
 0xa29   :  { %v6496_v48 = vsel %vm6493_vm4, %v6487_v9, -inf }
 0xa2b   :  { %v6476_v34 = vpop.xlane.xlu0 %6475 }
 0xa2c   :  { %v6488_v44 = vsel %vm3037_vm5, %v6476_v34, -1e+30 }
 0xa2d   :  { %v6497_v55 = vsel %vm6493_vm4, %v6488_v44, -inf }
 0xa2f   :  { %v6478_v62 = vpop.xlane.xlu1 %6477 }
 0xa30   :  { %v6489_v45 = vsel %vm3362_vm7, %v6478_v62, -1e+30 }
 0xa31   :  { %v6480_v35 = vpop.xlane.xlu0 %6479  ;;  %v6498_v41 = vsel %vm6493_vm4, %v6489_v45, -inf }
 0xa32   :  { %v6490_v26 = vsel %vm2712_vm6, %v6480_v35, -1e+30  ;;  %v6499_v24 = vmax.f32 %v6494_v0, %v6498_v41 }
 0xa33   :  { %v6500_v21 = vsel %vm6493_vm4, %v6490_v26, -inf }
 0xa34   :  { %v6501_v15 = vmax.f32 %v6495_v11, %v6500_v21 }
 0xa36   :  { %v6506_v5 = vmax.f32 %v6499_v24, %v6501_v15 }
 0xa37   :  { %v6482_v61 = vpop.xlane.xlu1 %6481 }
 0xa38   :  { %v6491_v18 = vsel %vm11621_vm8, %v6482_v61, -1e+30 }
 0xa39   :  { %v6502_v60 = vsel %vm6493_vm4, %v6491_v18, -inf  ;;  %v6484_v39 = vpop.xlane.xlu0 %6483 }
 0xa3a   :  { %v6492_v63 = vsel %vm11622_vm1, %v6484_v39, -1e+30  ;;  %v6503_v8 = vmax.f32 %v6496_v48, %v6502_v60 }
 0xa3b   :  { %v6504_v2 = vsel %vm6493_vm4, %v6492_v63, -inf }
 0xa3c   :  { %v6505_v4 = vmax.f32 %v6497_v55, %v6504_v2 }
 0xa3e   :  { %v6507_v53 = vmax.f32 %v6503_v8, %v6505_v4 }
 0xa40   :  { %v6508_v19 = vmax.f32 %v6506_v5, %v6507_v53 }
 0xa42   :  { %v6509_v25 = vsub.f32 %v6470_v36, %v6508_v19  ;;  %v6510_v31 = vsub.f32 %v6472_v38, %v6508_v19  ;;  %v6511_v14 = vsub.f32 %v6474_v33, %v6508_v19  ;;  %v6512_v10 = vsub.f32 %v6476_v34, %v6508_v19 }
 0xa43   :  { %v6513_v47 = vsub.f32 %v6478_v62, %v6508_v19  ;;  %v6514_v57 = vsub.f32 %v6480_v35, %v6508_v19  ;;  %v6515_v49 = vsub.f32 %v6482_v61, %v6508_v19  ;;  %v6516_v45 = vsub.f32 %v6484_v39, %v6508_v19 }
 0xa44   :  { %v6517_v7 = vmul.f32 1.442695, %v6509_v25  ;;  %v6519_v51 = vmul.f32 1.442695, %v6510_v31  ;;  %v6521_v12 = vmul.f32 1.442695, %v6511_v14 }
 0xa45   :  { %v6523_v26 = vmul.f32 1.442695, %v6512_v10  ;;  %v6525_v16 = vmul.f32 1.442695, %v6513_v47  ;;  %v6527_v27 = vmul.f32 1.442695, %v6514_v57 }
 0xa46   :  { %8344 = vpow2.f32 %v6517_v7  ;;  %v6529_v21 = vmul.f32 1.442695, %v6515_v49  ;;  %v6531_v36 = vmul.f32 1.442695, %v6516_v45  ;;  %v8062_v45 = vld [vmem:[%s11316_s9 + $0x58] sm:$0xff]  }
 0xa47   :  { %8346 = vpow2.f32 %v6519_v51  ;;  %7633 = vmatprep.subr.bf16.mxu1 %v8062_v45 }
 0xa48   :  { %8348 = vpow2.f32 %v6521_v12 }
 0xa49   :  { %8350 = vpow2.f32 %v6523_v26 }
 0xa4a   :  { %8352 = vpow2.f32 %v6525_v16 }
 0xa4b   :  { %8354 = vpow2.f32 %v6527_v27 }
 0xa4c   :  { %8356 = vpow2.f32 %v6529_v21 }
 0xa4d   :  { %8358 = vpow2.f32 %v6531_v36  ;;  %v8063_v36 = vld [vmem:[%s11316_s9 + $0x18] sm:$0xff]  }
 0xa4e   :  { %7634 = vmatpush3.bf16.msra.mxu1 %v8063_v36 }
 0xa50   :  { %v8345_v33 = vpop.eup %8344 }
 0xa51   :  { %v8347_v34 = vpop.eup %8346  ;;  %v6533_v38 = vsel %vm1071_vm0, %v8345_v33, 0.0  ;;  %vm11623_vm0 = vmmov %vm11621_vm8  ;;  %v8064_v33 = vld [vmem:[%s11316_s9 + $0x60] sm:$0xff]  }
 0xa52   :  { %v8349_v35 = vpop.eup %8348  ;;  %v6534_v62 = vsel %vm1737_vm2, %v8347_v34, 0.0  ;;  %v6541_v61 = vsel %vm6493_vm4, %v6533_v38, 0.0  ;;  %vm11624_vm2 = vmmov %vm11622_vm1  ;;  %7635 = vmatprep.subr.bf16.mxu1 %v8064_v33 }
 0xa53   :  { %v8351_v9 = vpop.eup %8350  ;;  %v6535_v44 = vsel %vm2387_vm3, %v8349_v35, 0.0  ;;  %v6542_v18 = vsel %vm6493_vm4, %v6534_v62, 0.0  ;;  %v8066_v35 = vld [vmem:[%s11316_s9 + $0x68] sm:$0xff]   ;;  %vm11625_vm3 = vcmp.eq.s32.totalorder %v11604_v28, 1 }
 0xa54   :  { %v8353_v11 = vpop.eup %8352  ;;  %v6536_v41 = vsel %vm3037_vm5, %v8351_v9, 0.0  ;;  %v6543_v60 = vadd.f32 %v6542_v18, %v6541_v61  ;;  %v6544_v15 = vsel %vm6493_vm4, %v6535_v44, 0.0  ;;  %v8067_v61 = vld [vmem:[%s11316_s9 + $0x28] sm:$0xff]   ;;  %v8068_v9 = vld [vmem:[%s11316_s9 + $0x70] sm:$0xff]   ;;  %v8070_v18 = vld [vmem:[%s11316_s9 + $0x78] sm:$0xff]  }
 0xa55   :  { %v8355_v39 = vpop.eup %8354  ;;  %v6537_v63 = vsel %vm3362_vm7, %v8353_v11, 0.0  ;;  %v6546_v55 = vsel %vm6493_vm4, %v6536_v41, 0.0  ;;  %v8071_v11 = vld [vmem:[%s11316_s9 + $0x38] sm:$0xff]  }
 0xa56   :  { %v6545_v0 = vadd.f32 %v6544_v15, %v6543_v60  ;;  %v8357_v48 = vpop.eup %8356  ;;  %v6538_v2 = vsel %vm2712_vm6, %v8355_v39, 0.0  ;;  %v6548_v4 = vsel %vm6493_vm4, %v6537_v63, 0.0  ;;  %v6220_v39 = vsel %vm11625_vm3, %v11115_v23, 0.0 }
 0xa57   :  { %v8359_v8 = vpop.eup %8358  ;;  %v6539_v5 = vsel %vm11623_vm0, %v8357_v48, 0.0  ;;  %v6550_v19 = vsel %vm6493_vm4, %v6538_v2, 0.0  ;;  %v2046_v48 = vsel %vm2045_vm12, %v11606_v52, 0.0  ;;  %v4309_v52 = vsel %vm3345_vm9, %v11607_v56, 0.0 }
 0xa58   :  { %v6547_v24 = vadd.f32 %v6546_v55, %v6545_v0  ;;  %v6540_v25 = vsel %vm11624_vm2, %v8359_v8, 0.0  ;;  %v6552_v14 = vsel %vm6493_vm4, %v6539_v5, 0.0  ;;  %v2696_v8 = vsel %vm2695_vm14, %v11609_v1, 0.0 }
 0xa59   :  { %v6554_v47 = vsel %vm6493_vm4, %v6540_v25, 0.0  ;;  %v3021_v56 = vsel %vm3020_vm15, %v11612_v29, 0.0 }
 0xa5a   :  { %v6549_v53 = vadd.f32 %v6548_v4, %v6547_v24 }
 0xa5c   :  { %v6551_v31 = vadd.f32 %v6550_v19, %v6549_v53 }
 0xa5e   :  { %v6553_v10 = vadd.f32 %v6552_v14, %v6551_v31 }
 0xa60   :  { %v6555_v57 = vadd.f32 %v6554_v47, %v6553_v10  ;;  %v3990_v10 = vsel %vm3670_vm11, %v11615_v54, 0.0  ;;  %v5266_v54 = vsel %vm2370_vm13, %v11005_v40, 0.0 }
 0xa62   :  { %v6556_v7 = vmax.f32 %v6555_v57, 1e-30 }
 0xa64   :  { %8360 = vrcp.f32 %v6556_v7 }
 0xa6e   :  { %v8361_v51 = vpop.eup %8360 }
 0xa6f   :  { %v6559_v12 = vmul.f32 %v8361_v51, %v6534_v62  ;;  %v6558_v49 = vmul.f32 %v8361_v51, %v6533_v38  ;;  %v6562_v26 = vmul.f32 %v8361_v51, %v6537_v63  ;;  %v6560_v16 = vmul.f32 %v8361_v51, %v6535_v44  ;;  %v8065_v38 = vld [vmem:[%s11316_s9 + $0x20] sm:$0xff]   ;;  %v8069_v44 = vld [vmem:[%s11316_s9 + $0x30] sm:$0xff]  }
 0xa70   :  { %v6564_v27 = vmul.f32 %v8361_v51, %v6539_v5  ;;  %v6561_v21 = vmul.f32 %v8361_v51, %v6536_v41  ;;  %v6563_v34 = vmul.f32 %v8361_v51, %v6538_v2  ;;  %7636 = vmatpush3.bf16.msra.mxu1 %v8065_v38  ;;  %v6565_v62 = vmul.f32 %v8361_v51, %v6540_v25  ;;  %v11626_v2 = vld [vmem:[#allocation63_spill] sm:$0xff] }
 0xa71   :  { %6573 = vperm.xlu0 %7650, %v6559_v12   ;;  %6568 = vperm.xlu1 %7651, %v6558_v49   ;;  %v5585_v41 = vsel %vm2045_vm12, %v11047_v20, 0.0  ;;  %v4947_v20 = vsel %vm2695_vm14, %v10943_v3, 0.0  ;;  %v3671_v3 = vsel %vm3670_vm11, %v11611_v37, 0.0 }
 0xa72   :  { %7637 = vmatprep.subr.bf16.mxu1 %v8066_v35 }
 0xa74   :  { %7638 = vmatpush3.bf16.msra.mxu1 %v8067_v61 }
 0xa75   :  { %6588 = vperm.xlu0 %7650, %v6562_v26   ;;  %6578 = vperm.xlu1 %7651, %v6560_v16  }
 0xa76   :  { %7639 = vmatprep.subr.bf16.mxu1 %v8068_v9 }
 0xa78   :  { %7640 = vmatpush3.bf16.msra.mxu1 %v8069_v44 }
 0xa79   :  { %6598 = vperm.xlu0 %7650, %v6564_v27   ;;  %6583 = vperm.xlu1 %7651, %v6561_v21  }
 0xa7a   :  { %7641 = vmatprep.subr.bf16.mxu1 %v8070_v18 }
 0xa7c   :  { %7642 = vmatpush3.bf16.msra.mxu1 %v8071_v11 }
 0xa7d   :  { %6593 = vperm.xlu1 %7651, %v6563_v34   ;;  %v11627_v34 = vld [vmem:[#allocation77_spill] sm:$0xff] }
 0xa81   :  { %6603 = vperm.xlu1 %7651, %v6565_v62  }
 0xaf0   :  { %v6574_v60 = vpop.permute.xlu0 %6573  ;;  %v6569_v15 = vpop.permute.xlu1 %6568 }
 0xaf1   :  { %v6622_v63 = vmul.f32 %v6574_v60, %v5585_v41  ;;  %v6621_v0 = vmul.f32 %v6569_v15, %v6220_v39  ;;  %v6607_v55 = vmul.f32 %v6574_v60, %v2046_v48  ;;  %v6606_v24 = vmul.f32 %v6569_v15, %v11626_v2 }
 0xaf3   :  { %v6629_v23 = vadd.f32 %v6622_v63, %v6621_v0  ;;  %v6614_v19 = vadd.f32 %v6607_v55, %v6606_v24 }
 0xaf4   :  { %v6579_v28 = vpop.permute.xlu1 %6578  ;;  %v6589_v53 = vpop.permute.xlu0 %6588 }
 0xaf5   :  { %v6608_v4 = vmul.f32 %v6579_v28, %v2696_v8  ;;  %v6623_v5 = vmul.f32 %v6579_v28, %v4947_v20  ;;  %v6610_v47 = vmul.f32 %v6589_v53, %v3990_v10  ;;  %v6625_v57 = vmul.f32 %v6589_v53, %v3671_v3 }
 0xaf7   :  { %v6630_v25 = vadd.f32 %v6629_v23, %v6623_v5  ;;  %v6615_v31 = vadd.f32 %v6614_v19, %v6608_v4 }
 0xaf8   :  { %v6584_v1 = vpop.permute.xlu1 %6583  ;;  %v6599_v51 = vpop.permute.xlu0 %6598 }
 0xaf9   :  { %v6609_v14 = vmul.f32 %v6584_v1, %v3346_v46  ;;  %v6624_v22 = vmul.f32 %v6584_v1, %v4309_v52  ;;  %v6612_v50 = vmul.f32 %v6599_v51, %v5266_v54  ;;  %v6627_v45 = vmul.f32 %v6599_v51, %v2371_v58 }
 0xafb   :  { %v6616_v7 = vadd.f32 %v6615_v31, %v6609_v14  ;;  %v6631_v13 = vadd.f32 %v6630_v25, %v6624_v22 }
 0xafc   :  { %v6594_v12 = vpop.permute.xlu1 %6593 }
 0xafd   :  { %v6617_v49 = vadd.f32 %v6616_v7, %v6610_v47  ;;  %v6632_v37 = vadd.f32 %v6631_v13, %v6625_v57  ;;  %v6611_v26 = vmul.f32 %v6594_v12, %v4628_v30  ;;  %v6626_v16 = vmul.f32 %v6594_v12, %v3021_v56 }
 0xaff   :  { %v6618_v29 = vadd.f32 %v6617_v49, %v6611_v26  ;;  %v6633_v27 = vadd.f32 %v6632_v37, %v6626_v16 }
 0xb00   :  { %v6604_v17 = vpop.permute.xlu1 %6603 }
 0xb01   :  { %v6619_v21 = vadd.f32 %v6618_v29, %v6612_v50  ;;  %v6634_v36 = vadd.f32 %v6633_v27, %v6627_v45  ;;  %v6613_v33 = vmul.f32 %v6604_v17, %v5904_v42  ;;  %v6628_v38 = vmul.f32 %v6604_v17, %v11627_v34 }
 0xb03   :  { %v6620_v35 = vadd.f32 %v6619_v21, %v6613_v33  ;;  %v6635_v43 = vadd.f32 %v6634_v36, %v6628_v38 }
 0xb05   :  { %v6636_v62 = vpack.c.bf16 %v6620_v35, %v6620_v35  ;;  %6814 = vst [vmem:[%s11317_s12] sm:$0xff] %v6620_v35  ;;  %6815 = vst [vmem:[%s11317_s12 + $0x8] sm:$0xff] %v6635_v43  ;;  %v6637_v32 = vpack.c.bf16 %v6635_v43, %v6635_v43 }
 0xb07   :  { %6805 = vmatprep.mubr.bf16.mxu1 %v6637_v32 }
 0xb08   :  { %6806 = vmatmul.mubr.bf16.vlgmr.msra.gmra.mrb[96].mxu1 %v6636_v62 }
 0xbdb   :  { %v7643_v40 = vpop.f32.mrb[96].mxu1 }
 0xbdc   :  { %v7644_v59 = vpop.f32.mrb[97].mxu1 }
 0xbdd   :  { %v7645_v61 = vadd.f32 %v7644_v59, %v7643_v40  ;;  %v7646_v9 = vpop.f32.mrb[98].mxu1 }
 0xbde   :  { %v7647_v44 = vpop.f32.mrb[99].mxu1 }
 0xbdf   :  { %v6808_v18 = vadd.f32 %v7645_v61, %v7514_v6 }
 0xbe1   :  { %6813 = vst [vmem:[%s11319_s11] sm:$0xff] %v6808_v18 }

</bundles_post_ra>
